<compile_context>
chip_gen: v5e
topology: v5e:2x2
jax: 0.10.0
libtpu: 0.0.40
codegen_flags: <defaults>
</compile_context>

<pallas_src>
import jax
import jax.numpy as jnp
import numpy as np
from jax.experimental import pallas as pl
from jax.experimental.pallas import tpu as pltpu

EPS = 1e-6
ACT_NUM = 3
KS = 2 * ACT_NUM + 1   # 7x7 depthwise activation kernel
PAD = KS // 2          # 3
LPAD = 8               # left pad of pooled buffer (sublane aligned, >= PAD)


def _round_up(x, m):
    return ((x + m - 1) // m) * m


def block_kernel(x_ref, w_ref, b_ref, dw_ref, ab_ref, o_ref, padbuf):
    """One batch element per (sequential) grid step.

    x_ref : (1, 4*Hp*Wp, Cin) bf16  four 2x2-pool phases stacked on the M axis
    w_ref : (Cin, Cout)        bf16  fused conv1+BN1 -> conv2+BN2 weight
    b_ref : (1, Cout)          f32   fused bias
    dw_ref: (KS, KS, Cout)     f32   depthwise 7x7 weights, act-BN scale folded
    ab_ref: (1, Cout)          f32   act-BN bias
    o_ref : (1, Hp, Wp, Cout)  bf16  output (post-pool spatial size)
    padbuf: VMEM (Hp+2*PAD, WPAD, Cout) f32  zero-bordered pooled map (scratch)
    """
    Hp, Wp, Cout = o_ref.shape[1], o_ref.shape[2], o_ref.shape[3]
    WPAD = padbuf.shape[1]

    # ---- one-shot halo zero: the grid runs sequentially ("arbitrary") on one
    # TensorCore and the interior is fully overwritten every step, so the zero
    # border of the persistent scratch only needs to be written once.
    @pl.when(pl.program_id(0) == 0)
    def _init():
        padbuf[...] = jnp.zeros_like(padbuf)

    # ---- fused 1x1 conv: a single M = 4*Hp*Wp matmul on the MXU (one RHS
    # push, one pipeline fill/drain), then 2x2 max-pool + bias + ReLU on the
    # register-resident per-phase results.  No pre-pool map is ever stored.
    m4 = jnp.dot(x_ref[0], w_ref[...], preferred_element_type=jnp.float32)
    m = jnp.max(m4.reshape(4, Hp * Wp, Cout), axis=0)          # pool phases
    pooled = jnp.maximum(m + b_ref[...], 0.0)                  # bias + ReLU

    # sublane-aligned interior write (column offset LPAD = 8, width Wp).
    padbuf[pl.ds(PAD, Hp), pl.ds(LPAD, Wp), :] = pooled.reshape(Hp, Wp, Cout)

    # ---- depthwise 7x7 conv (groups=Cout, padding=3), BN scale pre-folded.
    # Fully unrolled 7x7 taps; per kernel row ONE aligned full-width slab load,
    # column shifts via pltpu.roll (XLU) + static aligned slice, tap weights
    # hoisted into a single table load.
    dw = dw_ref[...]                                           # (KS, KS, Cout)
    acc = jnp.zeros((Hp, Wp, Cout), jnp.float32)
    for dy in range(KS):                                       # static unroll
        slab = padbuf[pl.ds(dy, Hp), :, :]                     # (Hp, WPAD, Cout)
        for dx in range(KS):                                   # static unroll
            if dx == PAD:
                win = slab[:, LPAD:LPAD + Wp, :]
            else:
                shifted = pltpu.roll(slab, shift=(PAD - dx) % WPAD, axis=1)
                win = shifted[:, LPAD:LPAD + Wp, :]
            w_tap = dw[dy, dx, :]                              # (Cout,)
            acc = acc + win * w_tap
    o_ref[0] = (acc + ab_ref[...]).astype(o_ref.dtype)


def init_params(key, dim, dim_out):
    ks = jax.random.split(key, 16)
    p = {}
    p["conv1_w"] = jax.random.normal(ks[0], (dim, dim, 1, 1), jnp.float32) / np.sqrt(dim)
    p["conv1_b"] = 0.1 * jax.random.normal(ks[1], (dim,), jnp.float32)
    p["bn1_g"] = 1.0 + 0.1 * jax.random.normal(ks[2], (dim,), jnp.float32)
    p["bn1_b"] = 0.1 * jax.random.normal(ks[3], (dim,), jnp.float32)
    p["bn1_rm"] = 0.1 * jax.random.normal(ks[4], (dim,), jnp.float32)
    p["bn1_rv"] = 0.5 + jnp.abs(jax.random.normal(ks[5], (dim,), jnp.float32))
    p["conv2_w"] = jax.random.normal(ks[6], (dim_out, dim, 1, 1), jnp.float32) / np.sqrt(dim)
    p["conv2_b"] = 0.1 * jax.random.normal(ks[7], (dim_out,), jnp.float32)
    p["bn2_g"] = 1.0 + 0.1 * jax.random.normal(ks[8], (dim_out,), jnp.float32)
    p["bn2_b"] = 0.1 * jax.random.normal(ks[9], (dim_out,), jnp.float32)
    p["bn2_rm"] = 0.1 * jax.random.normal(ks[10], (dim_out,), jnp.float32)
    p["bn2_rv"] = 0.5 + jnp.abs(jax.random.normal(ks[11], (dim_out,), jnp.float32))
    p["act_w"] = 0.02 * jax.random.normal(ks[12], (dim_out, 1, KS, KS), jnp.float32)
    p["act_bn_g"] = 1.0 + 0.1 * jax.random.normal(ks[13], (dim_out,), jnp.float32)
    p["act_bn_b"] = 0.1 * jax.random.normal(ks[14], (dim_out,), jnp.float32)
    p["act_bn_rm"] = 0.05 * jax.random.normal(ks[15], (dim_out,), jnp.float32)
    p["act_bn_rv"] = 0.8 * jnp.ones((dim_out,), jnp.float32)
    return p


def fuse_params(p, act_learn=1.0):
    """Fold eval-mode BNs into the convs and fuse conv1 -> conv2 (act_learn=1)."""
    hi = jax.lax.Precision.HIGHEST
    s1 = p["bn1_g"] / jnp.sqrt(p["bn1_rv"] + EPS)
    m1 = (p["conv1_w"][:, :, 0, 0] * s1[:, None]).T                 # (Cin, Cin)
    b1 = (p["conv1_b"] - p["bn1_rm"]) * s1 + p["bn1_b"]

    s2 = p["bn2_g"] / jnp.sqrt(p["bn2_rv"] + EPS)
    m2 = (p["conv2_w"][:, :, 0, 0] * s2[:, None]).T                 # (Cin, Cout)
    b2 = (p["conv2_b"] - p["bn2_rm"]) * s2 + p["bn2_b"]

    # leaky_relu with negative_slope == act_learn == 1 is the identity, so the
    # two 1x1 convs collapse into one matmul.  Only valid while act_learn == 1.
    assert act_learn == 1.0, "conv1/conv2 fusion requires act_learn == 1"
    w = jnp.matmul(m1, m2, precision=hi)                            # (Cin, Cout)
    b = jnp.matmul(b1, m2, precision=hi) + b2                       # (Cout,)

    s3 = p["act_bn_g"] / jnp.sqrt(p["act_bn_rv"] + EPS)
    dw = p["act_w"][:, 0, :, :] * s3[:, None, None]                 # (Cout, K, K)
    dw = jnp.transpose(dw, (1, 2, 0))                               # (K, K, Cout)
    ab = p["act_bn_b"] - p["act_bn_rm"] * s3
    return w, b[None, :], dw, ab[None, :]


def block_forward_pallas(x_nchw, p):
    B, C, H, W = x_nchw.shape
    assert H % 2 == 0 and W % 2 == 0, "MaxPool2d(2) path assumes even H, W"
    w, b, dw, ab = fuse_params(p)
    Cout = w.shape[1]
    Hp, Wp = H // 2, W // 2
    WPAD = _round_up(LPAD + Wp + PAD, 8)

    # NCHW -> NHWC, then stack the four 2x2 max-pool phases along the matmul M
    # axis so the kernel issues one big MXU matmul and pools in registers.
    # (Layout plumbing; see TODO at top for the NHWC end-to-end alternative.)
    x_nhwc = jnp.transpose(x_nchw, (0, 2, 3, 1))
    x4 = x_nhwc.reshape(B, Hp, 2, Wp, 2, C)
    x4 = jnp.transpose(x4, (0, 2, 4, 1, 3, 5)).reshape(B, 4 * Hp * Wp, C)

    # bf16 MXU inputs, f32 accumulation inside the kernel; bf16 output.
    x4 = x4.astype(jnp.bfloat16)
    w_bf = w.astype(jnp.bfloat16)

    # Explicit scoped-VMEM budget: double-buffered in/out blocks + persistent
    # scratch + weights, with 2x slack (v5e scoped default is only 16 MiB;
    # keeps headroom on v7x's 64 MiB physical VMEM).
    vmem_bytes = (
        2 * (4 * Hp * Wp * C) * 2            # input block (bf16), double buffered
        + 2 * (Hp * Wp * Cout) * 2           # output block (bf16), double buffered
        + (Hp + 2 * PAD) * WPAD * Cout * 4   # padbuf scratch (f32)
        + 2 * (C * Cout * 2 + KS * KS * Cout * 4 + 2 * Cout * 4))
    vmem_limit = int(min(100 * 2**20, max(32 * 2**20, 2 * vmem_bytes)))

    out = pl.pallas_call(
        block_kernel,
        out_shape=jax.ShapeDtypeStruct((B, Hp, Wp, Cout), jnp.bfloat16),
        grid_spec=pltpu.PrefetchScalarGridSpec(
            num_scalar_prefetch=0,
            grid=(B,),
            in_specs=[
                pl.BlockSpec((1, 4 * Hp * Wp, C), lambda bb: (bb, 0, 0)),
                pl.BlockSpec((C, Cout), lambda bb: (0, 0)),
                pl.BlockSpec((1, Cout), lambda bb: (0, 0)),
                pl.BlockSpec((KS, KS, Cout), lambda bb: (0, 0, 0)),
                pl.BlockSpec((1, Cout), lambda bb: (0, 0)),
            ],
            out_specs=pl.BlockSpec((1, Hp, Wp, Cout), lambda bb: (bb, 0, 0, 0)),
            scratch_shapes=[
                pltpu.VMEM((Hp + 2 * PAD, WPAD, Cout), jnp.float32),
            ],
        ),
        # Sequential grid: the persistent scratch halo is zeroed only at step 0.
        # (On v7x megacore, re-zero a shrunk halo per step and use ("parallel",)
        # to shard the batch across TensorCores.)
        compiler_params=pltpu.CompilerParams(
            dimension_semantics=("arbitrary",),
            vmem_limit_bytes=vmem_limit),
    )(x4, w_bf, b, dw, ab)

    # back to NCHW to match the PyTorch convention (bf16 output)
    return jnp.transpose(out, (0, 3, 1, 2))


def block_forward_ref(x, p):
    """Plain-JAX NCHW reference (eval-mode BN) for correctness checking."""
    def bn(y, g, b, rm, rv):
        inv = g / jnp.sqrt(rv + EPS)
        return (y - rm[None, :, None, None]) * inv[None, :, None, None] + b[None, :, None, None]

    hi = jax.lax.Precision.HIGHEST
    h = jnp.einsum("bchw,oc->bohw", x, p["conv1_w"][:, :, 0, 0], precision=hi)
    h = h + p["conv1_b"][None, :, None, None]
    h = bn(h, p["bn1_g"], p["bn1_b"], p["bn1_rm"], p["bn1_rv"])
    h = jnp.where(h >= 0, h, 1.0 * h)                      # leaky_relu, slope 1
    h = jnp.einsum("bchw,oc->bohw", h, p["conv2_w"][:, :, 0, 0], precision=hi)
    h = h + p["conv2_b"][None, :, None, None]
    h = bn(h, p["bn2_g"], p["bn2_b"], p["bn2_rm"], p["bn2_rv"])

    B, C, H, W = h.shape
    Hp, Wp = H // 2, W // 2
    h = h.reshape(B, C, Hp, 2, Wp, 2).max(axis=(3, 5))     # MaxPool2d(2)
    h = jnp.maximum(h, 0.0)                                # ReLU (activation)

    hp = jnp.pad(h, ((0, 0), (0, 0), (PAD, PAD), (PAD, PAD)))
    acc = jnp.zeros_like(h)
    for dy in range(KS):
        for dx in range(KS):
            acc = acc + hp[:, :, dy:dy + Hp, dx:dx + Wp] * \
                p["act_w"][None, :, 0, dy, dx, None, None]
    acc = bn(acc, p["act_bn_g"], p["act_bn_b"], p["act_bn_rm"], p["act_bn_rv"])
    return acc


if __name__ == "__main__":
    key = jax.random.PRNGKey(0)
    kx, kp = jax.random.split(key)
    dim, dim_out = 64, 128          # lane-dense channel counts (Cout == 128)
    B, H, W = 2, 16, 16

    x = jax.random.normal(kx, (B, dim, H, W), jnp.float32)
    params = init_params(kp, dim, dim_out)

    out = jax.block_until_ready(block_forward_pallas(x, params))

    ref = block_forward_ref(x, params)
    # bf16 MXU inputs (f32 accumulation) + bf16 output -> loosened tolerance.
    np.testing.assert_allclose(np.asarray(out.astype(jnp.float32)),
                               np.asarray(ref), rtol=2.5e-2, atol=2.5e-2)
    print("KERNEL_OK")
</pallas_src>

<mosaic_0001>
module attributes {stable_mosaic.version = 11 : i64} {
  func.func @block_kernel(%arg0: i32, %arg1: memref<1x256x64xbf16, #tpu.memory_space<vmem>>, %arg2: memref<64x128xbf16, #tpu.memory_space<vmem>>, %arg3: memref<1x128xf32, #tpu.memory_space<vmem>>, %arg4: memref<7x7x128xf32, #tpu.memory_space<vmem>>, %arg5: memref<1x128xf32, #tpu.memory_space<vmem>>, %arg6: memref<1x8x8x128xbf16, #tpu.memory_space<vmem>>, %arg7: memref<14x24x128xf32, #tpu.memory_space<vmem>>) attributes {dimension_semantics = [#tpu.dimension_semantics<arbitrary>], iteration_bounds = array<i64: 2>, scalar_prefetch = 0 : i64, scratch_operands = 1 : i64, tpu.core_type = #tpu.core_type<tc>, window_params = [{transform_indices = @transform_0, window_bounds = array<i64: 1, 256, 64>}, {pipeline_mode = #tpu.pipeline_mode<synchronous>, transform_indices = @transform_1, window_bounds = array<i64: 64, 128>}, {pipeline_mode = #tpu.pipeline_mode<synchronous>, transform_indices = @transform_2, window_bounds = array<i64: 1, 128>}, {pipeline_mode = #tpu.pipeline_mode<synchronous>, transform_indices = @transform_3, window_bounds = array<i64: 7, 7, 128>}, {pipeline_mode = #tpu.pipeline_mode<synchronous>, transform_indices = @transform_4, window_bounds = array<i64: 1, 128>}, {transform_indices = @transform_5, window_bounds = array<i64: 1, 8, 8, 128>}]} {
    %c0_i32 = arith.constant 0 : i32
    %0 = arith.cmpi eq, %arg0, %c0_i32 : i32
    %1 = arith.extui %0 : i1 to i32
    %c0_i32_0 = arith.constant 0 : i32
    %2 = arith.cmpi ne, %1, %c0_i32_0 : i32
    scf.if %2 {
      %cst_72 = arith.constant 0.000000e+00 : f32
      %418 = vector.broadcast %cst_72 : f32 to vector<14x24x128xf32>
      %c0_73 = arith.constant 0 : index
      %c0_74 = arith.constant 0 : index
      %c0_75 = arith.constant 0 : index
      %419 = vector.load %arg7[%c0_73, %c0_74, %c0_75] : memref<14x24x128xf32, #tpu.memory_space<vmem>>, vector<14x24x128xf32>
      tpu.vector_store %arg7[%c0_73, %c0_74, %c0_75], %418 {strides = array<i32>} : memref<14x24x128xf32, #tpu.memory_space<vmem>>, vector<14x24x128xf32>,
    } else {
    }
    %c0 = arith.constant 0 : index
    %c0_1 = arith.constant 0 : index
    %c0_2 = arith.constant 0 : index
    %3 = vector.load %arg1[%c0, %c0_1, %c0_2] : memref<1x256x64xbf16, #tpu.memory_space<vmem>>, vector<1x256x64xbf16>
    %4 = vector.shape_cast %3 : vector<1x256x64xbf16> to vector<256x64xbf16>
    %c0_3 = arith.constant 0 : index
    %c0_4 = arith.constant 0 : index
    %5 = vector.load %arg2[%c0_3, %c0_4] : memref<64x128xbf16, #tpu.memory_space<vmem>>, vector<64x128xbf16>
    %cst = arith.constant dense<0.000000e+00> : vector<256x128xf32>
    %6 = tpu.matmul %4, %5, %cst {dimension_numbers = #tpu.dot_dimension_numbers<[1], [0], [0], [1], [0, 0, 1, 1], [], []>} : vector<256x64xbf16>, vector<64x128xbf16>, vector<256x128xf32> -> vector<256x128xf32>
    %7 = vector.shape_cast %6 : vector<256x128xf32> to vector<4x64x128xf32>
    %cst_5 = arith.constant dense<0xFF800000> : vector<64x128xf32>
    %8 = vector.multi_reduction <maximumf>, %7, %cst_5 [0] : vector<4x64x128xf32> to vector<64x128xf32>
    %c0_6 = arith.constant 0 : index
    %c0_7 = arith.constant 0 : index
    %9 = vector.load %arg3[%c0_6, %c0_7] : memref<1x128xf32, #tpu.memory_space<vmem>>, vector<1x128xf32>
    %10 = vector.broadcast %9 : vector<1x128xf32> to vector<64x128xf32>
    %11 = arith.addf %8, %10 : vector<64x128xf32>
    %cst_8 = arith.constant 0.000000e+00 : f32
    %12 = vector.broadcast %cst_8 : f32 to vector<64x128xf32>
    %13 = arith.maximumf %11, %12 : vector<64x128xf32>
    %14 = vector.shape_cast %13 : vector<64x128xf32> to vector<8x8x128xf32>
    %c3 = arith.constant 3 : index
    %c8 = arith.constant 8 : index
    %c0_9 = arith.constant 0 : index
    %15 = vector.load %arg7[%c3, %c8, %c0_9] : memref<14x24x128xf32, #tpu.memory_space<vmem>>, vector<8x8x128xf32>
    tpu.vector_store %arg7[%c3, %c8, %c0_9], %14 {strides = array<i32>} : memref<14x24x128xf32, #tpu.memory_space<vmem>>, vector<8x8x128xf32>,
    %c0_10 = arith.constant 0 : index
    %c0_11 = arith.constant 0 : index
    %c0_12 = arith.constant 0 : index
    %16 = vector.load %arg4[%c0_10, %c0_11, %c0_12] : memref<7x7x128xf32, #tpu.memory_space<vmem>>, vector<7x7x128xf32>
    %cst_13 = arith.constant 0.000000e+00 : f32
    %17 = vector.broadcast %cst_13 : f32 to vector<8x8x128xf32>
    %c0_14 = arith.constant 0 : index
    %c0_15 = arith.constant 0 : index
    %c0_16 = arith.constant 0 : index
    %18 = vector.load %arg7[%c0_14, %c0_15, %c0_16] : memref<14x24x128xf32, #tpu.memory_space<vmem>>, vector<8x24x128xf32>
    %c3_i32 = arith.constant 3 : i32
    %19 = tpu.dynamic_rotate %18 by %c3_i32 dim 1 : vector<8x24x128xf32>, i32 -> vector<8x24x128xf32>
    %20 = vector.extract_strided_slice %19 {offsets = [0, 8, 0], sizes = [8, 8, 128], strides = [1, 1, 1]} : vector<8x24x128xf32> to vector<8x8x128xf32>
    %21 = vector.extract_strided_slice %16 {offsets = [0, 0, 0], sizes = [1, 1, 128], strides = [1, 1, 1]} : vector<7x7x128xf32> to vector<1x1x128xf32>
    %22 = vector.shape_cast %21 : vector<1x1x128xf32> to vector<128xf32>
    %23 = vector.shape_cast %22 : vector<128xf32> to vector<1x1x128xf32>
    %24 = vector.broadcast %23 : vector<1x1x128xf32> to vector<8x8x128xf32>
    %25 = arith.mulf %20, %24 : vector<8x8x128xf32>
    %26 = arith.addf %17, %25 : vector<8x8x128xf32>
    %c2_i32 = arith.constant 2 : i32
    %27 = tpu.dynamic_rotate %18 by %c2_i32 dim 1 : vector<8x24x128xf32>, i32 -> vector<8x24x128xf32>
    %28 = vector.extract_strided_slice %27 {offsets = [0, 8, 0], sizes = [8, 8, 128], strides = [1, 1, 1]} : vector<8x24x128xf32> to vector<8x8x128xf32>
    %29 = vector.extract_strided_slice %16 {offsets = [0, 1, 0], sizes = [1, 1, 128], strides = [1, 1, 1]} : vector<7x7x128xf32> to vector<1x1x128xf32>
    %30 = vector.shape_cast %29 : vector<1x1x128xf32> to vector<128xf32>
    %31 = vector.shape_cast %30 : vector<128xf32> to vector<1x1x128xf32>
    %32 = vector.broadcast %31 : vector<1x1x128xf32> to vector<8x8x128xf32>
    %33 = arith.mulf %28, %32 : vector<8x8x128xf32>
    %34 = arith.addf %26, %33 : vector<8x8x128xf32>
    %c1_i32 = arith.constant 1 : i32
    %35 = tpu.dynamic_rotate %18 by %c1_i32 dim 1 : vector<8x24x128xf32>, i32 -> vector<8x24x128xf32>
    %36 = vector.extract_strided_slice %35 {offsets = [0, 8, 0], sizes = [8, 8, 128], strides = [1, 1, 1]} : vector<8x24x128xf32> to vector<8x8x128xf32>
    %37 = vector.extract_strided_slice %16 {offsets = [0, 2, 0], sizes = [1, 1, 128], strides = [1, 1, 1]} : vector<7x7x128xf32> to vector<1x1x128xf32>
    %38 = vector.shape_cast %37 : vector<1x1x128xf32> to vector<128xf32>
    %39 = vector.shape_cast %38 : vector<128xf32> to vector<1x1x128xf32>
    %40 = vector.broadcast %39 : vector<1x1x128xf32> to vector<8x8x128xf32>
    %41 = arith.mulf %36, %40 : vector<8x8x128xf32>
    %42 = arith.addf %34, %41 : vector<8x8x128xf32>
    %43 = vector.extract_strided_slice %18 {offsets = [0, 8, 0], sizes = [8, 8, 128], strides = [1, 1, 1]} : vector<8x24x128xf32> to vector<8x8x128xf32>
    %44 = vector.extract_strided_slice %16 {offsets = [0, 3, 0], sizes = [1, 1, 128], strides = [1, 1, 1]} : vector<7x7x128xf32> to vector<1x1x128xf32>
    %45 = vector.shape_cast %44 : vector<1x1x128xf32> to vector<128xf32>
    %46 = vector.shape_cast %45 : vector<128xf32> to vector<1x1x128xf32>
    %47 = vector.broadcast %46 : vector<1x1x128xf32> to vector<8x8x128xf32>
    %48 = arith.mulf %43, %47 : vector<8x8x128xf32>
    %49 = arith.addf %42, %48 : vector<8x8x128xf32>
    %c23_i32 = arith.constant 23 : i32
    %50 = tpu.dynamic_rotate %18 by %c23_i32 dim 1 : vector<8x24x128xf32>, i32 -> vector<8x24x128xf32>
    %51 = vector.extract_strided_slice %50 {offsets = [0, 8, 0], sizes = [8, 8, 128], strides = [1, 1, 1]} : vector<8x24x128xf32> to vector<8x8x128xf32>
    %52 = vector.extract_strided_slice %16 {offsets = [0, 4, 0], sizes = [1, 1, 128], strides = [1, 1, 1]} : vector<7x7x128xf32> to vector<1x1x128xf32>
    %53 = vector.shape_cast %52 : vector<1x1x128xf32> to vector<128xf32>
    %54 = vector.shape_cast %53 : vector<128xf32> to vector<1x1x128xf32>
    %55 = vector.broadcast %54 : vector<1x1x128xf32> to vector<8x8x128xf32>
    %56 = arith.mulf %51, %55 : vector<8x8x128xf32>
    %57 = arith.addf %49, %56 : vector<8x8x128xf32>
    %c22_i32 = arith.constant 22 : i32
    %58 = tpu.dynamic_rotate %18 by %c22_i32 dim 1 : vector<8x24x128xf32>, i32 -> vector<8x24x128xf32>
    %59 = vector.extract_strided_slice %58 {offsets = [0, 8, 0], sizes = [8, 8, 128], strides = [1, 1, 1]} : vector<8x24x128xf32> to vector<8x8x128xf32>
    %60 = vector.extract_strided_slice %16 {offsets = [0, 5, 0], sizes = [1, 1, 128], strides = [1, 1, 1]} : vector<7x7x128xf32> to vector<1x1x128xf32>
    %61 = vector.shape_cast %60 : vector<1x1x128xf32> to vector<128xf32>
    %62 = vector.shape_cast %61 : vector<128xf32> to vector<1x1x128xf32>
    %63 = vector.broadcast %62 : vector<1x1x128xf32> to vector<8x8x128xf32>
    %64 = arith.mulf %59, %63 : vector<8x8x128xf32>
    %65 = arith.addf %57, %64 : vector<8x8x128xf32>
    %c21_i32 = arith.constant 21 : i32
    %66 = tpu.dynamic_rotate %18 by %c21_i32 dim 1 : vector<8x24x128xf32>, i32 -> vector<8x24x128xf32>
    %67 = vector.extract_strided_slice %66 {offsets = [0, 8, 0], sizes = [8, 8, 128], strides = [1, 1, 1]} : vector<8x24x128xf32> to vector<8x8x128xf32>
    %68 = vector.extract_strided_slice %16 {offsets = [0, 6, 0], sizes = [1, 1, 128], strides = [1, 1, 1]} : vector<7x7x128xf32> to vector<1x1x128xf32>
    %69 = vector.shape_cast %68 : vector<1x1x128xf32> to vector<128xf32>
    %70 = vector.shape_cast %69 : vector<128xf32> to vector<1x1x128xf32>
    %71 = vector.broadcast %70 : vector<1x1x128xf32> to vector<8x8x128xf32>
    %72 = arith.mulf %67, %71 : vector<8x8x128xf32>
    %73 = arith.addf %65, %72 : vector<8x8x128xf32>
    %c1 = arith.constant 1 : index
    %c0_17 = arith.constant 0 : index
    %c0_18 = arith.constant 0 : index
    %74 = vector.load %arg7[%c1, %c0_17, %c0_18] : memref<14x24x128xf32, #tpu.memory_space<vmem>>, vector<8x24x128xf32>
    %c3_i32_19 = arith.constant 3 : i32
    %75 = tpu.dynamic_rotate %74 by %c3_i32_19 dim 1 : vector<8x24x128xf32>, i32 -> vector<8x24x128xf32>
    %76 = vector.extract_strided_slice %75 {offsets = [0, 8, 0], sizes = [8, 8, 128], strides = [1, 1, 1]} : vector<8x24x128xf32> to vector<8x8x128xf32>
    %77 = vector.extract_strided_slice %16 {offsets = [1, 0, 0], sizes = [1, 1, 128], strides = [1, 1, 1]} : vector<7x7x128xf32> to vector<1x1x128xf32>
    %78 = vector.shape_cast %77 : vector<1x1x128xf32> to vector<128xf32>
    %79 = vector.shape_cast %78 : vector<128xf32> to vector<1x1x128xf32>
    %80 = vector.broadcast %79 : vector<1x1x128xf32> to vector<8x8x128xf32>
    %81 = arith.mulf %76, %80 : vector<8x8x128xf32>
    %82 = arith.addf %73, %81 : vector<8x8x128xf32>
    %c2_i32_20 = arith.constant 2 : i32
    %83 = tpu.dynamic_rotate %74 by %c2_i32_20 dim 1 : vector<8x24x128xf32>, i32 -> vector<8x24x128xf32>
    %84 = vector.extract_strided_slice %83 {offsets = [0, 8, 0], sizes = [8, 8, 128], strides = [1, 1, 1]} : vector<8x24x128xf32> to vector<8x8x128xf32>
    %85 = vector.extract_strided_slice %16 {offsets = [1, 1, 0], sizes = [1, 1, 128], strides = [1, 1, 1]} : vector<7x7x128xf32> to vector<1x1x128xf32>
    %86 = vector.shape_cast %85 : vector<1x1x128xf32> to vector<128xf32>
    %87 = vector.shape_cast %86 : vector<128xf32> to vector<1x1x128xf32>
    %88 = vector.broadcast %87 : vector<1x1x128xf32> to vector<8x8x128xf32>
    %89 = arith.mulf %84, %88 : vector<8x8x128xf32>
    %90 = arith.addf %82, %89 : vector<8x8x128xf32>
    %c1_i32_21 = arith.constant 1 : i32
    %91 = tpu.dynamic_rotate %74 by %c1_i32_21 dim 1 : vector<8x24x128xf32>, i32 -> vector<8x24x128xf32>
    %92 = vector.extract_strided_slice %91 {offsets = [0, 8, 0], sizes = [8, 8, 128], strides = [1, 1, 1]} : vector<8x24x128xf32> to vector<8x8x128xf32>
    %93 = vector.extract_strided_slice %16 {offsets = [1, 2, 0], sizes = [1, 1, 128], strides = [1, 1, 1]} : vector<7x7x128xf32> to vector<1x1x128xf32>
    %94 = vector.shape_cast %93 : vector<1x1x128xf32> to vector<128xf32>
    %95 = vector.shape_cast %94 : vector<128xf32> to vector<1x1x128xf32>
    %96 = vector.broadcast %95 : vector<1x1x128xf32> to vector<8x8x128xf32>
    %97 = arith.mulf %92, %96 : vector<8x8x128xf32>
    %98 = arith.addf %90, %97 : vector<8x8x128xf32>
    %99 = vector.extract_strided_slice %74 {offsets = [0, 8, 0], sizes = [8, 8, 128], strides = [1, 1, 1]} : vector<8x24x128xf32> to vector<8x8x128xf32>
    %100 = vector.extract_strided_slice %16 {offsets = [1, 3, 0], sizes = [1, 1, 128], strides = [1, 1, 1]} : vector<7x7x128xf32> to vector<1x1x128xf32>
    %101 = vector.shape_cast %100 : vector<1x1x128xf32> to vector<128xf32>
    %102 = vector.shape_cast %101 : vector<128xf32> to vector<1x1x128xf32>
    %103 = vector.broadcast %102 : vector<1x1x128xf32> to vector<8x8x128xf32>
    %104 = arith.mulf %99, %103 : vector<8x8x128xf32>
    %105 = arith.addf %98, %104 : vector<8x8x128xf32>
    %c23_i32_22 = arith.constant 23 : i32
    %106 = tpu.dynamic_rotate %74 by %c23_i32_22 dim 1 : vector<8x24x128xf32>, i32 -> vector<8x24x128xf32>
    %107 = vector.extract_strided_slice %106 {offsets = [0, 8, 0], sizes = [8, 8, 128], strides = [1, 1, 1]} : vector<8x24x128xf32> to vector<8x8x128xf32>
    %108 = vector.extract_strided_slice %16 {offsets = [1, 4, 0], sizes = [1, 1, 128], strides = [1, 1, 1]} : vector<7x7x128xf32> to vector<1x1x128xf32>
    %109 = vector.shape_cast %108 : vector<1x1x128xf32> to vector<128xf32>
    %110 = vector.shape_cast %109 : vector<128xf32> to vector<1x1x128xf32>
    %111 = vector.broadcast %110 : vector<1x1x128xf32> to vector<8x8x128xf32>
    %112 = arith.mulf %107, %111 : vector<8x8x128xf32>
    %113 = arith.addf %105, %112 : vector<8x8x128xf32>
    %c22_i32_23 = arith.constant 22 : i32
    %114 = tpu.dynamic_rotate %74 by %c22_i32_23 dim 1 : vector<8x24x128xf32>, i32 -> vector<8x24x128xf32>
    %115 = vector.extract_strided_slice %114 {offsets = [0, 8, 0], sizes = [8, 8, 128], strides = [1, 1, 1]} : vector<8x24x128xf32> to vector<8x8x128xf32>
    %116 = vector.extract_strided_slice %16 {offsets = [1, 5, 0], sizes = [1, 1, 128], strides = [1, 1, 1]} : vector<7x7x128xf32> to vector<1x1x128xf32>
    %117 = vector.shape_cast %116 : vector<1x1x128xf32> to vector<128xf32>
    %118 = vector.shape_cast %117 : vector<128xf32> to vector<1x1x128xf32>
    %119 = vector.broadcast %118 : vector<1x1x128xf32> to vector<8x8x128xf32>
    %120 = arith.mulf %115, %119 : vector<8x8x128xf32>
    %121 = arith.addf %113, %120 : vector<8x8x128xf32>
    %c21_i32_24 = arith.constant 21 : i32
    %122 = tpu.dynamic_rotate %74 by %c21_i32_24 dim 1 : vector<8x24x128xf32>, i32 -> vector<8x24x128xf32>
    %123 = vector.extract_strided_slice %122 {offsets = [0, 8, 0], sizes = [8, 8, 128], strides = [1, 1, 1]} : vector<8x24x128xf32> to vector<8x8x128xf32>
    %124 = vector.extract_strided_slice %16 {offsets = [1, 6, 0], sizes = [1, 1, 128], strides = [1, 1, 1]} : vector<7x7x128xf32> to vector<1x1x128xf32>
    %125 = vector.shape_cast %124 : vector<1x1x128xf32> to vector<128xf32>
    %126 = vector.shape_cast %125 : vector<128xf32> to vector<1x1x128xf32>
    %127 = vector.broadcast %126 : vector<1x1x128xf32> to vector<8x8x128xf32>
    %128 = arith.mulf %123, %127 : vector<8x8x128xf32>
    %129 = arith.addf %121, %128 : vector<8x8x128xf32>
    %c2 = arith.constant 2 : index
    %c0_25 = arith.constant 0 : index
    %c0_26 = arith.constant 0 : index
    %130 = vector.load %arg7[%c2, %c0_25, %c0_26] : memref<14x24x128xf32, #tpu.memory_space<vmem>>, vector<8x24x128xf32>
    %c3_i32_27 = arith.constant 3 : i32
    %131 = tpu.dynamic_rotate %130 by %c3_i32_27 dim 1 : vector<8x24x128xf32>, i32 -> vector<8x24x128xf32>
    %132 = vector.extract_strided_slice %131 {offsets = [0, 8, 0], sizes = [8, 8, 128], strides = [1, 1, 1]} : vector<8x24x128xf32> to vector<8x8x128xf32>
    %133 = vector.extract_strided_slice %16 {offsets = [2, 0, 0], sizes = [1, 1, 128], strides = [1, 1, 1]} : vector<7x7x128xf32> to vector<1x1x128xf32>
    %134 = vector.shape_cast %133 : vector<1x1x128xf32> to vector<128xf32>
    %135 = vector.shape_cast %134 : vector<128xf32> to vector<1x1x128xf32>
    %136 = vector.broadcast %135 : vector<1x1x128xf32> to vector<8x8x128xf32>
    %137 = arith.mulf %132, %136 : vector<8x8x128xf32>
    %138 = arith.addf %129, %137 : vector<8x8x128xf32>
    %c2_i32_28 = arith.constant 2 : i32
    %139 = tpu.dynamic_rotate %130 by %c2_i32_28 dim 1 : vector<8x24x128xf32>, i32 -> vector<8x24x128xf32>
    %140 = vector.extract_strided_slice %139 {offsets = [0, 8, 0], sizes = [8, 8, 128], strides = [1, 1, 1]} : vector<8x24x128xf32> to vector<8x8x128xf32>
    %141 = vector.extract_strided_slice %16 {offsets = [2, 1, 0], sizes = [1, 1, 128], strides = [1, 1, 1]} : vector<7x7x128xf32> to vector<1x1x128xf32>
    %142 = vector.shape_cast %141 : vector<1x1x128xf32> to vector<128xf32>
    %143 = vector.shape_cast %142 : vector<128xf32> to vector<1x1x128xf32>
    %144 = vector.broadcast %143 : vector<1x1x128xf32> to vector<8x8x128xf32>
    %145 = arith.mulf %140, %144 : vector<8x8x128xf32>
    %146 = arith.addf %138, %145 : vector<8x8x128xf32>
    %c1_i32_29 = arith.constant 1 : i32
    %147 = tpu.dynamic_rotate %130 by %c1_i32_29 dim 1 : vector<8x24x128xf32>, i32 -> vector<8x24x128xf32>
    %148 = vector.extract_strided_slice %147 {offsets = [0, 8, 0], sizes = [8, 8, 128], strides = [1, 1, 1]} : vector<8x24x128xf32> to vector<8x8x128xf32>
    %149 = vector.extract_strided_slice %16 {offsets = [2, 2, 0], sizes = [1, 1, 128], strides = [1, 1, 1]} : vector<7x7x128xf32> to vector<1x1x128xf32>
    %150 = vector.shape_cast %149 : vector<1x1x128xf32> to vector<128xf32>
    %151 = vector.shape_cast %150 : vector<128xf32> to vector<1x1x128xf32>
    %152 = vector.broadcast %151 : vector<1x1x128xf32> to vector<8x8x128xf32>
    %153 = arith.mulf %148, %152 : vector<8x8x128xf32>
    %154 = arith.addf %146, %153 : vector<8x8x128xf32>
    %155 = vector.extract_strided_slice %130 {offsets = [0, 8, 0], sizes = [8, 8, 128], strides = [1, 1, 1]} : vector<8x24x128xf32> to vector<8x8x128xf32>
    %156 = vector.extract_strided_slice %16 {offsets = [2, 3, 0], sizes = [1, 1, 128], strides = [1, 1, 1]} : vector<7x7x128xf32> to vector<1x1x128xf32>
    %157 = vector.shape_cast %156 : vector<1x1x128xf32> to vector<128xf32>
    %158 = vector.shape_cast %157 : vector<128xf32> to vector<1x1x128xf32>
    %159 = vector.broadcast %158 : vector<1x1x128xf32> to vector<8x8x128xf32>
    %160 = arith.mulf %155, %159 : vector<8x8x128xf32>
    %161 = arith.addf %154, %160 : vector<8x8x128xf32>
    %c23_i32_30 = arith.constant 23 : i32
    %162 = tpu.dynamic_rotate %130 by %c23_i32_30 dim 1 : vector<8x24x128xf32>, i32 -> vector<8x24x128xf32>
    %163 = vector.extract_strided_slice %162 {offsets = [0, 8, 0], sizes = [8, 8, 128], strides = [1, 1, 1]} : vector<8x24x128xf32> to vector<8x8x128xf32>
    %164 = vector.extract_strided_slice %16 {offsets = [2, 4, 0], sizes = [1, 1, 128], strides = [1, 1, 1]} : vector<7x7x128xf32> to vector<1x1x128xf32>
    %165 = vector.shape_cast %164 : vector<1x1x128xf32> to vector<128xf32>
    %166 = vector.shape_cast %165 : vector<128xf32> to vector<1x1x128xf32>
    %167 = vector.broadcast %166 : vector<1x1x128xf32> to vector<8x8x128xf32>
    %168 = arith.mulf %163, %167 : vector<8x8x128xf32>
    %169 = arith.addf %161, %168 : vector<8x8x128xf32>
    %c22_i32_31 = arith.constant 22 : i32
    %170 = tpu.dynamic_rotate %130 by %c22_i32_31 dim 1 : vector<8x24x128xf32>, i32 -> vector<8x24x128xf32>
    %171 = vector.extract_strided_slice %170 {offsets = [0, 8, 0], sizes = [8, 8, 128], strides = [1, 1, 1]} : vector<8x24x128xf32> to vector<8x8x128xf32>
    %172 = vector.extract_strided_slice %16 {offsets = [2, 5, 0], sizes = [1, 1, 128], strides = [1, 1, 1]} : vector<7x7x128xf32> to vector<1x1x128xf32>
    %173 = vector.shape_cast %172 : vector<1x1x128xf32> to vector<128xf32>
    %174 = vector.shape_cast %173 : vector<128xf32> to vector<1x1x128xf32>
    %175 = vector.broadcast %174 : vector<1x1x128xf32> to vector<8x8x128xf32>
    %176 = arith.mulf %171, %175 : vector<8x8x128xf32>
    %177 = arith.addf %169, %176 : vector<8x8x128xf32>
    %c21_i32_32 = arith.constant 21 : i32
    %178 = tpu.dynamic_rotate %130 by %c21_i32_32 dim 1 : vector<8x24x128xf32>, i32 -> vector<8x24x128xf32>
    %179 = vector.extract_strided_slice %178 {offsets = [0, 8, 0], sizes = [8, 8, 128], strides = [1, 1, 1]} : vector<8x24x128xf32> to vector<8x8x128xf32>
    %180 = vector.extract_strided_slice %16 {offsets = [2, 6, 0], sizes = [1, 1, 128], strides = [1, 1, 1]} : vector<7x7x128xf32> to vector<1x1x128xf32>
    %181 = vector.shape_cast %180 : vector<1x1x128xf32> to vector<128xf32>
    %182 = vector.shape_cast %181 : vector<128xf32> to vector<1x1x128xf32>
    %183 = vector.broadcast %182 : vector<1x1x128xf32> to vector<8x8x128xf32>
    %184 = arith.mulf %179, %183 : vector<8x8x128xf32>
    %185 = arith.addf %177, %184 : vector<8x8x128xf32>
    %c3_33 = arith.constant 3 : index
    %c0_34 = arith.constant 0 : index
    %c0_35 = arith.constant 0 : index
    %186 = vector.load %arg7[%c3_33, %c0_34, %c0_35] : memref<14x24x128xf32, #tpu.memory_space<vmem>>, vector<8x24x128xf32>
    %c3_i32_36 = arith.constant 3 : i32
    %187 = tpu.dynamic_rotate %186 by %c3_i32_36 dim 1 : vector<8x24x128xf32>, i32 -> vector<8x24x128xf32>
    %188 = vector.extract_strided_slice %187 {offsets = [0, 8, 0], sizes = [8, 8, 128], strides = [1, 1, 1]} : vector<8x24x128xf32> to vector<8x8x128xf32>
    %189 = vector.extract_strided_slice %16 {offsets = [3, 0, 0], sizes = [1, 1, 128], strides = [1, 1, 1]} : vector<7x7x128xf32> to vector<1x1x128xf32>
    %190 = vector.shape_cast %189 : vector<1x1x128xf32> to vector<128xf32>
    %191 = vector.shape_cast %190 : vector<128xf32> to vector<1x1x128xf32>
    %192 = vector.broadcast %191 : vector<1x1x128xf32> to vector<8x8x128xf32>
    %193 = arith.mulf %188, %192 : vector<8x8x128xf32>
    %194 = arith.addf %185, %193 : vector<8x8x128xf32>
    %c2_i32_37 = arith.constant 2 : i32
    %195 = tpu.dynamic_rotate %186 by %c2_i32_37 dim 1 : vector<8x24x128xf32>, i32 -> vector<8x24x128xf32>
    %196 = vector.extract_strided_slice %195 {offsets = [0, 8, 0], sizes = [8, 8, 128], strides = [1, 1, 1]} : vector<8x24x128xf32> to vector<8x8x128xf32>
    %197 = vector.extract_strided_slice %16 {offsets = [3, 1, 0], sizes = [1, 1, 128], strides = [1, 1, 1]} : vector<7x7x128xf32> to vector<1x1x128xf32>
    %198 = vector.shape_cast %197 : vector<1x1x128xf32> to vector<128xf32>
    %199 = vector.shape_cast %198 : vector<128xf32> to vector<1x1x128xf32>
    %200 = vector.broadcast %199 : vector<1x1x128xf32> to vector<8x8x128xf32>
    %201 = arith.mulf %196, %200 : vector<8x8x128xf32>
    %202 = arith.addf %194, %201 : vector<8x8x128xf32>
    %c1_i32_38 = arith.constant 1 : i32
    %203 = tpu.dynamic_rotate %186 by %c1_i32_38 dim 1 : vector<8x24x128xf32>, i32 -> vector<8x24x128xf32>
    %204 = vector.extract_strided_slice %203 {offsets = [0, 8, 0], sizes = [8, 8, 128], strides = [1, 1, 1]} : vector<8x24x128xf32> to vector<8x8x128xf32>
    %205 = vector.extract_strided_slice %16 {offsets = [3, 2, 0], sizes = [1, 1, 128], strides = [1, 1, 1]} : vector<7x7x128xf32> to vector<1x1x128xf32>
    %206 = vector.shape_cast %205 : vector<1x1x128xf32> to vector<128xf32>
    %207 = vector.shape_cast %206 : vector<128xf32> to vector<1x1x128xf32>
    %208 = vector.broadcast %207 : vector<1x1x128xf32> to vector<8x8x128xf32>
    %209 = arith.mulf %204, %208 : vector<8x8x128xf32>
    %210 = arith.addf %202, %209 : vector<8x8x128xf32>
    %211 = vector.extract_strided_slice %186 {offsets = [0, 8, 0], sizes = [8, 8, 128], strides = [1, 1, 1]} : vector<8x24x128xf32> to vector<8x8x128xf32>
    %212 = vector.extract_strided_slice %16 {offsets = [3, 3, 0], sizes = [1, 1, 128], strides = [1, 1, 1]} : vector<7x7x128xf32> to vector<1x1x128xf32>
    %213 = vector.shape_cast %212 : vector<1x1x128xf32> to vector<128xf32>
    %214 = vector.shape_cast %213 : vector<128xf32> to vector<1x1x128xf32>
    %215 = vector.broadcast %214 : vector<1x1x128xf32> to vector<8x8x128xf32>
    %216 = arith.mulf %211, %215 : vector<8x8x128xf32>
    %217 = arith.addf %210, %216 : vector<8x8x128xf32>
    %c23_i32_39 = arith.constant 23 : i32
    %218 = tpu.dynamic_rotate %186 by %c23_i32_39 dim 1 : vector<8x24x128xf32>, i32 -> vector<8x24x128xf32>
    %219 = vector.extract_strided_slice %218 {offsets = [0, 8, 0], sizes = [8, 8, 128], strides = [1, 1, 1]} : vector<8x24x128xf32> to vector<8x8x128xf32>
    %220 = vector.extract_strided_slice %16 {offsets = [3, 4, 0], sizes = [1, 1, 128], strides = [1, 1, 1]} : vector<7x7x128xf32> to vector<1x1x128xf32>
    %221 = vector.shape_cast %220 : vector<1x1x128xf32> to vector<128xf32>
    %222 = vector.shape_cast %221 : vector<128xf32> to vector<1x1x128xf32>
    %223 = vector.broadcast %222 : vector<1x1x128xf32> to vector<8x8x128xf32>
    %224 = arith.mulf %219, %223 : vector<8x8x128xf32>
    %225 = arith.addf %217, %224 : vector<8x8x128xf32>
    %c22_i32_40 = arith.constant 22 : i32
    %226 = tpu.dynamic_rotate %186 by %c22_i32_40 dim 1 : vector<8x24x128xf32>, i32 -> vector<8x24x128xf32>
    %227 = vector.extract_strided_slice %226 {offsets = [0, 8, 0], sizes = [8, 8, 128], strides = [1, 1, 1]} : vector<8x24x128xf32> to vector<8x8x128xf32>
    %228 = vector.extract_strided_slice %16 {offsets = [3, 5, 0], sizes = [1, 1, 128], strides = [1, 1, 1]} : vector<7x7x128xf32> to vector<1x1x128xf32>
    %229 = vector.shape_cast %228 : vector<1x1x128xf32> to vector<128xf32>
    %230 = vector.shape_cast %229 : vector<128xf32> to vector<1x1x128xf32>
    %231 = vector.broadcast %230 : vector<1x1x128xf32> to vector<8x8x128xf32>
    %232 = arith.mulf %227, %231 : vector<8x8x128xf32>
    %233 = arith.addf %225, %232 : vector<8x8x128xf32>
    %c21_i32_41 = arith.constant 21 : i32
    %234 = tpu.dynamic_rotate %186 by %c21_i32_41 dim 1 : vector<8x24x128xf32>, i32 -> vector<8x24x128xf32>
    %235 = vector.extract_strided_slice %234 {offsets = [0, 8, 0], sizes = [8, 8, 128], strides = [1, 1, 1]} : vector<8x24x128xf32> to vector<8x8x128xf32>
    %236 = vector.extract_strided_slice %16 {offsets = [3, 6, 0], sizes = [1, 1, 128], strides = [1, 1, 1]} : vector<7x7x128xf32> to vector<1x1x128xf32>
    %237 = vector.shape_cast %236 : vector<1x1x128xf32> to vector<128xf32>
    %238 = vector.shape_cast %237 : vector<128xf32> to vector<1x1x128xf32>
    %239 = vector.broadcast %238 : vector<1x1x128xf32> to vector<8x8x128xf32>
    %240 = arith.mulf %235, %239 : vector<8x8x128xf32>
    %241 = arith.addf %233, %240 : vector<8x8x128xf32>
    %c4 = arith.constant 4 : index
    %c0_42 = arith.constant 0 : index
    %c0_43 = arith.constant 0 : index
    %242 = vector.load %arg7[%c4, %c0_42, %c0_43] : memref<14x24x128xf32, #tpu.memory_space<vmem>>, vector<8x24x128xf32>
    %c3_i32_44 = arith.constant 3 : i32
    %243 = tpu.dynamic_rotate %242 by %c3_i32_44 dim 1 : vector<8x24x128xf32>, i32 -> vector<8x24x128xf32>
    %244 = vector.extract_strided_slice %243 {offsets = [0, 8, 0], sizes = [8, 8, 128], strides = [1, 1, 1]} : vector<8x24x128xf32> to vector<8x8x128xf32>
    %245 = vector.extract_strided_slice %16 {offsets = [4, 0, 0], sizes = [1, 1, 128], strides = [1, 1, 1]} : vector<7x7x128xf32> to vector<1x1x128xf32>
    %246 = vector.shape_cast %245 : vector<1x1x128xf32> to vector<128xf32>
    %247 = vector.shape_cast %246 : vector<128xf32> to vector<1x1x128xf32>
    %248 = vector.broadcast %247 : vector<1x1x128xf32> to vector<8x8x128xf32>
    %249 = arith.mulf %244, %248 : vector<8x8x128xf32>
    %250 = arith.addf %241, %249 : vector<8x8x128xf32>
    %c2_i32_45 = arith.constant 2 : i32
    %251 = tpu.dynamic_rotate %242 by %c2_i32_45 dim 1 : vector<8x24x128xf32>, i32 -> vector<8x24x128xf32>
    %252 = vector.extract_strided_slice %251 {offsets = [0, 8, 0], sizes = [8, 8, 128], strides = [1, 1, 1]} : vector<8x24x128xf32> to vector<8x8x128xf32>
    %253 = vector.extract_strided_slice %16 {offsets = [4, 1, 0], sizes = [1, 1, 128], strides = [1, 1, 1]} : vector<7x7x128xf32> to vector<1x1x128xf32>
    %254 = vector.shape_cast %253 : vector<1x1x128xf32> to vector<128xf32>
    %255 = vector.shape_cast %254 : vector<128xf32> to vector<1x1x128xf32>
    %256 = vector.broadcast %255 : vector<1x1x128xf32> to vector<8x8x128xf32>
    %257 = arith.mulf %252, %256 : vector<8x8x128xf32>
    %258 = arith.addf %250, %257 : vector<8x8x128xf32>
    %c1_i32_46 = arith.constant 1 : i32
    %259 = tpu.dynamic_rotate %242 by %c1_i32_46 dim 1 : vector<8x24x128xf32>, i32 -> vector<8x24x128xf32>
    %260 = vector.extract_strided_slice %259 {offsets = [0, 8, 0], sizes = [8, 8, 128], strides = [1, 1, 1]} : vector<8x24x128xf32> to vector<8x8x128xf32>
    %261 = vector.extract_strided_slice %16 {offsets = [4, 2, 0], sizes = [1, 1, 128], strides = [1, 1, 1]} : vector<7x7x128xf32> to vector<1x1x128xf32>
    %262 = vector.shape_cast %261 : vector<1x1x128xf32> to vector<128xf32>
    %263 = vector.shape_cast %262 : vector<128xf32> to vector<1x1x128xf32>
    %264 = vector.broadcast %263 : vector<1x1x128xf32> to vector<8x8x128xf32>
    %265 = arith.mulf %260, %264 : vector<8x8x128xf32>
    %266 = arith.addf %258, %265 : vector<8x8x128xf32>
    %267 = vector.extract_strided_slice %242 {offsets = [0, 8, 0], sizes = [8, 8, 128], strides = [1, 1, 1]} : vector<8x24x128xf32> to vector<8x8x128xf32>
    %268 = vector.extract_strided_slice %16 {offsets = [4, 3, 0], sizes = [1, 1, 128], strides = [1, 1, 1]} : vector<7x7x128xf32> to vector<1x1x128xf32>
    %269 = vector.shape_cast %268 : vector<1x1x128xf32> to vector<128xf32>
    %270 = vector.shape_cast %269 : vector<128xf32> to vector<1x1x128xf32>
    %271 = vector.broadcast %270 : vector<1x1x128xf32> to vector<8x8x128xf32>
    %272 = arith.mulf %267, %271 : vector<8x8x128xf32>
    %273 = arith.addf %266, %272 : vector<8x8x128xf32>
    %c23_i32_47 = arith.constant 23 : i32
    %274 = tpu.dynamic_rotate %242 by %c23_i32_47 dim 1 : vector<8x24x128xf32>, i32 -> vector<8x24x128xf32>
    %275 = vector.extract_strided_slice %274 {offsets = [0, 8, 0], sizes = [8, 8, 128], strides = [1, 1, 1]} : vector<8x24x128xf32> to vector<8x8x128xf32>
    %276 = vector.extract_strided_slice %16 {offsets = [4, 4, 0], sizes = [1, 1, 128], strides = [1, 1, 1]} : vector<7x7x128xf32> to vector<1x1x128xf32>
    %277 = vector.shape_cast %276 : vector<1x1x128xf32> to vector<128xf32>
    %278 = vector.shape_cast %277 : vector<128xf32> to vector<1x1x128xf32>
    %279 = vector.broadcast %278 : vector<1x1x128xf32> to vector<8x8x128xf32>
    %280 = arith.mulf %275, %279 : vector<8x8x128xf32>
    %281 = arith.addf %273, %280 : vector<8x8x128xf32>
    %c22_i32_48 = arith.constant 22 : i32
    %282 = tpu.dynamic_rotate %242 by %c22_i32_48 dim 1 : vector<8x24x128xf32>, i32 -> vector<8x24x128xf32>
    %283 = vector.extract_strided_slice %282 {offsets = [0, 8, 0], sizes = [8, 8, 128], strides = [1, 1, 1]} : vector<8x24x128xf32> to vector<8x8x128xf32>
    %284 = vector.extract_strided_slice %16 {offsets = [4, 5, 0], sizes = [1, 1, 128], strides = [1, 1, 1]} : vector<7x7x128xf32> to vector<1x1x128xf32>
    %285 = vector.shape_cast %284 : vector<1x1x128xf32> to vector<128xf32>
    %286 = vector.shape_cast %285 : vector<128xf32> to vector<1x1x128xf32>
    %287 = vector.broadcast %286 : vector<1x1x128xf32> to vector<8x8x128xf32>
    %288 = arith.mulf %283, %287 : vector<8x8x128xf32>
    %289 = arith.addf %281, %288 : vector<8x8x128xf32>
    %c21_i32_49 = arith.constant 21 : i32
    %290 = tpu.dynamic_rotate %242 by %c21_i32_49 dim 1 : vector<8x24x128xf32>, i32 -> vector<8x24x128xf32>
    %291 = vector.extract_strided_slice %290 {offsets = [0, 8, 0], sizes = [8, 8, 128], strides = [1, 1, 1]} : vector<8x24x128xf32> to vector<8x8x128xf32>
    %292 = vector.extract_strided_slice %16 {offsets = [4, 6, 0], sizes = [1, 1, 128], strides = [1, 1, 1]} : vector<7x7x128xf32> to vector<1x1x128xf32>
    %293 = vector.shape_cast %292 : vector<1x1x128xf32> to vector<128xf32>
    %294 = vector.shape_cast %293 : vector<128xf32> to vector<1x1x128xf32>
    %295 = vector.broadcast %294 : vector<1x1x128xf32> to vector<8x8x128xf32>
    %296 = arith.mulf %291, %295 : vector<8x8x128xf32>
    %297 = arith.addf %289, %296 : vector<8x8x128xf32>
    %c5 = arith.constant 5 : index
    %c0_50 = arith.constant 0 : index
    %c0_51 = arith.constant 0 : index
    %298 = vector.load %arg7[%c5, %c0_50, %c0_51] : memref<14x24x128xf32, #tpu.memory_space<vmem>>, vector<8x24x128xf32>
    %c3_i32_52 = arith.constant 3 : i32
    %299 = tpu.dynamic_rotate %298 by %c3_i32_52 dim 1 : vector<8x24x128xf32>, i32 -> vector<8x24x128xf32>
    %300 = vector.extract_strided_slice %299 {offsets = [0, 8, 0], sizes = [8, 8, 128], strides = [1, 1, 1]} : vector<8x24x128xf32> to vector<8x8x128xf32>
    %301 = vector.extract_strided_slice %16 {offsets = [5, 0, 0], sizes = [1, 1, 128], strides = [1, 1, 1]} : vector<7x7x128xf32> to vector<1x1x128xf32>
    %302 = vector.shape_cast %301 : vector<1x1x128xf32> to vector<128xf32>
    %303 = vector.shape_cast %302 : vector<128xf32> to vector<1x1x128xf32>
    %304 = vector.broadcast %303 : vector<1x1x128xf32> to vector<8x8x128xf32>
    %305 = arith.mulf %300, %304 : vector<8x8x128xf32>
    %306 = arith.addf %297, %305 : vector<8x8x128xf32>
    %c2_i32_53 = arith.constant 2 : i32
    %307 = tpu.dynamic_rotate %298 by %c2_i32_53 dim 1 : vector<8x24x128xf32>, i32 -> vector<8x24x128xf32>
    %308 = vector.extract_strided_slice %307 {offsets = [0, 8, 0], sizes = [8, 8, 128], strides = [1, 1, 1]} : vector<8x24x128xf32> to vector<8x8x128xf32>
    %309 = vector.extract_strided_slice %16 {offsets = [5, 1, 0], sizes = [1, 1, 128], strides = [1, 1, 1]} : vector<7x7x128xf32> to vector<1x1x128xf32>
    %310 = vector.shape_cast %309 : vector<1x1x128xf32> to vector<128xf32>
    %311 = vector.shape_cast %310 : vector<128xf32> to vector<1x1x128xf32>
    %312 = vector.broadcast %311 : vector<1x1x128xf32> to vector<8x8x128xf32>
    %313 = arith.mulf %308, %312 : vector<8x8x128xf32>
    %314 = arith.addf %306, %313 : vector<8x8x128xf32>
    %c1_i32_54 = arith.constant 1 : i32
    %315 = tpu.dynamic_rotate %298 by %c1_i32_54 dim 1 : vector<8x24x128xf32>, i32 -> vector<8x24x128xf32>
    %316 = vector.extract_strided_slice %315 {offsets = [0, 8, 0], sizes = [8, 8, 128], strides = [1, 1, 1]} : vector<8x24x128xf32> to vector<8x8x128xf32>
    %317 = vector.extract_strided_slice %16 {offsets = [5, 2, 0], sizes = [1, 1, 128], strides = [1, 1, 1]} : vector<7x7x128xf32> to vector<1x1x128xf32>
    %318 = vector.shape_cast %317 : vector<1x1x128xf32> to vector<128xf32>
    %319 = vector.shape_cast %318 : vector<128xf32> to vector<1x1x128xf32>
    %320 = vector.broadcast %319 : vector<1x1x128xf32> to vector<8x8x128xf32>
    %321 = arith.mulf %316, %320 : vector<8x8x128xf32>
    %322 = arith.addf %314, %321 : vector<8x8x128xf32>
    %323 = vector.extract_strided_slice %298 {offsets = [0, 8, 0], sizes = [8, 8, 128], strides = [1, 1, 1]} : vector<8x24x128xf32> to vector<8x8x128xf32>
    %324 = vector.extract_strided_slice %16 {offsets = [5, 3, 0], sizes = [1, 1, 128], strides = [1, 1, 1]} : vector<7x7x128xf32> to vector<1x1x128xf32>
    %325 = vector.shape_cast %324 : vector<1x1x128xf32> to vector<128xf32>
    %326 = vector.shape_cast %325 : vector<128xf32> to vector<1x1x128xf32>
    %327 = vector.broadcast %326 : vector<1x1x128xf32> to vector<8x8x128xf32>
    %328 = arith.mulf %323, %327 : vector<8x8x128xf32>
    %329 = arith.addf %322, %328 : vector<8x8x128xf32>
    %c23_i32_55 = arith.constant 23 : i32
    %330 = tpu.dynamic_rotate %298 by %c23_i32_55 dim 1 : vector<8x24x128xf32>, i32 -> vector<8x24x128xf32>
    %331 = vector.extract_strided_slice %330 {offsets = [0, 8, 0], sizes = [8, 8, 128], strides = [1, 1, 1]} : vector<8x24x128xf32> to vector<8x8x128xf32>
    %332 = vector.extract_strided_slice %16 {offsets = [5, 4, 0], sizes = [1, 1, 128], strides = [1, 1, 1]} : vector<7x7x128xf32> to vector<1x1x128xf32>
    %333 = vector.shape_cast %332 : vector<1x1x128xf32> to vector<128xf32>
    %334 = vector.shape_cast %333 : vector<128xf32> to vector<1x1x128xf32>
    %335 = vector.broadcast %334 : vector<1x1x128xf32> to vector<8x8x128xf32>
    %336 = arith.mulf %331, %335 : vector<8x8x128xf32>
    %337 = arith.addf %329, %336 : vector<8x8x128xf32>
    %c22_i32_56 = arith.constant 22 : i32
    %338 = tpu.dynamic_rotate %298 by %c22_i32_56 dim 1 : vector<8x24x128xf32>, i32 -> vector<8x24x128xf32>
    %339 = vector.extract_strided_slice %338 {offsets = [0, 8, 0], sizes = [8, 8, 128], strides = [1, 1, 1]} : vector<8x24x128xf32> to vector<8x8x128xf32>
    %340 = vector.extract_strided_slice %16 {offsets = [5, 5, 0], sizes = [1, 1, 128], strides = [1, 1, 1]} : vector<7x7x128xf32> to vector<1x1x128xf32>
    %341 = vector.shape_cast %340 : vector<1x1x128xf32> to vector<128xf32>
    %342 = vector.shape_cast %341 : vector<128xf32> to vector<1x1x128xf32>
    %343 = vector.broadcast %342 : vector<1x1x128xf32> to vector<8x8x128xf32>
    %344 = arith.mulf %339, %343 : vector<8x8x128xf32>
    %345 = arith.addf %337, %344 : vector<8x8x128xf32>
    %c21_i32_57 = arith.constant 21 : i32
    %346 = tpu.dynamic_rotate %298 by %c21_i32_57 dim 1 : vector<8x24x128xf32>, i32 -> vector<8x24x128xf32>
    %347 = vector.extract_strided_slice %346 {offsets = [0, 8, 0], sizes = [8, 8, 128], strides = [1, 1, 1]} : vector<8x24x128xf32> to vector<8x8x128xf32>
    %348 = vector.extract_strided_slice %16 {offsets = [5, 6, 0], sizes = [1, 1, 128], strides = [1, 1, 1]} : vector<7x7x128xf32> to vector<1x1x128xf32>
    %349 = vector.shape_cast %348 : vector<1x1x128xf32> to vector<128xf32>
    %350 = vector.shape_cast %349 : vector<128xf32> to vector<1x1x128xf32>
    %351 = vector.broadcast %350 : vector<1x1x128xf32> to vector<8x8x128xf32>
    %352 = arith.mulf %347, %351 : vector<8x8x128xf32>
    %353 = arith.addf %345, %352 : vector<8x8x128xf32>
    %c6 = arith.constant 6 : index
    %c0_58 = arith.constant 0 : index
    %c0_59 = arith.constant 0 : index
    %354 = vector.load %arg7[%c6, %c0_58, %c0_59] : memref<14x24x128xf32, #tpu.memory_space<vmem>>, vector<8x24x128xf32>
    %c3_i32_60 = arith.constant 3 : i32
    %355 = tpu.dynamic_rotate %354 by %c3_i32_60 dim 1 : vector<8x24x128xf32>, i32 -> vector<8x24x128xf32>
    %356 = vector.extract_strided_slice %355 {offsets = [0, 8, 0], sizes = [8, 8, 128], strides = [1, 1, 1]} : vector<8x24x128xf32> to vector<8x8x128xf32>
    %357 = vector.extract_strided_slice %16 {offsets = [6, 0, 0], sizes = [1, 1, 128], strides = [1, 1, 1]} : vector<7x7x128xf32> to vector<1x1x128xf32>
    %358 = vector.shape_cast %357 : vector<1x1x128xf32> to vector<128xf32>
    %359 = vector.shape_cast %358 : vector<128xf32> to vector<1x1x128xf32>
    %360 = vector.broadcast %359 : vector<1x1x128xf32> to vector<8x8x128xf32>
    %361 = arith.mulf %356, %360 : vector<8x8x128xf32>
    %362 = arith.addf %353, %361 : vector<8x8x128xf32>
    %c2_i32_61 = arith.constant 2 : i32
    %363 = tpu.dynamic_rotate %354 by %c2_i32_61 dim 1 : vector<8x24x128xf32>, i32 -> vector<8x24x128xf32>
    %364 = vector.extract_strided_slice %363 {offsets = [0, 8, 0], sizes = [8, 8, 128], strides = [1, 1, 1]} : vector<8x24x128xf32> to vector<8x8x128xf32>
    %365 = vector.extract_strided_slice %16 {offsets = [6, 1, 0], sizes = [1, 1, 128], strides = [1, 1, 1]} : vector<7x7x128xf32> to vector<1x1x128xf32>
    %366 = vector.shape_cast %365 : vector<1x1x128xf32> to vector<128xf32>
    %367 = vector.shape_cast %366 : vector<128xf32> to vector<1x1x128xf32>
    %368 = vector.broadcast %367 : vector<1x1x128xf32> to vector<8x8x128xf32>
    %369 = arith.mulf %364, %368 : vector<8x8x128xf32>
    %370 = arith.addf %362, %369 : vector<8x8x128xf32>
    %c1_i32_62 = arith.constant 1 : i32
    %371 = tpu.dynamic_rotate %354 by %c1_i32_62 dim 1 : vector<8x24x128xf32>, i32 -> vector<8x24x128xf32>
    %372 = vector.extract_strided_slice %371 {offsets = [0, 8, 0], sizes = [8, 8, 128], strides = [1, 1, 1]} : vector<8x24x128xf32> to vector<8x8x128xf32>
    %373 = vector.extract_strided_slice %16 {offsets = [6, 2, 0], sizes = [1, 1, 128], strides = [1, 1, 1]} : vector<7x7x128xf32> to vector<1x1x128xf32>
    %374 = vector.shape_cast %373 : vector<1x1x128xf32> to vector<128xf32>
    %375 = vector.shape_cast %374 : vector<128xf32> to vector<1x1x128xf32>
    %376 = vector.broadcast %375 : vector<1x1x128xf32> to vector<8x8x128xf32>
    %377 = arith.mulf %372, %376 : vector<8x8x128xf32>
    %378 = arith.addf %370, %377 : vector<8x8x128xf32>
    %379 = vector.extract_strided_slice %354 {offsets = [0, 8, 0], sizes = [8, 8, 128], strides = [1, 1, 1]} : vector<8x24x128xf32> to vector<8x8x128xf32>
    %380 = vector.extract_strided_slice %16 {offsets = [6, 3, 0], sizes = [1, 1, 128], strides = [1, 1, 1]} : vector<7x7x128xf32> to vector<1x1x128xf32>
    %381 = vector.shape_cast %380 : vector<1x1x128xf32> to vector<128xf32>
    %382 = vector.shape_cast %381 : vector<128xf32> to vector<1x1x128xf32>
    %383 = vector.broadcast %382 : vector<1x1x128xf32> to vector<8x8x128xf32>
    %384 = arith.mulf %379, %383 : vector<8x8x128xf32>
    %385 = arith.addf %378, %384 : vector<8x8x128xf32>
    %c23_i32_63 = arith.constant 23 : i32
    %386 = tpu.dynamic_rotate %354 by %c23_i32_63 dim 1 : vector<8x24x128xf32>, i32 -> vector<8x24x128xf32>
    %387 = vector.extract_strided_slice %386 {offsets = [0, 8, 0], sizes = [8, 8, 128], strides = [1, 1, 1]} : vector<8x24x128xf32> to vector<8x8x128xf32>
    %388 = vector.extract_strided_slice %16 {offsets = [6, 4, 0], sizes = [1, 1, 128], strides = [1, 1, 1]} : vector<7x7x128xf32> to vector<1x1x128xf32>
    %389 = vector.shape_cast %388 : vector<1x1x128xf32> to vector<128xf32>
    %390 = vector.shape_cast %389 : vector<128xf32> to vector<1x1x128xf32>
    %391 = vector.broadcast %390 : vector<1x1x128xf32> to vector<8x8x128xf32>
    %392 = arith.mulf %387, %391 : vector<8x8x128xf32>
    %393 = arith.addf %385, %392 : vector<8x8x128xf32>
    %c22_i32_64 = arith.constant 22 : i32
    %394 = tpu.dynamic_rotate %354 by %c22_i32_64 dim 1 : vector<8x24x128xf32>, i32 -> vector<8x24x128xf32>
    %395 = vector.extract_strided_slice %394 {offsets = [0, 8, 0], sizes = [8, 8, 128], strides = [1, 1, 1]} : vector<8x24x128xf32> to vector<8x8x128xf32>
    %396 = vector.extract_strided_slice %16 {offsets = [6, 5, 0], sizes = [1, 1, 128], strides = [1, 1, 1]} : vector<7x7x128xf32> to vector<1x1x128xf32>
    %397 = vector.shape_cast %396 : vector<1x1x128xf32> to vector<128xf32>
    %398 = vector.shape_cast %397 : vector<128xf32> to vector<1x1x128xf32>
    %399 = vector.broadcast %398 : vector<1x1x128xf32> to vector<8x8x128xf32>
    %400 = arith.mulf %395, %399 : vector<8x8x128xf32>
    %401 = arith.addf %393, %400 : vector<8x8x128xf32>
    %c21_i32_65 = arith.constant 21 : i32
    %402 = tpu.dynamic_rotate %354 by %c21_i32_65 dim 1 : vector<8x24x128xf32>, i32 -> vector<8x24x128xf32>
    %403 = vector.extract_strided_slice %402 {offsets = [0, 8, 0], sizes = [8, 8, 128], strides = [1, 1, 1]} : vector<8x24x128xf32> to vector<8x8x128xf32>
    %404 = vector.extract_strided_slice %16 {offsets = [6, 6, 0], sizes = [1, 1, 128], strides = [1, 1, 1]} : vector<7x7x128xf32> to vector<1x1x128xf32>
    %405 = vector.shape_cast %404 : vector<1x1x128xf32> to vector<128xf32>
    %406 = vector.shape_cast %405 : vector<128xf32> to vector<1x1x128xf32>
    %407 = vector.broadcast %406 : vector<1x1x128xf32> to vector<8x8x128xf32>
    %408 = arith.mulf %403, %407 : vector<8x8x128xf32>
    %409 = arith.addf %401, %408 : vector<8x8x128xf32>
    %c0_66 = arith.constant 0 : index
    %c0_67 = arith.constant 0 : index
    %410 = vector.load %arg5[%c0_66, %c0_67] : memref<1x128xf32, #tpu.memory_space<vmem>>, vector<1x128xf32>
    %411 = vector.shape_cast %410 : vector<1x128xf32> to vector<1x1x128xf32>
    %412 = vector.broadcast %411 : vector<1x1x128xf32> to vector<8x8x128xf32>
    %413 = arith.addf %409, %412 : vector<8x8x128xf32>
    %414 = arith.truncf %413 : vector<8x8x128xf32> to vector<8x8x128xbf16>
    %c0_68 = arith.constant 0 : index
    %c0_69 = arith.constant 0 : index
    %c0_70 = arith.constant 0 : index
    %c0_71 = arith.constant 0 : index
    %415 = vector.load %arg6[%c0_68, %c0_69, %c0_70, %c0_71] : memref<1x8x8x128xbf16, #tpu.memory_space<vmem>>, vector<1x8x8x128xbf16>
    %416 = vector.shape_cast %415 : vector<1x8x8x128xbf16> to vector<8x8x128xbf16>
    %417 = vector.shape_cast %414 : vector<8x8x128xbf16> to vector<1x8x8x128xbf16>
    tpu.vector_store %arg6[%c0_68, %c0_69, %c0_70, %c0_71], %417 {strides = array<i32>} : memref<1x8x8x128xbf16, #tpu.memory_space<vmem>>, vector<1x8x8x128xbf16>,
    return
  }
  func.func @transform_0(%arg0: i32) -> (i32, i32, i32) {
    %c0_i32 = arith.constant 0 : i32
    %c0_i32_0 = arith.constant 0 : i32
    %c0_i32_1 = arith.constant 0 : i32
    return %arg0, %c0_i32, %c0_i32_0 : i32, i32, i32
  }
  func.func @transform_1(%arg0: i32) -> (i32, i32) {
    %c0_i32 = arith.constant 0 : i32
    %c0_i32_0 = arith.constant 0 : i32
    %c0_i32_1 = arith.constant 0 : i32
    return %c0_i32, %c0_i32_0 : i32, i32
  }
  func.func @transform_2(%arg0: i32) -> (i32, i32) {
    %c0_i32 = arith.constant 0 : i32
    %c0_i32_0 = arith.constant 0 : i32
    %c0_i32_1 = arith.constant 0 : i32
    return %c0_i32, %c0_i32_0 : i32, i32
  }
  func.func @transform_3(%arg0: i32) -> (i32, i32, i32) {
    %c0_i32 = arith.constant 0 : i32
    %c0_i32_0 = arith.constant 0 : i32
    %c0_i32_1 = arith.constant 0 : i32
    %c0_i32_2 = arith.constant 0 : i32
    return %c0_i32, %c0_i32_0, %c0_i32_1 : i32, i32, i32
  }
  func.func @transform_4(%arg0: i32) -> (i32, i32) {
    %c0_i32 = arith.constant 0 : i32
    %c0_i32_0 = arith.constant 0 : i32
    %c0_i32_1 = arith.constant 0 : i32
    return %c0_i32, %c0_i32_0 : i32, i32
  }
  func.func @transform_5(%arg0: i32) -> (i32, i32, i32, i32) {
    %c0_i32 = arith.constant 0 : i32
    %c0_i32_0 = arith.constant 0 : i32
    %c0_i32_1 = arith.constant 0 : i32
    %c0_i32_2 = arith.constant 0 : i32
    return %arg0, %c0_i32, %c0_i32_0, %c0_i32_1 : i32, i32, i32, i32
  }
}

</mosaic_0001>

<bundles_post_ra>
// kernel: tpu_custom_call.1
= control target key start
LH: loop header
LB: loop body
LE: loop exit
PB: predicated region body
PF: predicated region fallthrough
CT: control target
= control target key end

     0   :  { %10 = vsyncpa [#allocation4], 0  ;;  %s4599_s0 = inlined_call_operand.vmem [shape: bf16[2,256,64], index: 0, kind: input, shape index: {}]   ;;  %s4600_s1 = inlined_call_operand.vmem [shape: bf16[64,128], index: 1, kind: input, shape index: {}]   ;;  %s4601_s2 = inlined_call_operand.vmem [shape: f32[1,128], index: 2, kind: input, shape index: {}]   ;;  %s4602_s3 = inlined_call_operand.vmem [shape: f32[7,7,128], index: 3, kind: input, shape index: {}]   ;;  %s4603_s4 = inlined_call_operand.vmem [shape: f32[1,128], index: 4, kind: input, shape index: {}]   ;;  %s4604_s5 = inlined_call_operand.hbm [shape: bf16[2,8,8,128], index: 5, kind: output, shape index: {}]  }
   0x1   :  { %12 = vsyncpa [#allocation4 + $0x1], 0  ;;  %s3055_s18 = smov 0   ;;  %s3057_s19 = smov 0  }
   0x2   :  { %s3059_s20 = smov 0   ;;  %s3061_s21 = smov 0  }
   0x3 LB: > { %s3076_s22 = sadd.s32 4294967295, %s3020_s21   ;;  %s2740_s23 = sadd.s32 4294967294, %s3020_s21   ;;  %s3020_s21 = sphi %s3061_s21, %s4894_s21   ;;  %s3016_s20 = sphi %s3059_s20, %s4893_s20   ;;  %s3012_s19 = sphi %s3057_s19, %s4892_s19   ;;  %s3008_s18 = sphi %s3055_s18, %s4891_s18  }
   0x4   : > { %s3080_s24 = sadd.s32 1, %s3020_s21   ;;  %s135_s25 = sadd.s32 1, %s3016_s20 }
   0x5   : > { %s132_s26 = ssub.s32 %s3020_s21, %s3080_s24  ;;  %p145_p0 = scmp.ne.s32.totalorder %s3016_s20, %s3012_s19 }
   0x6   : > { %p133_p1 = scmp.eq.s32.totalorder %s132_s26, 0  ;;  %p146_p2 = scmp.eq.s32.totalorder %s3076_s22, 1 }
   0x7   : > { %p151_p3 = scmp.ne.s32.totalorder %s3012_s19, %s3008_s18  ;;  %p152_p4 = scmp.eq.s32.totalorder %s2740_s23, 1 }
   0x8   : > { %s3091_s27 = scalar_select %p133_p1, %s3016_s20, %s135_s25  }
   0x9   : > { %p3093_p5 = por %p146_p2, %p145_p0  ;;  %p3097_p6 = por %p152_p4, %p151_p3 }
   0xa   : > { %p2743_p7 = scmp.ge.s32.totalorder %s3020_s21, 1  ;;  %p190_p8 = scmp.lt.s32.totalorder %s3020_s21, 3 }
   0xc   : > { %p191_p9 = pnand %p2743_p7, %p190_p8 }
   0xe   : > { %194 = sbr.rel (%p191_p9) target bundleno = 492 (0x1ec), region = 40 }
  0x13   : > { %s215_s30 = sand.u32 1, %s3012_s19   ;;  %p218_p10 = scmp.lt.s32.totalorder %s3076_s22, 1 }
  0x14   : > { %s2744_s6 = sshll.u32 %s215_s30, 5  ;;  %p2747_p11 = scmp.ne.s32.totalorder %s3076_s22, 0 }
  0x15   : > { %s219_s7 = scalar_select %p218_p10, %s3076_s22, 1 }
  0x16   : > { %s3113_s12 = scalar_lea.vmem [#allocation3], %s2744_s6  ;;  %227 = sbr.rel (%p2747_p11) target bundleno = 66 (0x42), region = 44 }
  0x17   : > { %s2849_s8 = sshll.u32 %s219_s7, 7 }
  0x18   : > { %s3111_s11 = scalar_lea.vmem %s4599_s0, %s2849_s8 }
  0x1b   : > { %v3022_v0 = vmov 0.0  }
  0x1c   : > { %228 = vst [vmem:[#allocation2 + $0xb0] sm:$0xff] %v3022_v0 }
  0x1d   : > { %229 = vst [vmem:[#allocation2 + $0xd0] sm:$0xff] %v3022_v0 }
  0x1e   : > { %230 = vst [vmem:[#allocation2 + $0x10] sm:$0xff] %v3022_v0 }
  0x1f   : > { %231 = vst [vmem:[#allocation2 + $0x48] sm:$0xff] %v3022_v0 }
  0x20   : > { %232 = vst [vmem:[#allocation2 + $0x120] sm:$0xff] %v3022_v0 }
  0x21   : > { %233 = vst [vmem:[#allocation2 + $0x38] sm:$0xff] %v3022_v0 }
  0x22   : > { %234 = vst [vmem:[#allocation2 + $0xf8] sm:$0xff] %v3022_v0 }
  0x23   : > { %235 = vst [vmem:[#allocation2 + $0x100] sm:$0xff] %v3022_v0 }
  0x24   : > { %236 = vst [vmem:[#allocation2 + $0x80] sm:$0xff] %v3022_v0 }
  0x25   : > { %237 = vst [vmem:[#allocation2 + $0x108] sm:$0xff] %v3022_v0 }
  0x26   : > { %239 = vst [vmem:[#allocation2 + $0xf0] sm:$0xff] %v3022_v0 }
  0x27   : > { %240 = vst [vmem:[#allocation2 + $0x18] sm:$0xff] %v3022_v0 }
  0x28   : > { %242 = vst [vmem:[#allocation2 + $0x70] sm:$0xff] %v3022_v0 }
  0x29   : > { %243 = vst [vmem:[#allocation2 + $0x20] sm:$0xff] %v3022_v0 }
  0x2a   : > { %244 = vst [vmem:[#allocation2 + $0x128] sm:$0xff] %v3022_v0 }
  0x2b   : > { %245 = vst [vmem:[#allocation2 + $0x110] sm:$0xff] %v3022_v0 }
  0x2c   : > { %246 = vst [vmem:[#allocation2 + $0x8] sm:$0xff] %v3022_v0 }
  0x2d   : > { %247 = vst [vmem:[#allocation2 + $0x98] sm:$0xff] %v3022_v0 }
  0x2e   : > { %248 = vst [vmem:[#allocation2 + $0xa8] sm:$0xff] %v3022_v0 }
  0x2f   : > { %249 = vst [vmem:[#allocation2 + $0x90] sm:$0xff] %v3022_v0 }
  0x30   : > { %250 = vst [vmem:[#allocation2 + $0xe0] sm:$0xff] %v3022_v0 }
  0x31   : > { %251 = vst [vmem:[#allocation2 + $0x148] sm:$0xff] %v3022_v0 }
  0x32   : > { %252 = vst [vmem:[#allocation2 + $0x118] sm:$0xff] %v3022_v0 }
  0x33   : > { %253 = vst [vmem:[#allocation2 + $0x68] sm:$0xff] %v3022_v0 }
  0x34   : > { %254 = vst [vmem:[#allocation2 + $0x78] sm:$0xff] %v3022_v0 }
  0x35   : > { %255 = vst [vmem:[#allocation2] sm:$0xff] %v3022_v0 }
  0x36   : > { %257 = vst [vmem:[#allocation2 + $0xa0] sm:$0xff] %v3022_v0 }
  0x37   : > { %258 = vst [vmem:[#allocation2 + $0x50] sm:$0xff] %v3022_v0 }
  0x38   : > { %260 = vst [vmem:[#allocation2 + $0x58] sm:$0xff] %v3022_v0 }
  0x39   : > { %261 = vst [vmem:[#allocation2 + $0xe8] sm:$0xff] %v3022_v0 }
  0x3a   : > { %262 = vst [vmem:[#allocation2 + $0x130] sm:$0xff] %v3022_v0 }
  0x3b   : > { %263 = vst [vmem:[#allocation2 + $0x40] sm:$0xff] %v3022_v0 }
  0x3c   : > { %264 = vst [vmem:[#allocation2 + $0x28] sm:$0xff] %v3022_v0 }
  0x3d   : > { %265 = vst [vmem:[#allocation2 + $0xc0] sm:$0xff] %v3022_v0 }
  0x3e   : > { %266 = vst [vmem:[#allocation2 + $0x88] sm:$0xff] %v3022_v0 }
  0x3f   : > { %267 = vst [vmem:[#allocation2 + $0x60] sm:$0xff] %v3022_v0 }
  0x40   : > { %268 = vst [vmem:[#allocation2 + $0xb8] sm:$0xff] %v3022_v0 }
  0x41   : > { %269 = vst [vmem:[#allocation2 + $0x30] sm:$0xff] %v3022_v0 }
  0x42 PF: > { %v2869_v1 = vld [vmem:[%s4600_s1 + $0x18] sm:$0xff]  ;;  %v2868_v2 = vld [vmem:[%s4600_s1 + $0x10] sm:$0xff]  ;;  %v2867_v3 = vld [vmem:[%s4600_s1 + $0x8] sm:$0xff]  ;;  %vm414_vm0 = vcmask 523264   ;;  %v652_v21 = vlaneseq  ;;  %s2870_s10 = sshll.u32 %s3076_s22, 5  ;;  %s2675_s16 = sshll.u32 %s3113_s12, 4  ;;  %s2676_s16 = int_to_ptr.vmem [resolvable:$true] %s2675_s16 }
  0x43   : > { %467 = vmatpush.bf16.msra.mxu0 %v2869_v1  ;;  %2894 = vmatpush.bf16.msra.mxu1 %v2869_v1  ;;  %v2866_v4 = vld [vmem:[%s4600_s1] sm:$0xff]  ;;  %v2851_v9 = vld [vmem:[%s3111_s11 + $0x8] sm:$0xff]  ;;  %v2852_v13 = vld [vmem:[%s3111_s11 + $0x10] sm:$0xff]  ;;  %s2674_s15 = scalar_lea.hbm %s4604_s5, %s2870_s10  ;;  %s2663_s23 = scalar_lea.sflag [#allocation4], %s215_s30 }
  0x44   : > { %2895 = vmatpush.bf16.msra.mxu2 %v2869_v1  ;;  %2896 = vmatpush.bf16.msra.mxu3 %v2869_v1  ;;  %v2850_v5 = vld [vmem:[%s3111_s11] sm:$0xff]  ;;  %v2855_v10 = vld [vmem:[%s3111_s11 + $0x28] sm:$0xff]  ;;  %v2856_v14 = vld [vmem:[%s3111_s11 + $0x30] sm:$0xff]  ;;  %v3160_v24 = vshrl.u32 %v652_v21, 7  ;;  %s2677_s17 = sshll.u32 %s2674_s15, 4  ;;  %s2978_s8 = scalar_lea.hbm %s4604_s5, 64  ;;  %s2678_s17 = int_to_ptr.hbm [resolvable:$true] %s2677_s17 }
  0x45   : > { %v2854_v6 = vld [vmem:[%s3111_s11 + $0x20] sm:$0xff]  ;;  %v2859_v11 = vld [vmem:[%s3111_s11 + $0x48] sm:$0xff]  ;;  %v2860_v15 = vld [vmem:[%s3111_s11 + $0x50] sm:$0xff]  ;;  %s2972_s25 = sshra.s32 %s2678_s17, 4  ;;  %s2973_s25 = int_to_ptr.hbm [resolvable:$true] %s2972_s25 }
  0x46   : > { %v2858_v7 = vld [vmem:[%s3111_s11 + $0x40] sm:$0xff]  ;;  %v2863_v12 = vld [vmem:[%s3111_s11 + $0x68] sm:$0xff]  ;;  %v2864_v16 = vld [vmem:[%s3111_s11 + $0x70] sm:$0xff]  ;;  %vm654_vm1 = vcmp.lt.s32.totalorder %v3160_v24, 3  ;;  %vm696_vm2 = vcmp.lt.s32.totalorder %v3160_v24, 2  ;;  %vm738_vm3 = vcmp.lt.s32.totalorder %v3160_v24, 1  ;;  %p2979_p1 = scmp.lt.s32.totalorder %s2973_s25, %s4604_s5 }
  0x47   : > { %468 = vmatpush.bf16.msra.mxu0 %v2868_v2  ;;  %2897 = vmatpush.bf16.msra.mxu1 %v2868_v2  ;;  %v2862_v8 = vld [vmem:[%s3111_s11 + $0x60] sm:$0xff]  ;;  %v2853_v17 = vld [vmem:[%s3111_s11 + $0x18] sm:$0xff]  ;;  %v612_v22 = vld [vmem:[#allocation2 + $0xb0] sm:$0xff]  ;;  %vm797_vm4 = vcmp.lt.s32.totalorder %v3160_v24, 7  ;;  %vm839_vm5 = vcmp.lt.s32.totalorder %v3160_v24, 6  ;;  %vm881_vm6 = vcmp.lt.s32.totalorder %v3160_v24, 5 }
  0x48   : > { %2898 = vmatpush.bf16.msra.mxu2 %v2868_v2  ;;  %2899 = vmatpush.bf16.msra.mxu3 %v2868_v2  ;;  %v2857_v18 = vld [vmem:[%s3111_s11 + $0x38] sm:$0xff]  ;;  %v613_v23 = vld [vmem:[#allocation2 + $0xd0] sm:$0xff]  ;;  %v605_v25 = vld [vmem:[%s4602_s3] sm:$0x7f]  ;;  %v636_v26 = vrot.slane %v612_v22, 5  ;;  %v680_v28 = vrot.slane %v612_v22, 6 }
  0x49   : > { %v2861_v19 = vld [vmem:[%s3111_s11 + $0x58] sm:$0xff]  ;;  %v644_v27 = vrot.slane %v613_v23, 5  ;;  %v688_v29 = vrot.slane %v613_v23, 6  ;;  %v3166_v30 = vperm.slane %v605_v25, 0  ;;  %v3169_v31 = vperm.slane %v605_v25, 1  ;;  %v614_v40 = vld [vmem:[#allocation2 + $0x10] sm:$0xff] }
  0x4a   : > { %v2865_v20 = vld [vmem:[%s3111_s11 + $0x78] sm:$0xff]  ;;  %v722_v34 = vrot.slane %v612_v22, 7  ;;  %v730_v35 = vrot.slane %v613_v23, 7  ;;  %v3178_v38 = vperm.slane %v605_v25, 2  ;;  %v3183_v43 = vperm.slane %v605_v25, 3  ;;  %v615_v54 = vld [vmem:[#allocation2 + $0x48] sm:$0xff] }
  0x4b   : > { %469 = vmatpush.bf16.msra.mxu0 %v2867_v3  ;;  %2900 = vmatpush.bf16.msra.mxu1 %v2867_v3  ;;  %v655_v32 = vsel %vm654_vm1, %v636_v26, %v644_v27  ;;  %v697_v33 = vsel %vm696_vm2, %v680_v28, %v688_v29  ;;  %v781_v44 = vrot.slane %v613_v23, 1  ;;  %v789_v47 = vrot.slane %v614_v40, 1  ;;  %v3193_v55 = vld [vmem:[#allocation2 + $0x120] sm:$0xff]  ;;  %v606_v58 = vld [vmem:[%s4602_s3 + $0x8] sm:$0x7f]  ;;  %s2974_s26 = scalar_lea.hbm %s2973_s25, 32 }
  0x4c   : > { %2901 = vmatpush.bf16.msra.mxu2 %v2867_v3  ;;  %2902 = vmatpush.bf16.msra.mxu3 %v2867_v3  ;;  %v664_v36 = vmul.f32 %v3166_v30, %v655_v32  ;;  %v706_v37 = vmul.f32 %v3169_v31, %v697_v33  ;;  %v739_v39 = vsel %vm738_vm3, %v722_v34, %v730_v35  ;;  %v3187_v48 = vperm.slane %v605_v25, 4  ;;  %p2975_p12 = scmp.ne.s32.totalorder %s2973_s25, %s2974_s26  ;;  %p2980_p2 = scmp.lt.s32.totalorder %s2978_s8, %s2974_s26 }
  0x4d   : > { %v748_v42 = vmul.f32 %v3178_v38, %v739_v39  ;;  %v765_v46 = vmul.f32 %v3183_v43, %v613_v23  ;;  %v798_v50 = vsel %vm797_vm4, %v781_v44, %v789_v47  ;;  %v823_v51 = vrot.slane %v613_v23, 2  ;;  %v618_v47 = vld [vmem:[#allocation2 + $0xf8] sm:$0xff] }
  0x4e   : > { %v714_v41 = vadd.f32 %v706_v37, %v664_v36  ;;  %v831_v52 = vrot.slane %v614_v40, 2  ;;  %v807_v53 = vmul.f32 %v3187_v48, %v798_v50  ;;  %v3197_v57 = vperm.slane %v605_v25, 5  ;;  %p2976_p13 = pnand %p2975_p12, %p3093_p5  ;;  %p2981_p3 = por %p2980_p2, %p2979_p1 }
  0x4f   : > { %470 = vmatpush.bf16.msra.mxu0 %v2866_v4  ;;  %2903 = vmatpush.bf16.msra.mxu1 %v2866_v4  ;;  %v637_v59 = vrot.slane %v615_v54, 5  ;;  %v645_v60 = vrot.slane %v3193_v55, 5  ;;  %v865_v62 = vrot.slane %v613_v23, 3  ;;  %v873_v0 = vrot.slane %v614_v40, 3 }
  0x50   : > { %2904 = vmatpush.bf16.msra.mxu2 %v2866_v4  ;;  %2905 = vmatpush.bf16.msra.mxu3 %v2866_v4  ;;  %v756_v45 = vadd.f32 %v748_v42, %v714_v41  ;;  %v840_v56 = vsel %vm839_vm5, %v823_v51, %v831_v52  ;;  %4691 = vst [vmem:[#allocation6_spill] sm:$0xff] %v3197_v57  ;;  %v3205_v1 = vperm.slane %v605_v25, 6  ;;  %v681_v3 = vrot.slane %v615_v54, 6  ;;  %p2977_p0 = pneg %p2976_p13 }
  0x51   : > { %v849_v63 = vmul.f32 %v3197_v57, %v840_v56  ;;  %v656_v2 = vsel %vm654_vm1, %v637_v59, %v645_v60  ;;  %v689_v4 = vrot.slane %v3193_v55, 6  ;;  %v782_v25 = vrot.slane %v3193_v55, 1 }
  0x52   : > { %2828 = vmatmul.msk.bf16.vlgmr.msra.gmra.mxu0 %vm414_vm0, %v2850_v5  ;;  %2832 = vmatmul.msk.bf16.vlgmr.msra.gmra.mxu1 %vm414_vm0, %v2854_v6  ;;  %v773_v49 = vadd.f32 %v765_v46, %v756_v45  ;;  %4692 = vst [vmem:[#allocation7_spill] sm:$0xff] %v3205_v1  ;;  %v882_v6 = vsel %vm881_vm6, %v865_v62, %v873_v0  ;;  %v3231_v29 = vperm.slane %v606_v58, 3  ;;  %v824_v35 = vrot.slane %v3193_v55, 2  ;;  %p2982_p4 = pnand %p2981_p3, %p2977_p0 }
  0x53   : > { %2836 = vmatmul.msk.bf16.vlgmr.msra.gmra.mxu2 %vm414_vm0, %v2858_v7  ;;  %2840 = vmatmul.msk.bf16.vlgmr.msra.gmra.mxu3 %vm414_vm0, %v2862_v8  ;;  %v3212_v7 = vperm.slane %v606_v58, 0  ;;  %v698_v8 = vsel %vm696_vm2, %v681_v3, %v689_v4  ;;  %v766_v33 = vmul.f32 %v3183_v43, %v3193_v55  ;;  %v3240_v40 = vperm.slane %v606_v58, 4 }
  0x54   : > { %v815_v61 = vadd.f32 %v807_v53, %v773_v49  ;;  %4695 = vst [vmem:[#allocation10_spill] sm:$0xff] %v3231_v29  ;;  %v1056_v39 = vmul.f32 %v3231_v29, %v3193_v55  ;;  %v866_v45 = vrot.slane %v3193_v55, 3  ;;  %v3246_v49 = vld [vmem:[#allocation2 + $0x100] sm:$0xff]  ;;  %v3249_v52 = vperm.slane %v606_v58, 5 }
  0x55   : > { %4696 = vst [vmem:[#allocation11_spill] sm:$0xff] %v3240_v40  ;;  %v638_v56 = vrot.slane %v618_v47, 5  ;;  %v646_v59 = vrot.slane %v3246_v49, 5  ;;  %v3256_v62 = vperm.slane %v606_v58, 6  ;;  %v682_v0 = vrot.slane %v618_v47, 6 }
  0x56   : > { %v857_v5 = vadd.f32 %v849_v63, %v815_v61  ;;  %4697 = vst [vmem:[#allocation12_spill] sm:$0xff] %v3249_v52  ;;  %v3261_v63 = vld [vmem:[%s4602_s3 + $0x10] sm:$0x7f] }
  0x57   : > { %4698 = vst [vmem:[#allocation13_spill] sm:$0xff] %v3256_v62 }
  0x62   : > { %2829 = vmatmul.msk.bf16.gmra.mxu0 %vm414_vm0, %v2851_v9  ;;  %2833 = vmatmul.msk.bf16.gmra.mxu1 %vm414_vm0, %v2855_v10  ;;  %v723_v9 = vrot.slane %v615_v54, 7  ;;  %v731_v10 = vrot.slane %v3193_v55, 7 }
  0x63   : > { %2837 = vmatmul.msk.bf16.gmra.mxu2 %vm414_vm0, %v2859_v11  ;;  %2841 = vmatmul.msk.bf16.gmra.mxu3 %vm414_vm0, %v2863_v12  ;;  %v891_v11 = vmul.f32 %v3205_v1, %v882_v6  ;;  %v665_v12 = vmul.f32 %v3166_v30, %v656_v2 }
  0x72   : > { %2830 = vmatmul.msk.bf16.gmra.mxu0 %vm414_vm0, %v2852_v13  ;;  %2834 = vmatmul.msk.bf16.gmra.mxu1 %vm414_vm0, %v2856_v14  ;;  %v707_v13 = vmul.f32 %v3169_v31, %v698_v8  ;;  %v957_v14 = vmul.f32 %v3212_v7, %v656_v2  ;;  %v690_v2 = vrot.slane %v3246_v49, 6 }
  0x73   : > { %2838 = vmatmul.msk.bf16.gmra.mxu2 %vm414_vm0, %v2860_v15  ;;  %2842 = vmatmul.msk.bf16.gmra.mxu3 %vm414_vm0, %v2864_v16  ;;  %v3221_v15 = vperm.slane %v606_v58, 1  ;;  %v740_v16 = vsel %vm738_vm3, %v723_v9, %v731_v10  ;;  %v724_v10 = vrot.slane %v618_v47, 7 }
  0x74   : > { %v715_v21 = vadd.f32 %v707_v13, %v665_v12  ;;  %v749_v22 = vmul.f32 %v3178_v38, %v740_v16  ;;  %v699_v9 = vsel %vm696_vm2, %v682_v0, %v690_v2  ;;  %v867_v0 = vrot.slane %v3246_v49, 3 }
  0x75   : > { %4693 = vst [vmem:[#allocation8_spill] sm:$0xff] %v3221_v15 }
  0x76   : > { %v757_v32 = vadd.f32 %v749_v22, %v715_v21 }
  0x78   : > { %v774_v41 = vadd.f32 %v766_v33, %v757_v32 }
  0x82   : > { %2831 = vmatmul.msk.bf16.gmra.mxu0 %vm414_vm0, %v2853_v17  ;;  %2835 = vmatmul.msk.bf16.gmra.mxu1 %vm414_vm0, %v2857_v18  ;;  %v899_v17 = vadd.f32 %v891_v11, %v857_v5  ;;  %v617_v18 = vld [vmem:[#allocation2 + $0x38] sm:$0xff]  ;;  %v657_v5 = vsel %vm654_vm1, %v638_v56, %v646_v59  ;;  %v732_v11 = vrot.slane %v3246_v49, 7  ;;  %v3305_v59 = vperm.slane %v3261_v63, 4 }
  0x83   : > { %2839 = vmatmul.msk.bf16.gmra.mxu2 %vm414_vm0, %v2861_v19  ;;  %2843 = vmatmul.msk.bf16.gmra.mxu3 %vm414_vm0, %v2865_v20  ;;  %v998_v19 = vmul.f32 %v3221_v15, %v698_v8  ;;  %v3226_v20 = vperm.slane %v606_v58, 2  ;;  %v790_v26 = vrot.slane %v617_v18, 1  ;;  %v832_v36 = vrot.slane %v617_v18, 2 }
  0x84   : > { %v965_v23 = vadd.f32 %v957_v14, %v899_v17  ;;  %v874_v46 = vrot.slane %v617_v18, 3  ;;  %v3269_v58 = vperm.slane %v3261_v63, 0  ;;  %v958_v13 = vmul.f32 %v3212_v7, %v657_v5  ;;  %4703 = vst [vmem:[#allocation18_spill] sm:$0xff] %v3305_v59 }
  0x85   : > { %4694 = vst [vmem:[#allocation9_spill] sm:$0xff] %v3226_v20  ;;  %v1039_v28 = vmul.f32 %v3226_v20, %v740_v16  ;;  %v799_v34 = vsel %vm797_vm4, %v782_v25, %v790_v26  ;;  %v841_v44 = vsel %vm839_vm5, %v824_v35, %v832_v36  ;;  %v3277_v17 = vperm.slane %v3261_v63, 1  ;;  %v620_v25 = vld [vmem:[#allocation2 + $0x80] sm:$0xff] }
  0x86   : > { %v1006_v27 = vadd.f32 %v998_v19, %v965_v23  ;;  %v808_v42 = vmul.f32 %v3187_v48, %v799_v34  ;;  %v1097_v51 = vmul.f32 %v3240_v40, %v799_v34  ;;  %v850_v54 = vmul.f32 %v3197_v57, %v841_v44  ;;  %4699 = vst [vmem:[#allocation14_spill] sm:$0xff] %v3269_v58 }
  0x87   : > { %v883_v60 = vsel %vm881_vm6, %v866_v45, %v874_v46  ;;  %v1138_v55 = vmul.f32 %v3249_v52, %v841_v44  ;;  %v1245_v16 = vmul.f32 %v3269_v58, %v657_v5  ;;  %4700 = vst [vmem:[#allocation15_spill] sm:$0xff] %v3277_v17  ;;  %v666_v18 = vmul.f32 %v3166_v30, %v657_v5 }
  0x88   : > { %v1047_v37 = vadd.f32 %v1039_v28, %v1006_v27  ;;  %v816_v53 = vadd.f32 %v808_v42, %v774_v41  ;;  %v892_v4 = vmul.f32 %v3205_v1, %v883_v60  ;;  %v1179_v8 = vmul.f32 %v3256_v62, %v883_v60 }
  0x89   : > { %v708_v19 = vmul.f32 %v3169_v31, %v699_v9  ;;  %v741_v21 = vsel %vm738_vm3, %v724_v10, %v732_v11  ;;  %v999_v23 = vmul.f32 %v3221_v15, %v699_v9  ;;  %v1286_v27 = vmul.f32 %v3277_v17, %v699_v9 }
  0x8a   : > { %v1064_v50 = vadd.f32 %v1056_v39, %v1047_v37  ;;  %v858_v3 = vadd.f32 %v850_v54, %v816_v53  ;;  %v3286_v28 = vperm.slane %v3261_v63, 2  ;;  %v750_v33 = vmul.f32 %v3178_v38, %v741_v21 }
  0x8b   : > { %v716_v32 = vadd.f32 %v708_v19, %v666_v18  ;;  %v783_v34 = vrot.slane %v3246_v49, 1  ;;  %v791_v35 = vrot.slane %v620_v25, 1  ;;  %v1040_v37 = vmul.f32 %v3226_v20, %v741_v21  ;;  %v621_v18 = vld [vmem:[#allocation2 + $0x108] sm:$0xff] }
  0x8c   : > { %v1105_v61 = vadd.f32 %v1097_v51, %v1064_v50  ;;  %v900_v12 = vadd.f32 %v892_v4, %v858_v3  ;;  %4701 = vst [vmem:[#allocation16_spill] sm:$0xff] %v3286_v28  ;;  %v1327_v41 = vmul.f32 %v3286_v28, %v741_v21  ;;  %v3293_v42 = vperm.slane %v3261_v63, 3 }
  0x8d   : > { %v758_v44 = vadd.f32 %v750_v33, %v716_v32  ;;  %v767_v45 = vmul.f32 %v3183_v43, %v3246_v49  ;;  %v825_v46 = vrot.slane %v3246_v49, 2  ;;  %v833_v47 = vrot.slane %v620_v25, 2  ;;  %v3328_v33 = vld [vmem:[%s4601_s2] ss:$0 sm:$0xff] }
  0x8e   : > { %v1146_v6 = vadd.f32 %v1138_v55, %v1105_v61  ;;  %v966_v22 = vadd.f32 %v958_v13, %v900_v12  ;;  %4702 = vst [vmem:[#allocation17_spill] sm:$0xff] %v3293_v42  ;;  %v800_v50 = vsel %vm797_vm4, %v783_v34, %v791_v35  ;;  %v1057_v53 = vmul.f32 %v3231_v29, %v3246_v49  ;;  %v608_v34 = vld [vmem:[%s4602_s3 + $0x18] sm:$0x7f] }
  0x8f   : > { %v1344_v56 = vmul.f32 %v3293_v42, %v3246_v49  ;;  %v775_v60 = vadd.f32 %v767_v45, %v758_v44  ;;  %v809_v61 = vmul.f32 %v3187_v48, %v800_v50  ;;  %v842_v55 = vsel %vm839_vm5, %v825_v46, %v833_v47 }
  0x90   : > { %v1187_v14 = vadd.f32 %v1179_v8, %v1146_v6  ;;  %v1007_v36 = vadd.f32 %v999_v23, %v966_v22  ;;  %v875_v2 = vrot.slane %v620_v25, 3  ;;  %v1098_v4 = vmul.f32 %v3240_v40, %v800_v50  ;;  %v623_v25 = vld [vmem:[#allocation2 + $0xf0] sm:$0xff] }
  0x91   : > { %v1385_v6 = vmul.f32 %v3305_v59, %v800_v50  ;;  %v3314_v8 = vperm.slane %v3261_v63, 5  ;;  %v817_v11 = vadd.f32 %v809_v61, %v775_v60  ;;  %v851_v12 = vmul.f32 %v3197_v57, %v842_v55 }
  0x92   : > { %v1253_v26 = vadd.f32 %v1245_v16, %v1187_v14  ;;  %v1048_v51 = vadd.f32 %v1040_v37, %v1007_v36  ;;  %v884_v14 = vsel %vm881_vm6, %v867_v0, %v875_v2  ;;  %v1139_v16 = vmul.f32 %v3249_v52, %v842_v55  ;;  %v3344_v2 = vld [vmem:[#allocation2 + $0x70] sm:$0xff] }
  0x93   : > { %4704 = vst [vmem:[#allocation19_spill] sm:$0xff] %v3314_v8  ;;  %v1426_v21 = vmul.f32 %v3314_v8, %v842_v55  ;;  %v3322_v22 = vperm.slane %v3261_v63, 6  ;;  %v1180_v36 = vmul.f32 %v3256_v62, %v884_v14  ;;  %v639_v37 = vrot.slane %v621_v18, 5 }
  0x94   : > { %v1294_v39 = vadd.f32 %v1286_v27, %v1253_v26  ;;  %v1065_v3 = vadd.f32 %v1057_v53, %v1048_v51  ;;  %v859_v26 = vadd.f32 %v851_v12, %v817_v11  ;;  %v893_v27 = vmul.f32 %v3205_v1, %v884_v14 }
  0x95   : > { %4705 = vst [vmem:[#allocation20_spill] sm:$0xff] %v3322_v22  ;;  %v792_v45 = vrot.slane %v623_v25, 1  ;;  %v1467_v47 = vmul.f32 %v3322_v22, %v884_v14  ;;  %v834_v50 = vrot.slane %v623_v25, 2  ;;  %v876_v51 = vrot.slane %v623_v25, 3 }
  0x96   : > { %v1335_v54 = vadd.f32 %v1327_v41, %v1294_v39  ;;  %v1106_v49 = vadd.f32 %v1098_v4, %v1065_v3  ;;  %v683_v39 = vrot.slane %v621_v18, 6  ;;  %v725_v41 = vrot.slane %v621_v18, 7 }
  0x97   : > { %v901_v53 = vadd.f32 %v893_v27, %v859_v26  ;;  %v3340_v55 = vperm.slane %v608_v34, 0  ;;  %v3342_v0 = vperm.slane %v608_v34, 1  ;;  %v3346_v3 = vperm.slane %v608_v34, 2 }
  0x98   : > { %v1352_v5 = vadd.f32 %v1344_v56, %v1335_v54  ;;  %v1147_v35 = vadd.f32 %v1139_v16, %v1106_v49  ;;  %v3335_v54 = vperm.slane %v608_v34, 3  ;;  %v3337_v56 = vld [vmem:[#allocation2 + $0x18] sm:$0xff]  ;;  %v3348_v4 = vperm.slane %v608_v34, 4 }
  0x99   : > { %4706 = vst [vmem:[#allocation21_spill] sm:$0xff] %v3340_v55 }
  0x9a   : > { %v1393_v19 = vadd.f32 %v1385_v6, %v1352_v5  ;;  %v1188_v61 = vadd.f32 %v1180_v36, %v1147_v35  ;;  %4707 = vst [vmem:[#allocation22_spill] sm:$0xff] %v3342_v0  ;;  %v3350_v5 = vperm.slane %v608_v34, 5  ;;  %v3352_v6 = vperm.slane %v608_v34, 6 }
  0x9b   : > { %4708 = vst [vmem:[#allocation23_spill] sm:$0xff] %v3348_v4 }
  0x9c   : > { %v1434_v46 = vadd.f32 %v1426_v21, %v1393_v19 }
  0x9e   : > { %v1475_v12 = vadd.f32 %v1467_v47, %v1434_v46 }
  0xcf   : > { %v472_v9 = vpop.f32.mrf.mxu0  ;;  %v492_v10 = vpop.f32.mrf.mxu1 }
  0xd0   : > { %v552_v13 = vmax.f32 %v472_v9, %v492_v10 }
  0xd6   : > { %v512_v23 = vpop.f32.mrf.mxu2  ;;  %v532_v63 = vpop.f32.mrf.mxu3 }
  0xd7   : > { %v553_v32 = vmax.f32 %v552_v13, %v512_v23  ;;  %v3354_v9 = vpop.f32.mrf.mxu0  ;;  %v3356_v10 = vpop.f32.mrf.mxu1  ;;  %v3361_v13 = vld [vmem:[%s4602_s3 + $0x20] sm:$0x7f] }
  0xd8   : > { %v555_v27 = vmax.f32 %v3354_v9, %v3356_v10  ;;  %v3372_v36 = vperm.slane %v3361_v13, 3 }
  0xd9   : > { %v554_v44 = vmax.f32 %v553_v32, %v532_v63 }
  0xda   : > { %4709 = vst [vmem:[#allocation24_spill] sm:$0xff] %v3372_v36 }
  0xdb   : > { %v580_v60 = vadd.f32 %v3328_v33, %v554_v44 }
  0xdd   : > { %v588_v11 = vmax.f32 %v580_v60, 0.0 }
  0xdf   : > { %v647_v23 = vrot.slane %v588_v11, 5  ;;  %v691_v25 = vrot.slane %v588_v11, 6  ;;  %v733_v26 = vrot.slane %v588_v11, 7  ;;  %v784_v32 = vrot.slane %v588_v11, 1 }
  0xe0   : > { %v826_v34 = vrot.slane %v588_v11, 2  ;;  %v868_v35 = vrot.slane %v588_v11, 3  ;;  %v768_v47 = vmul.f32 %v3183_v43, %v588_v11  ;;  %v1058_v21 = vmul.f32 %v3231_v29, %v588_v11 }
  0xe1   : > { %v658_v63 = vsel %vm654_vm1, %v639_v37, %v647_v23  ;;  %v700_v44 = vsel %vm696_vm2, %v683_v39, %v691_v25  ;;  %v742_v46 = vsel %vm738_vm3, %v725_v41, %v733_v26  ;;  %v801_v10 = vsel %vm797_vm4, %v784_v32, %v792_v45 }
  0xe2   : > { %v667_v60 = vmul.f32 %v3166_v30, %v658_v63  ;;  %v709_v9 = vmul.f32 %v3169_v31, %v700_v44  ;;  %v843_v37 = vsel %vm839_vm5, %v826_v34, %v834_v50  ;;  %v885_v39 = vsel %vm881_vm6, %v868_v35, %v876_v51 }
  0xe3   : > { %v959_v23 = vmul.f32 %v3212_v7, %v658_v63  ;;  %v1345_v41 = vmul.f32 %v3293_v42, %v588_v11  ;;  %v751_v26 = vmul.f32 %v3178_v38, %v742_v46  ;;  %v810_v19 = vmul.f32 %v3187_v48, %v801_v10 }
  0xe4   : > { %v717_v25 = vadd.f32 %v709_v9, %v667_v60  ;;  %v852_v18 = vmul.f32 %v3197_v57, %v843_v37  ;;  %v894_v45 = vmul.f32 %v3205_v1, %v885_v39  ;;  %v1000_v16 = vmul.f32 %v3221_v15, %v700_v44  ;;  %v514_v9 = vpop.f32.mrf.mxu2 }
  0xe5   : > { %v967_v32 = vadd.f32 %v959_v23, %v901_v53  ;;  %v1041_v50 = vmul.f32 %v3226_v20, %v742_v46  ;;  %v1099_v51 = vmul.f32 %v3240_v40, %v801_v10  ;;  %v1140_v35 = vmul.f32 %v3249_v52, %v843_v37 }
  0xe6   : > { %v759_v34 = vadd.f32 %v751_v26, %v717_v25  ;;  %v1246_v60 = vmul.f32 %v3269_v58, %v658_v63  ;;  %v1181_v14 = vmul.f32 %v3256_v62, %v885_v39  ;;  %v1287_v36 = vmul.f32 %v3277_v17, %v700_v44 }
  0xe7   : > { %v1008_v49 = vadd.f32 %v1000_v16, %v967_v32  ;;  %v1328_v42 = vmul.f32 %v3286_v28, %v742_v46  ;;  %v1386_v29 = vmul.f32 %v3305_v59, %v801_v10  ;;  %v1532_v25 = vmul.f32 %v3340_v55, %v658_v63 }
  0xe8   : > { %v776_v53 = vadd.f32 %v768_v47, %v759_v34  ;;  %v1254_v23 = vadd.f32 %v1246_v60, %v1188_v61  ;;  %v1427_v40 = vmul.f32 %v3314_v8, %v843_v37  ;;  %v1468_v52 = vmul.f32 %v3322_v22, %v885_v39  ;;  %v534_v8 = vpop.f32.mrf.mxu3 }
  0xe9   : > { %v1049_v26 = vadd.f32 %v1041_v50, %v1008_v49  ;;  %v1573_v58 = vmul.f32 %v3342_v0, %v700_v44  ;;  %v1540_v62 = vadd.f32 %v1532_v25, %v1475_v12  ;;  %v1614_v17 = vmul.f32 %v3346_v3, %v742_v46  ;;  %v497_v46 = vpop.f32.mrf.mxu1  ;;  %v4722_v25 = vld [vmem:[#allocation14_spill] sm:$0xff] }
  0xea   : > { %v818_v16 = vadd.f32 %v810_v19, %v776_v53  ;;  %v1295_v32 = vadd.f32 %v1287_v36, %v1254_v23  ;;  %v1631_v47 = vmul.f32 %v3335_v54, %v588_v11  ;;  %v1672_v61 = vmul.f32 %v3348_v4, %v801_v10 }
  0xeb   : > { %v1066_v20 = vadd.f32 %v1058_v21, %v1049_v26  ;;  %v556_v34 = vmax.f32 %v555_v27, %v514_v9  ;;  %v1581_v49 = vadd.f32 %v1573_v58, %v1540_v62  ;;  %v1713_v50 = vmul.f32 %v3350_v5, %v843_v37 }
  0xec   : > { %v860_v60 = vadd.f32 %v852_v18, %v818_v16  ;;  %v1336_v63 = vadd.f32 %v1328_v42, %v1295_v32  ;;  %v1754_v44 = vmul.f32 %v3352_v6, %v885_v39  ;;  %v3415_v12 = vperm.slane %v3361_v13, 0  ;;  %v3423_v42 = vld [vmem:[#allocation2 + $0x20] sm:$0xff] }
  0xed   : > { %v1107_v22 = vadd.f32 %v1099_v51, %v1066_v20  ;;  %v557_v19 = vmax.f32 %v556_v34, %v534_v8  ;;  %v1622_v21 = vadd.f32 %v1614_v17, %v1581_v49  ;;  %v3418_v11 = vperm.slane %v3361_v13, 1  ;;  %v477_v8 = vpop.f32.mrf.mxu0 }
  0xee   : > { %4710 = vst [vmem:[#allocation25_spill] sm:$0xff] %v3415_v12  ;;  %v1353_v36 = vadd.f32 %v1345_v41, %v1336_v63  ;;  %v3421_v27 = vperm.slane %v3361_v13, 2  ;;  %v902_v62 = vadd.f32 %v894_v45, %v860_v60  ;;  %v3427_v18 = vperm.slane %v3361_v13, 4  ;;  %v517_v41 = vpop.f32.mrf.mxu2 }
  0xef   : > { %v1148_v58 = vadd.f32 %v1140_v35, %v1107_v22  ;;  %v581_v20 = vadd.f32 %v3328_v33, %v557_v19  ;;  %v1639_v37 = vadd.f32 %v1631_v47, %v1622_v21  ;;  %v3430_v17 = vperm.slane %v3361_v13, 5  ;;  %v3437_v22 = vld [vmem:[#allocation2 + $0x110] sm:$0xff] }
  0xf0   : > { %v1394_v10 = vadd.f32 %v1386_v29, %v1353_v36  ;;  %v558_v39 = vmax.f32 %v477_v8, %v497_v46  ;;  %v3435_v45 = vperm.slane %v3361_v13, 6  ;;  %v4712_v63 = vrot.slane %v3337_v56, 6 }
  0xf1   : > { %v1189_v51 = vadd.f32 %v1181_v14, %v1148_v58  ;;  %v3432_v9 = vmax.f32 %v581_v20, 0.0  ;;  %v1680_v23 = vadd.f32 %v1672_v61, %v1639_v37  ;;  %v4711_v61 = vrot.slane %v3337_v56, 5 }
  0xf2   : > { %v1435_v53 = vadd.f32 %v1427_v40, %v1394_v10  ;;  %v3445_v32 = vmax.f32 %v558_v39, %v517_v41  ;;  %v4713_v19 = vrot.slane %v3337_v56, 7  ;;  %v4714_v46 = vrot.slane %v3344_v2, 1 }
  0xf3   : > { %v648_v26 = vrot.slane %v3432_v9, 5  ;;  %v692_v16 = vrot.slane %v3432_v9, 6  ;;  %v734_v14 = vrot.slane %v3432_v9, 7  ;;  %v1721_v13 = vadd.f32 %v1713_v50, %v1680_v23 }
  0xf4   : > { %v785_v47 = vrot.slane %v3432_v9, 1  ;;  %v827_v34 = vrot.slane %v3432_v9, 2  ;;  %v869_v36 = vrot.slane %v3432_v9, 3  ;;  %v1476_v21 = vadd.f32 %v1468_v52, %v1435_v53 }
  0xf5   : > { %v659_v60 = vsel %vm654_vm1, %v4711_v61, %v648_v26  ;;  %v701_v49 = vsel %vm696_vm2, %v4712_v63, %v692_v16  ;;  %v743_v50 = vsel %vm738_vm3, %v4713_v19, %v734_v14  ;;  %v769_v8 = vmul.f32 %v3183_v43, %v3432_v9  ;;  %v4717_v63 = vld [vmem:[#allocation9_spill] sm:$0xff] }
  0xf6   : > { %v668_v58 = vmul.f32 %v3166_v30, %v659_v60  ;;  %v710_v20 = vmul.f32 %v3169_v31, %v701_v49  ;;  %v802_v10 = vsel %vm797_vm4, %v785_v47, %v4714_v46  ;;  %v4715_v56 = vrot.slane %v3344_v2, 2 }
  0xf7   : > { %v4716_v39 = vrot.slane %v3344_v2, 3  ;;  %v960_v41 = vmul.f32 %v3212_v7, %v659_v60  ;;  %v1762_v53 = vadd.f32 %v1754_v44, %v1721_v13  ;;  %v752_v26 = vmul.f32 %v3178_v38, %v743_v50  ;;  %v4719_v44 = vld [vmem:[#allocation11_spill] sm:$0xff] }
  0xf8   : > { %v844_v37 = vsel %vm839_vm5, %v827_v34, %v4715_v56  ;;  %v718_v23 = vadd.f32 %v710_v20, %v668_v58  ;;  %v811_v16 = vmul.f32 %v3187_v48, %v802_v10  ;;  %v1001_v2 = vmul.f32 %v3221_v15, %v701_v49  ;;  %v4720_v20 = vld [vmem:[#allocation12_spill] sm:$0xff] }
  0xf9   : > { %v3479_v52 = vsel %vm881_vm6, %v869_v36, %v4716_v39  ;;  %v853_v14 = vmul.f32 %v3197_v57, %v844_v37  ;;  %v968_v34 = vadd.f32 %v960_v41, %v902_v62  ;;  %v1042_v19 = vmul.f32 %v4717_v63, %v743_v50  ;;  %v4718_v36 = vld [vmem:[#allocation10_spill] sm:$0xff]  ;;  %v4721_v39 = vld [vmem:[#allocation13_spill] sm:$0xff]  ;;  %v4723_v62 = vld [vmem:[#allocation15_spill] sm:$0xff] }
  0xfa   : > { %v895_v47 = vmul.f32 %v3205_v1, %v3479_v52  ;;  %v760_v61 = vadd.f32 %v752_v26, %v718_v23  ;;  %v1059_v46 = vmul.f32 %v4718_v36, %v3432_v9  ;;  %v1100_v13 = vmul.f32 %v4719_v44, %v802_v10  ;;  %v4724_v26 = vld [vmem:[#allocation17_spill] sm:$0xff] }
  0xfb   : > { %v1009_v58 = vadd.f32 %v1001_v2, %v968_v34  ;;  %v1141_v56 = vmul.f32 %v4720_v20, %v844_v37  ;;  %v1182_v40 = vmul.f32 %v4721_v39, %v3479_v52  ;;  %v1247_v29 = vmul.f32 %v4722_v25, %v659_v60  ;;  %v4725_v20 = vld [vmem:[#allocation19_spill] sm:$0xff]  ;;  %v4726_v39 = vld [vmem:[#allocation20_spill] sm:$0xff] }
  0xfc   : > { %v777_v35 = vadd.f32 %v769_v8, %v760_v61  ;;  %v1288_v41 = vmul.f32 %v4723_v62, %v701_v49  ;;  %v1329_v23 = vmul.f32 %v3286_v28, %v743_v50  ;;  %v1346_v1 = vmul.f32 %v4724_v26, %v3432_v9 }
  0xfd   : > { %v1050_v63 = vadd.f32 %v1042_v19, %v1009_v58  ;;  %v1255_v36 = vadd.f32 %v1247_v29, %v1189_v51  ;;  %v1387_v44 = vmul.f32 %v3305_v59, %v802_v10  ;;  %v1533_v34 = vmul.f32 %v3340_v55, %v659_v60 }
  0xfe   : > { %v819_v2 = vadd.f32 %v811_v16, %v777_v35  ;;  %v1428_v15 = vmul.f32 %v4725_v20, %v844_v37  ;;  %v1469_v25 = vmul.f32 %v4726_v39, %v3479_v52  ;;  %v1574_v8 = vmul.f32 %v3342_v0, %v701_v49 }
  0xff   : > { %v1067_v61 = vadd.f32 %v1059_v46, %v1050_v63  ;;  %v1296_v62 = vadd.f32 %v1288_v41, %v1255_v36  ;;  %v1541_v28 = vadd.f32 %v1533_v34, %v1476_v21  ;;  %v1615_v57 = vmul.f32 %v3346_v3, %v743_v50 }
 0x100   : > { %v861_v26 = vadd.f32 %v853_v14, %v819_v2  ;;  %v1632_v51 = vmul.f32 %v3335_v54, %v3432_v9  ;;  %v1673_v29 = vmul.f32 %v3348_v4, %v802_v10  ;;  %v1820_v35 = vmul.f32 %v3415_v12, %v659_v60  ;;  %v537_v2 = vpop.f32.mrf.mxu3 }
 0x101   : > { %v1108_v16 = vadd.f32 %v1100_v13, %v1067_v61  ;;  %v1337_v19 = vadd.f32 %v1329_v23, %v1296_v62  ;;  %v1582_v58 = vadd.f32 %v1574_v8, %v1541_v28  ;;  %v1714_v39 = vmul.f32 %v3350_v5, %v844_v37  ;;  %v4727_v13 = vld [vmem:[#allocation24_spill] sm:$0xff]  ;;  %v479_v23 = vpop.f32.mrf.mxu0 }
 0x102   : > { %v3512_v20 = vadd.f32 %v895_v47, %v861_v26  ;;  %v1755_v21 = vmul.f32 %v3352_v6, %v3479_v52  ;;  %v1828_v63 = vadd.f32 %v1820_v35, %v1762_v53  ;;  %v1861_v14 = vmul.f32 %v3418_v11, %v701_v49  ;;  %v499_v26 = vpop.f32.mrf.mxu1 }
 0x103   : > { %v1149_v36 = vadd.f32 %v1141_v56, %v1108_v16  ;;  %v1354_v46 = vadd.f32 %v1346_v1, %v1337_v19  ;;  %v1623_v41 = vadd.f32 %v1615_v57, %v1582_v58  ;;  %v1902_v34 = vmul.f32 %v3421_v27, %v743_v50  ;;  %v3525_v57 = vld [vmem:[#allocation2 + $0x8] sm:$0xff] }
 0x104   : > { %v1869_v60 = vadd.f32 %v1861_v14, %v1828_v63  ;;  %v1919_v28 = vmul.f32 %v4727_v13, %v3432_v9  ;;  %v1960_v62 = vmul.f32 %v3427_v18, %v802_v10  ;;  %v560_v47 = vmax.f32 %v3445_v32, %v537_v2  ;;  %v519_v32 = vpop.f32.mrf.mxu2  ;;  %v4743_v19 = vld [vmem:[#allocation13_spill] sm:$0xff] }
 0x105   : > { %v3522_v8 = vadd.f32 %v1182_v40, %v1149_v36  ;;  %v1395_v53 = vadd.f32 %v1387_v44, %v1354_v46  ;;  %v1640_v49 = vadd.f32 %v1632_v51, %v1623_v41  ;;  %v2001_v1 = vmul.f32 %v3430_v17, %v844_v37  ;;  %v3536_v37 = vld [vmem:[#allocation2 + $0xa8] sm:$0xff]  ;;  %v4742_v36 = vld [vmem:[#allocation12_spill] sm:$0xff] }
 0x106   : > { %v1910_v50 = vadd.f32 %v1902_v34, %v1869_v60  ;;  %v3529_v56 = vmul.f32 %v3435_v45, %v3479_v52  ;;  %v582_v9 = vadd.f32 %v3328_v33, %v560_v47  ;;  %v836_v10 = vrot.slane %v3437_v22, 2 }
 0x107   : > { %v1436_v61 = vadd.f32 %v1428_v15, %v1395_v53  ;;  %v1681_v35 = vadd.f32 %v1673_v29, %v1640_v49  ;;  %v878_v40 = vrot.slane %v3437_v22, 3  ;;  %v561_v44 = vmax.f32 %v479_v23, %v499_v26 }
 0x108   : > { %4728 = vst [vmem:[#allocation24_spill] sm:$0xff] %v3529_v56  ;;  %v1927_v51 = vadd.f32 %v1919_v28, %v1910_v50  ;;  %v3534_v16 = vmax.f32 %v582_v9, 0.0  ;;  %v4731_v28 = vrot.slane %v3423_v42, 5  ;;  %v4733_v47 = vrot.slane %v3423_v42, 6 }
 0x109   : > { %v1477_v58 = vadd.f32 %v1469_v25, %v1436_v61  ;;  %v1722_v63 = vadd.f32 %v1714_v39, %v1681_v35  ;;  %v3540_v14 = vmax.f32 %v561_v44, %v519_v32  ;;  %v4734_v23 = vrot.slane %v3423_v42, 7 }
 0x10a   : > { %4729 = vst [vmem:[#allocation26_spill] sm:$0xff] %v3534_v16  ;;  %v1968_v15 = vadd.f32 %v1960_v62, %v1927_v51  ;;  %v649_v29 = vrot.slane %v3534_v16, 5  ;;  %v4636_v46 = vrot.slane %v3534_v16, 6  ;;  %v4635_v41 = vrot.slane %v3534_v16, 7 }
 0x10b   : > { %599 = vst [vmem:[#allocation2 + $0x128] sm:$0xff] %v3534_v16  ;;  %v1763_v34 = vadd.f32 %v1755_v21, %v1722_v63  ;;  %v4634_v2 = vrot.slane %v3534_v16, 1  ;;  %v828_v60 = vrot.slane %v3534_v16, 2  ;;  %v770_v42 = vmul.f32 %v3183_v43, %v3534_v16  ;;  %v4736_v63 = vld [vmem:[#allocation6_spill] sm:$0xff] }
 0x10c   : > { %v3550_v39 = vadd.f32 %v2001_v1, %v1968_v15  ;;  %v3556_v62 = vsel %vm654_vm1, %v4731_v28, %v649_v29  ;;  %v702_v21 = vsel %vm696_vm2, %v4733_v47, %v4636_v46  ;;  %v744_v26 = vsel %vm738_vm3, %v4734_v23, %v4635_v41  ;;  %v4737_v47 = vld [vmem:[#allocation8_spill] sm:$0xff]  ;;  %v4741_v46 = vld [vmem:[#allocation11_spill] sm:$0xff] }
 0x10d   : > { %4732 = vst [vmem:[#allocation28_spill] sm:$0xff] %v3556_v62  ;;  %v669_v53 = vmul.f32 %v3166_v30, %v3556_v62  ;;  %v711_v49 = vmul.f32 %v3169_v31, %v702_v21  ;;  %v4735_v1 = vrot.slane %v3437_v22, 1  ;;  %v845_v32 = vsel %vm839_vm5, %v828_v60, %v836_v10  ;;  %v4738_v10 = vld [vmem:[#allocation9_spill] sm:$0xff] }
 0x10e   : > { %4730 = vst [vmem:[#allocation27_spill] sm:$0xff] %v3550_v39  ;;  %v870_v61 = vrot.slane %v3534_v16, 3  ;;  %v961_v35 = vmul.f32 %v3212_v7, %v3556_v62  ;;  %v753_v22 = vmul.f32 %v3178_v38, %v744_v26  ;;  %v854_v15 = vmul.f32 %v4736_v63, %v845_v32 }
 0x10f   : > { %v803_v50 = vsel %vm797_vm4, %v4634_v2, %v4735_v1  ;;  %v719_v44 = vadd.f32 %v711_v49, %v669_v53  ;;  %v1002_v23 = vmul.f32 %v4737_v47, %v702_v21  ;;  %v1043_v60 = vmul.f32 %v4738_v10, %v744_v26  ;;  %v4739_v2 = vld [vmem:[#allocation7_spill] sm:$0xff]  ;;  %v4740_v53 = vld [vmem:[#allocation10_spill] sm:$0xff]  ;;  %v4746_v10 = vld [vmem:[#allocation16_spill] sm:$0xff] }
 0x110   : > { %v812_v51 = vmul.f32 %v3187_v48, %v803_v50  ;;  %v887_v29 = vsel %vm881_vm6, %v870_v61, %v878_v40  ;;  %v969_v28 = vadd.f32 %v961_v35, %v3512_v20  ;;  %v1060_v49 = vmul.f32 %v4740_v53, %v3534_v16  ;;  %v4744_v40 = vld [vmem:[#allocation14_spill] sm:$0xff]  ;;  %v4745_v35 = vld [vmem:[#allocation15_spill] sm:$0xff] }
 0x111   : > { %v761_v1 = vadd.f32 %v753_v22, %v719_v44  ;;  %v896_v41 = vmul.f32 %v4739_v2, %v887_v29  ;;  %v1101_v9 = vmul.f32 %v4741_v46, %v803_v50  ;;  %v1142_v52 = vmul.f32 %v4742_v36, %v845_v32  ;;  %v4747_v22 = vld [vmem:[#allocation17_spill] sm:$0xff]  ;;  %v4748_v36 = vld [vmem:[#allocation19_spill] sm:$0xff] }
 0x112   : > { %v1010_v25 = vadd.f32 %v1002_v23, %v969_v28  ;;  %v1183_v56 = vmul.f32 %v4743_v19, %v887_v29  ;;  %v1248_v20 = vmul.f32 %v4744_v40, %v3556_v62  ;;  %v1289_v39 = vmul.f32 %v4745_v35, %v702_v21  ;;  %v4749_v40 = vld [vmem:[#allocation20_spill] sm:$0xff] }
 0x113   : > { %v778_v61 = vadd.f32 %v770_v42, %v761_v1  ;;  %v1330_v44 = vmul.f32 %v4746_v10, %v744_v26  ;;  %v1347_v2 = vmul.f32 %v4747_v22, %v3534_v16  ;;  %v1388_v28 = vmul.f32 %v3305_v59, %v803_v50 }
 0x114   : > { %v1051_v47 = vadd.f32 %v1043_v60, %v1010_v25  ;;  %v1256_v53 = vadd.f32 %v1248_v20, %v3522_v8  ;;  %v1534_v23 = vmul.f32 %v3340_v55, %v3556_v62  ;;  %v1429_v46 = vmul.f32 %v4748_v36, %v845_v32 }
 0x115   : > { %v820_v19 = vadd.f32 %v812_v51, %v778_v61  ;;  %v1470_v42 = vmul.f32 %v4749_v40, %v887_v29  ;;  %v1575_v1 = vmul.f32 %v3342_v0, %v702_v21  ;;  %v1616_v22 = vmul.f32 %v3346_v3, %v744_v26 }
 0x116   : > { %v1068_v35 = vadd.f32 %v1060_v49, %v1051_v47  ;;  %v1297_v10 = vadd.f32 %v1289_v39, %v1256_v53  ;;  %v1542_v63 = vadd.f32 %v1534_v23, %v1477_v58  ;;  %v1633_v8 = vmul.f32 %v3335_v54, %v3534_v16  ;;  %v539_v23 = vpop.f32.mrf.mxu3 }
 0x117   : > { %v862_v25 = vadd.f32 %v854_v15, %v820_v19  ;;  %v1674_v60 = vmul.f32 %v3348_v4, %v803_v50  ;;  %v1821_v51 = vmul.f32 %v3415_v12, %v3556_v62  ;;  %v1715_v40 = vmul.f32 %v3350_v5, %v845_v32 }
 0x118   : > { %v1109_v20 = vadd.f32 %v1101_v9, %v1068_v35  ;;  %v1338_v61 = vadd.f32 %v1330_v44, %v1297_v10  ;;  %v1583_v36 = vadd.f32 %v1575_v1, %v1542_v63  ;;  %v1756_v58 = vmul.f32 %v3352_v6, %v887_v29  ;;  %v3630_v10 = vld [vmem:[#allocation2 + $0x90] sm:$0xff] }
 0x119   : > { %v3621_v0 = vadd.f32 %v896_v41, %v862_v25  ;;  %v1829_v39 = vadd.f32 %v1821_v51, %v1763_v34  ;;  %v1862_v19 = vmul.f32 %v3418_v11, %v702_v21  ;;  %v1903_v49 = vmul.f32 %v3421_v27, %v744_v26  ;;  %v522_v25 = vpop.f32.mrf.mxu2 }
 0x11a   : > { %v1150_v15 = vadd.f32 %v1142_v52, %v1109_v20  ;;  %v1355_v47 = vadd.f32 %v1347_v2, %v1338_v61  ;;  %v1624_v53 = vadd.f32 %v1616_v22, %v1583_v36  ;;  %v1920_v9 = vmul.f32 %v4727_v13, %v3534_v16  ;;  %v482_v36 = vpop.f32.mrf.mxu0  ;;  %v502_v2 = vpop.f32.mrf.mxu1 }
 0x11b   : > { %v1870_v4 = vadd.f32 %v1862_v19, %v1829_v39  ;;  %v1961_v63 = vmul.f32 %v3427_v18, %v803_v50  ;;  %v563_v41 = vmax.f32 %v3540_v14, %v539_v23  ;;  %v2002_v21 = vmul.f32 %v3430_v17, %v845_v32  ;;  %v3637_v50 = vld [vmem:[#allocation2 + $0x148] sm:$0xff] }
 0x11c   : > { %v1396_v35 = vadd.f32 %v1388_v28, %v1355_v47  ;;  %v1641_v34 = vadd.f32 %v1633_v8, %v1624_v53  ;;  %v3634_v52 = vmul.f32 %v3435_v45, %v887_v29  ;;  %v1191_v26 = vadd.f32 %v1183_v56, %v1150_v15  ;;  %v4765_v56 = vld [vmem:[#allocation12_spill] sm:$0xff]  ;;  %v4766_v8 = vld [vmem:[#allocation13_spill] sm:$0xff] }
 0x11d   : > { %v1911_v44 = vadd.f32 %v1903_v49, %v1870_v4  ;;  %v583_v22 = vadd.f32 %v3328_v33, %v563_v41  ;;  %v564_v1 = vmax.f32 %v482_v36, %v502_v2  ;;  %v879_v28 = vrot.slane %v3536_v37, 3 }
 0x11e   : > { %4750 = vst [vmem:[#allocation29_spill] sm:$0xff] %v3634_v52  ;;  %v1437_v14 = vadd.f32 %v1429_v46, %v1396_v35  ;;  %v1682_v51 = vadd.f32 %v1674_v60, %v1641_v34  ;;  %v4754_v41 = vrot.slane %v3525_v57, 6  ;;  %v4755_v34 = vrot.slane %v3525_v57, 7  ;;  %v4769_v52 = vld [vmem:[#allocation16_spill] sm:$0xff] }
 0x11f   : > { %v1928_v32 = vadd.f32 %v1920_v9, %v1911_v44  ;;  %v3641_v20 = vmax.f32 %v583_v22, 0.0  ;;  %v3645_v39 = vmax.f32 %v564_v1, %v522_v25  ;;  %v4752_v9 = vrot.slane %v3525_v57, 5 }
 0x120   : > { %v1478_v4 = vadd.f32 %v1470_v42, %v1437_v14  ;;  %v1723_v61 = vadd.f32 %v1715_v40, %v1682_v51  ;;  %v4756_v22 = vrot.slane %v3536_v37, 1  ;;  %v4758_v57 = vrot.slane %v3536_v37, 2  ;;  %v4764_v40 = vld [vmem:[#allocation11_spill] sm:$0xff] }
 0x121   : > { %4751 = vst [vmem:[#allocation30_spill] sm:$0xff] %v3641_v20  ;;  %v1969_v15 = vadd.f32 %v1961_v63, %v1928_v32  ;;  %v650_v46 = vrot.slane %v3641_v20, 5  ;;  %v4643_v60 = vrot.slane %v3641_v20, 6  ;;  %v4642_v47 = vrot.slane %v3641_v20, 7 }
 0x122   : > { %600 = vst [vmem:[#allocation2 + $0x98] sm:$0xff] %v3641_v20  ;;  %v4641_v53 = vrot.slane %v3641_v20, 1  ;;  %v829_v49 = vrot.slane %v3641_v20, 2  ;;  %v1764_v23 = vadd.f32 %v1756_v58, %v1723_v61  ;;  %v771_v44 = vmul.f32 %v3183_v43, %v3641_v20 }
 0x123   : > { %v3660_v63 = vsel %vm654_vm1, %v4752_v9, %v650_v46  ;;  %v703_v35 = vsel %vm696_vm2, %v4754_v41, %v4643_v60  ;;  %v745_v58 = vsel %vm738_vm3, %v4755_v34, %v4642_v47  ;;  %v3685_v25 = vadd.f32 %v2002_v21, %v1969_v15  ;;  %v4759_v41 = vld [vmem:[#allocation6_spill] sm:$0xff]  ;;  %v4760_v15 = vld [vmem:[#allocation8_spill] sm:$0xff]  ;;  %v4762_v47 = vld [vmem:[#allocation7_spill] sm:$0xff] }
 0x124   : > { %4753 = vst [vmem:[#allocation31_spill] sm:$0xff] %v3660_v63  ;;  %v670_v36 = vmul.f32 %v3166_v30, %v3660_v63  ;;  %v712_v2 = vmul.f32 %v3169_v31, %v703_v35  ;;  %v804_v1 = vsel %vm797_vm4, %v4641_v53, %v4756_v22  ;;  %v846_v14 = vsel %vm839_vm5, %v829_v49, %v4758_v57  ;;  %v4761_v49 = vld [vmem:[#allocation9_spill] sm:$0xff] }
 0x125   : > { %4757 = vst [vmem:[#allocation32_spill] sm:$0xff] %v3685_v25  ;;  %v871_v51 = vrot.slane %v3641_v20, 3  ;;  %v962_v32 = vmul.f32 %v3212_v7, %v3660_v63  ;;  %v754_v46 = vmul.f32 %v3178_v38, %v745_v58  ;;  %v813_v9 = vmul.f32 %v3187_v48, %v804_v1 }
 0x126   : > { %v720_v61 = vadd.f32 %v712_v2, %v670_v36  ;;  %v855_v34 = vmul.f32 %v4759_v41, %v846_v14  ;;  %v1003_v22 = vmul.f32 %v4760_v15, %v703_v35  ;;  %v1044_v57 = vmul.f32 %v4761_v49, %v745_v58  ;;  %v4763_v36 = vld [vmem:[#allocation10_spill] sm:$0xff]  ;;  %v4772_v49 = vld [vmem:[#allocation20_spill] sm:$0xff] }
 0x127   : > { %v888_v21 = vsel %vm881_vm6, %v871_v51, %v879_v28  ;;  %v970_v37 = vadd.f32 %v962_v32, %v3621_v0  ;;  %v1061_v2 = vmul.f32 %v4763_v36, %v3641_v20  ;;  %v1102_v42 = vmul.f32 %v4764_v40, %v804_v1  ;;  %v4767_v28 = vld [vmem:[#allocation14_spill] sm:$0xff]  ;;  %v4768_v32 = vld [vmem:[#allocation15_spill] sm:$0xff] }
 0x128   : > { %v762_v53 = vadd.f32 %v754_v46, %v720_v61  ;;  %v897_v60 = vmul.f32 %v4762_v47, %v888_v21  ;;  %v1143_v29 = vmul.f32 %v4765_v56, %v846_v14  ;;  %v1184_v16 = vmul.f32 %v4766_v8, %v888_v21  ;;  %v4770_v46 = vld [vmem:[#allocation17_spill] sm:$0xff]  ;;  %v4771_v8 = vld [vmem:[#allocation19_spill] sm:$0xff] }
 0x129   : > { %v1011_v19 = vadd.f32 %v1003_v22, %v970_v37  ;;  %v1249_v0 = vmul.f32 %v4767_v28, %v3660_v63  ;;  %v1290_v62 = vmul.f32 %v4768_v32, %v703_v35  ;;  %v1331_v61 = vmul.f32 %v4769_v52, %v745_v58 }
 0x12a   : > { %v779_v51 = vadd.f32 %v771_v44, %v762_v53  ;;  %v1348_v25 = vmul.f32 %v4770_v46, %v3641_v20  ;;  %v1389_v40 = vmul.f32 %v3305_v59, %v804_v1  ;;  %v1535_v37 = vmul.f32 %v3340_v55, %v3660_v63  ;;  %v4773_v53 = vld [vmem:[#allocation22_spill] sm:$0xff] }
 0x12b   : > { %v1052_v47 = vadd.f32 %v1044_v57, %v1011_v19  ;;  %v1257_v36 = vadd.f32 %v1249_v0, %v1191_v26  ;;  %v1430_v56 = vmul.f32 %v4771_v8, %v846_v14  ;;  %v1471_v28 = vmul.f32 %v4772_v49, %v888_v21  ;;  %v4774_v19 = vld [vmem:[#allocation23_spill] sm:$0xff]  ;;  %v542_v0 = vpop.f32.mrf.mxu3 }
 0x12c   : > { %v821_v22 = vadd.f32 %v813_v9, %v779_v51  ;;  %v1576_v44 = vmul.f32 %v4773_v53, %v703_v35  ;;  %v1543_v52 = vadd.f32 %v1535_v37, %v1478_v4  ;;  %v1617_v41 = vmul.f32 %v3346_v3, %v745_v58 }
 0x12d   : > { %v1069_v32 = vadd.f32 %v1061_v2, %v1052_v47  ;;  %v1298_v15 = vadd.f32 %v1290_v62, %v1257_v36  ;;  %v1634_v26 = vmul.f32 %v3335_v54, %v3641_v20  ;;  %v1675_v57 = vmul.f32 %v4774_v19, %v804_v1  ;;  %v484_v36 = vpop.f32.mrf.mxu0  ;;  %v504_v2 = vpop.f32.mrf.mxu1 }
 0x12e   : > { %v863_v46 = vadd.f32 %v855_v34, %v821_v22  ;;  %v1822_v9 = vmul.f32 %v3415_v12, %v3660_v63  ;;  %v1584_v49 = vadd.f32 %v1576_v44, %v1543_v52  ;;  %v1716_v53 = vmul.f32 %v3350_v5, %v846_v14 }
 0x12f   : > { %v1110_v51 = vadd.f32 %v1102_v42, %v1069_v32  ;;  %v1339_v8 = vadd.f32 %v1331_v61, %v1298_v15  ;;  %v1757_v62 = vmul.f32 %v3352_v6, %v888_v21  ;;  %v1863_v34 = vmul.f32 %v3418_v11, %v703_v35  ;;  %v524_v15 = vpop.f32.mrf.mxu2  ;;  %v3736_v32 = vld [vmem:[#allocation2 + $0x118] sm:$0xff] }
 0x130   : > { %v3727_v47 = vadd.f32 %v897_v60, %v863_v46  ;;  %v1830_v4 = vadd.f32 %v1822_v9, %v1764_v23  ;;  %v1625_v19 = vadd.f32 %v1617_v41, %v1584_v49  ;;  %v1904_v63 = vmul.f32 %v3421_v27, %v745_v58  ;;  %v3743_v49 = vld [vmem:[#allocation2 + $0x78] sm:$0xff] }
 0x131   : > { %v1151_v37 = vadd.f32 %v1143_v29, %v1110_v51  ;;  %v1356_v22 = vadd.f32 %v1348_v25, %v1339_v8  ;;  %v1921_v52 = vmul.f32 %v4727_v13, %v3641_v20  ;;  %v1962_v42 = vmul.f32 %v3427_v18, %v804_v1 }
 0x132   : > { %v1871_v12 = vadd.f32 %v1863_v34, %v1830_v4  ;;  %v566_v60 = vmax.f32 %v3645_v39, %v542_v0  ;;  %v1642_v35 = vadd.f32 %v1634_v26, %v1625_v19  ;;  %v2003_v61 = vmul.f32 %v3430_v17, %v846_v14  ;;  %v4795_v34 = vld [vmem:[#allocation15_spill] sm:$0xff] }
 0x133   : > { %v1397_v23 = vadd.f32 %v1389_v40, %v1356_v22  ;;  %v567_v29 = vmax.f32 %v484_v36, %v504_v2  ;;  %v1192_v8 = vadd.f32 %v1184_v16, %v1151_v37  ;;  %v3740_v58 = vmul.f32 %v3435_v45, %v888_v21  ;;  %v3758_v51 = vpop.f32.mrf.mxu3 }
 0x134   : > { %v1912_v25 = vadd.f32 %v1904_v63, %v1871_v12  ;;  %v584_v41 = vadd.f32 %v3328_v33, %v566_v60  ;;  %v1683_v46 = vadd.f32 %v1675_v57, %v1642_v35  ;;  %v4777_v2 = vrot.slane %v3630_v10, 5 }
 0x135   : > { %4775 = vst [vmem:[#allocation33_spill] sm:$0xff] %v3740_v58  ;;  %v1438_v1 = vadd.f32 %v1430_v56, %v1397_v23  ;;  %v3745_v39 = vmax.f32 %v567_v29, %v524_v15  ;;  %v4778_v22 = vrot.slane %v3630_v10, 6  ;;  %v4782_v35 = vrot.slane %v3637_v50, 1  ;;  %v4800_v58 = vld [vmem:[#allocation22_spill] sm:$0xff] }
 0x136   : > { %v1929_v40 = vadd.f32 %v1921_v52, %v1912_v25  ;;  %v3748_v26 = vmax.f32 %v584_v41, 0.0  ;;  %v1724_v63 = vadd.f32 %v1716_v53, %v1683_v46  ;;  %v4784_v25 = vrot.slane %v3637_v50, 2  ;;  %v4798_v53 = vld [vmem:[#allocation19_spill] sm:$0xff] }
 0x137   : > { %v1479_v16 = vadd.f32 %v1471_v28, %v1438_v1 }
 0x138   : > { %4776 = vst [vmem:[#allocation34_spill] sm:$0xff] %v3748_v26  ;;  %v1970_v9 = vadd.f32 %v1962_v42, %v1929_v40  ;;  %v651_v56 = vrot.slane %v3748_v26, 5  ;;  %v695_v57 = vrot.slane %v3748_v26, 6  ;;  %v737_v0 = vrot.slane %v3748_v26, 7 }
 0x139   : > { %601 = vst [vmem:[#allocation2 + $0xe0] sm:$0xff] %v3748_v26  ;;  %v4652_v4 = vrot.slane %v3748_v26, 1  ;;  %v4650_v28 = vrot.slane %v3748_v26, 2  ;;  %v1765_v36 = vadd.f32 %v1757_v62, %v1724_v63  ;;  %v4780_v42 = vrot.slane %v3630_v10, 7 }
 0x13a   : > { %v3769_v37 = vsel %vm654_vm1, %v4777_v2, %v651_v56  ;;  %v3775_v52 = vsel %vm696_vm2, %v4778_v22, %v695_v57  ;;  %v772_v23 = vmul.f32 %v3183_v43, %v3748_v26  ;;  %v3795_v29 = vadd.f32 %v2003_v61, %v1970_v9  ;;  %v4785_v61 = vld [vmem:[#allocation6_spill] sm:$0xff]  ;;  %v4787_v57 = vld [vmem:[#allocation8_spill] sm:$0xff]  ;;  %v4788_v2 = vld [vmem:[#allocation9_spill] sm:$0xff] }
 0x13b   : > { %4779 = vst [vmem:[#allocation35_spill] sm:$0xff] %v3775_v52  ;;  %v3781_v60 = vsel %vm738_vm3, %v4780_v42, %v737_v0  ;;  %v671_v62 = vmul.f32 %v3166_v30, %v3769_v37  ;;  %v713_v15 = vmul.f32 %v3169_v31, %v3775_v52  ;;  %v805_v10 = vsel %vm797_vm4, %v4652_v4, %v4782_v35  ;;  %v4789_v42 = vld [vmem:[#allocation7_spill] sm:$0xff] }
 0x13c   : > { %4781 = vst [vmem:[#allocation36_spill] sm:$0xff] %v3781_v60  ;;  %v847_v30 = vsel %vm839_vm5, %v4650_v28, %v4784_v25  ;;  %v4651_v31 = vrot.slane %v3748_v26, 3  ;;  %v963_v43 = vmul.f32 %v3212_v7, %v3769_v37  ;;  %v755_v1 = vmul.f32 %v3178_v38, %v3781_v60 }
 0x13d   : > { %4783 = vst [vmem:[#allocation37_spill] sm:$0xff] %v3795_v29  ;;  %v721_v41 = vadd.f32 %v713_v15, %v671_v62  ;;  %v814_v46 = vmul.f32 %v3187_v48, %v805_v10  ;;  %v856_v40 = vmul.f32 %v4785_v61, %v847_v30  ;;  %v4786_v63 = vrot.slane %v3637_v50, 3  ;;  %v4790_v62 = vld [vmem:[#allocation10_spill] sm:$0xff]  ;;  %v4791_v50 = vld [vmem:[#allocation11_spill] sm:$0xff]  ;;  %v4792_v61 = vld [vmem:[#allocation12_spill] sm:$0xff] }
 0x13e   : > { %v971_v56 = vadd.f32 %v963_v43, %v3727_v47  ;;  %v1004_v0 = vmul.f32 %v4787_v57, %v3775_v52  ;;  %v1045_v22 = vmul.f32 %v4788_v2, %v3781_v60  ;;  %v1062_v15 = vmul.f32 %v4790_v62, %v3748_v26  ;;  %v4794_v47 = vld [vmem:[#allocation14_spill] sm:$0xff] }
 0x13f   : > { %v889_v9 = vsel %vm881_vm6, %v4651_v31, %v4786_v63  ;;  %v763_v38 = vadd.f32 %v755_v1, %v721_v41  ;;  %v1103_v35 = vmul.f32 %v4791_v50, %v805_v10  ;;  %v1144_v28 = vmul.f32 %v4792_v61, %v847_v30  ;;  %v4793_v63 = vld [vmem:[#allocation13_spill] sm:$0xff]  ;;  %v4796_v41 = vld [vmem:[#allocation16_spill] sm:$0xff] }
 0x140   : > { %v898_v48 = vmul.f32 %v4789_v42, %v889_v9  ;;  %v1012_v25 = vadd.f32 %v1004_v0, %v971_v56  ;;  %v1185_v31 = vmul.f32 %v4793_v63, %v889_v9  ;;  %v1250_v43 = vmul.f32 %v4794_v47, %v3769_v37  ;;  %v4797_v42 = vld [vmem:[#allocation17_spill] sm:$0xff] }
 0x141   : > { %v780_v4 = vadd.f32 %v772_v23, %v763_v38  ;;  %v1291_v19 = vmul.f32 %v4795_v34, %v3775_v52  ;;  %v1332_v1 = vmul.f32 %v4796_v41, %v3781_v60  ;;  %v1349_v21 = vmul.f32 %v4797_v42, %v3748_v26  ;;  %v4799_v23 = vld [vmem:[#allocation20_spill] sm:$0xff] }
 0x142   : > { %v1053_v12 = vadd.f32 %v1045_v22, %v1012_v25  ;;  %v1258_v14 = vadd.f32 %v1250_v43, %v1192_v8  ;;  %v1390_v56 = vmul.f32 %v3305_v59, %v805_v10  ;;  %v1536_v0 = vmul.f32 %v3340_v55, %v3769_v37  ;;  %v4801_v43 = vld [vmem:[#allocation23_spill] sm:$0xff] }
 0x143   : > { %v822_v44 = vadd.f32 %v814_v46, %v780_v4  ;;  %v1431_v20 = vmul.f32 %v4798_v53, %v847_v30  ;;  %v1472_v38 = vmul.f32 %v4799_v23, %v889_v9  ;;  %v1577_v29 = vmul.f32 %v4800_v58, %v3775_v52  ;;  %v4802_v4 = vld [vmem:[#allocation25_spill] sm:$0xff] }
 0x144   : > { %v1070_v63 = vadd.f32 %v1062_v15, %v1053_v12  ;;  %v1299_v61 = vadd.f32 %v1291_v19, %v1258_v14  ;;  %v1544_v41 = vadd.f32 %v1536_v0, %v1479_v16  ;;  %v1618_v22 = vmul.f32 %v3346_v3, %v3781_v60 }
 0x145   : > { %v864_v8 = vadd.f32 %v856_v40, %v822_v44  ;;  %v1635_v25 = vmul.f32 %v3335_v54, %v3748_v26  ;;  %v1676_v55 = vmul.f32 %v4801_v43, %v805_v10  ;;  %v1823_v46 = vmul.f32 %v4802_v4, %v3769_v37 }
 0x146   : > { %v1111_v53 = vadd.f32 %v1103_v35, %v1070_v63  ;;  %v1340_v23 = vadd.f32 %v1332_v1, %v1299_v61  ;;  %v1585_v59 = vadd.f32 %v1577_v29, %v1544_v41  ;;  %v1717_v58 = vmul.f32 %v3350_v5, %v847_v30  ;;  %v487_v61 = vpop.f32.mrf.mxu0  ;;  %v507_v63 = vpop.f32.mrf.mxu1  ;;  %v3862_v41 = vld [vmem:[#allocation2] sm:$0xff] }
 0x147   : > { %v906_v12 = vadd.f32 %v898_v48, %v864_v8  ;;  %v1758_v14 = vmul.f32 %v3352_v6, %v889_v9  ;;  %v1831_v16 = vadd.f32 %v1823_v46, %v1765_v36  ;;  %v1864_v44 = vmul.f32 %v3418_v11, %v3775_v52 }
 0x148   : > { %v1152_v19 = vadd.f32 %v1144_v28, %v1111_v53  ;;  %v1357_v40 = vadd.f32 %v1349_v21, %v1340_v23  ;;  %v1626_v15 = vadd.f32 %v1618_v22, %v1585_v59  ;;  %v1905_v0 = vmul.f32 %v3421_v27, %v3781_v60 }
 0x149   : > { %v1872_v43 = vadd.f32 %v1864_v44, %v1831_v16  ;;  %v1922_v35 = vmul.f32 %v4727_v13, %v3748_v26  ;;  %v1963_v29 = vmul.f32 %v3427_v18, %v805_v10  ;;  %v4803_v48 = vmax.f32 %v3745_v39, %v3758_v51 }
 0x14a   : > { %v1398_v21 = vadd.f32 %v1390_v56, %v1357_v40  ;;  %v1643_v59 = vadd.f32 %v1635_v25, %v1626_v15  ;;  %v2004_v28 = vmul.f32 %v3430_v17, %v847_v30  ;;  %v570_v53 = vmax.f32 %v487_v61, %v507_v63  ;;  %v527_v25 = vpop.f32.mrf.mxu2 }
 0x14b   : > { %v585_v36 = vadd.f32 %v3328_v33, %v4803_v48  ;;  %v1193_v1 = vadd.f32 %v1185_v31, %v1152_v19  ;;  %v1913_v23 = vadd.f32 %v1905_v0, %v1872_v43  ;;  %v3866_v22 = vmul.f32 %v3435_v45, %v889_v9 }
 0x14c   : > { %v1439_v8 = vadd.f32 %v1431_v20, %v1398_v21  ;;  %v1684_v39 = vadd.f32 %v1676_v55, %v1643_v59  ;;  %v3877_v16 = vmax.f32 %v570_v53, %v527_v25  ;;  %v4805_v44 = vrot.slane %v3736_v32, 5 }
 0x14d   : > { %v3868_v10 = vmax.f32 %v585_v36, 0.0  ;;  %v1930_v46 = vadd.f32 %v1922_v35, %v1913_v23  ;;  %v4806_v40 = vrot.slane %v3736_v32, 6  ;;  %v4808_v15 = vrot.slane %v3736_v32, 7 }
 0x14e   : > { %v1725_v9 = vadd.f32 %v1717_v58, %v1684_v39  ;;  %v1480_v35 = vadd.f32 %v1472_v38, %v1439_v8  ;;  %v4810_v63 = vrot.slane %v3743_v49, 1  ;;  %v4812_v53 = vrot.slane %v3743_v49, 2  ;;  %v4816_v39 = vld [vmem:[#allocation16_spill] sm:$0xff]  ;;  %v489_v60 = vpop.f32.mrf.mxu0  ;;  %v509_v52 = vpop.f32.mrf.mxu1 }
 0x14f   : > { %4804 = vst [vmem:[#allocation6_spill] sm:$0xff] %v3868_v10  ;;  %v4663_v56 = vrot.slane %v3868_v10, 5  ;;  %v4662_v30 = vrot.slane %v3868_v10, 6  ;;  %v4661_v31 = vrot.slane %v3868_v10, 7  ;;  %v1079_v43 = vrot.slane %v3868_v10, 1 }
 0x150   : > { %602 = vst [vmem:[#allocation2 + $0x68] sm:$0xff] %v3868_v10  ;;  %v1971_v20 = vadd.f32 %v1963_v29, %v1930_v46  ;;  %v1766_v29 = vadd.f32 %v1758_v14, %v1725_v9  ;;  %v1063_v36 = vmul.f32 %v4790_v62, %v3868_v10  ;;  %v4660_v21 = vrot.slane %v3868_v10, 2  ;;  %v4817_v9 = vld [vmem:[#allocation12_spill] sm:$0xff] }
 0x151   : > { %v3886_v19 = vsel %vm654_vm1, %v4805_v44, %v4663_v56  ;;  %v3894_v58 = vsel %vm696_vm2, %v4806_v40, %v4662_v30  ;;  %v3902_v0 = vsel %vm738_vm3, %v4808_v15, %v4661_v31  ;;  %v3914_v32 = vsel %vm797_vm4, %v1079_v43, %v4810_v63  ;;  %v4818_v43 = vld [vmem:[#allocation13_spill] sm:$0xff]  ;;  %v4819_v44 = vld [vmem:[#allocation18_spill] sm:$0xff]  ;;  %v4821_v63 = vld [vmem:[#allocation19_spill] sm:$0xff] }
 0x152   : > { %4807 = vst [vmem:[#allocation8_spill] sm:$0xff] %v3894_v58  ;;  %v964_v48 = vmul.f32 %v3212_v7, %v3886_v19  ;;  %v1005_v61 = vmul.f32 %v4787_v57, %v3894_v58  ;;  %v4659_v38 = vrot.slane %v3868_v10, 3  ;;  %v3918_v14 = vadd.f32 %v2004_v28, %v1971_v20  ;;  %v4820_v15 = vld [vmem:[#allocation21_spill] sm:$0xff] }
 0x153   : > { %4809 = vst [vmem:[#allocation9_spill] sm:$0xff] %v3902_v0  ;;  %v1046_v7 = vmul.f32 %v4788_v2, %v3902_v0  ;;  %v1251_v62 = vmul.f32 %v4794_v47, %v3886_v19  ;;  %v1104_v57 = vmul.f32 %v4791_v50, %v3914_v32  ;;  %v3932_v23 = vsel %vm839_vm5, %v4660_v21, %v4812_v53 }
 0x154   : > { %4811 = vst [vmem:[#allocation7_spill] sm:$0xff] %v3914_v32  ;;  %v972_v59 = vadd.f32 %v964_v48, %v906_v12  ;;  %v4814_v28 = vrot.slane %v3743_v49, 3  ;;  %v1292_v12 = vmul.f32 %v4795_v34, %v3894_v58  ;;  %v1333_v46 = vmul.f32 %v4816_v39, %v3902_v0 }
 0x155   : > { %4813 = vst [vmem:[#allocation10_spill] sm:$0xff] %v3932_v23  ;;  %v1259_v8 = vadd.f32 %v1251_v62, %v1193_v1  ;;  %v1350_v25 = vmul.f32 %v4797_v42, %v3868_v10  ;;  %v1145_v49 = vmul.f32 %v4817_v9, %v3932_v23  ;;  %v1391_v40 = vmul.f32 %v4819_v44, %v3914_v32  ;;  %v4822_v62 = vld [vmem:[#allocation20_spill] sm:$0xff]  ;;  %v4823_v9 = vld [vmem:[#allocation22_spill] sm:$0xff] }
 0x156   : > { %v3940_v2 = vsel %vm881_vm6, %v4659_v38, %v4814_v28  ;;  %v1013_v50 = vadd.f32 %v1005_v61, %v972_v59  ;;  %v1537_v48 = vmul.f32 %v4820_v15, %v3886_v19  ;;  %v1432_v59 = vmul.f32 %v4821_v63, %v3932_v23 }
 0x157   : > { %4815 = vst [vmem:[#allocation11_spill] sm:$0xff] %v3940_v2  ;;  %v1186_v20 = vmul.f32 %v4818_v43, %v3940_v2  ;;  %v1300_v1 = vadd.f32 %v1292_v12, %v1259_v8  ;;  %v1473_v53 = vmul.f32 %v4822_v62, %v3940_v2  ;;  %v1578_v38 = vmul.f32 %v4823_v9, %v3894_v58 }
 0x158   : > { %v1054_v61 = vadd.f32 %v1046_v7, %v1013_v50  ;;  %v1545_v28 = vadd.f32 %v1537_v48, %v1480_v35  ;;  %v1619_v43 = vmul.f32 %v3346_v3, %v3902_v0  ;;  %v1636_v21 = vmul.f32 %v3335_v54, %v3868_v10  ;;  %v4824_v7 = vld [vmem:[#allocation23_spill] sm:$0xff] }
 0x159   : > { %v1341_v30 = vadd.f32 %v1333_v46, %v1300_v1  ;;  %v1677_v12 = vmul.f32 %v4824_v7, %v3914_v32  ;;  %v1824_v50 = vmul.f32 %v4802_v4, %v3886_v19  ;;  %v1718_v35 = vmul.f32 %v3350_v5, %v3932_v23  ;;  %v1219_v1 = vld [vmem:[#allocation2 + $0xa0] sm:$0xff] }
 0x15a   : > { %v1071_v31 = vadd.f32 %v1063_v36, %v1054_v61  ;;  %v1586_v8 = vadd.f32 %v1578_v38, %v1545_v28  ;;  %v1759_v48 = vmul.f32 %v3352_v6, %v3940_v2  ;;  %v1865_v56 = vmul.f32 %v3418_v11, %v3894_v58  ;;  %v547_v61 = vpop.f32.mrf.mxu3 }
 0x15b   : > { %v1358_v51 = vadd.f32 %v1350_v25, %v1341_v30  ;;  %v1832_v36 = vadd.f32 %v1824_v50, %v1766_v29  ;;  %v1906_v46 = vmul.f32 %v3421_v27, %v3902_v0  ;;  %v1923_v38 = vmul.f32 %v4727_v13, %v3868_v10 }
 0x15c   : > { %v1112_v55 = vadd.f32 %v1104_v57, %v1071_v31  ;;  %v1627_v33 = vadd.f32 %v1619_v43, %v1586_v8  ;;  %v1964_v28 = vmul.f32 %v3427_v18, %v3914_v32  ;;  %v572_v26 = vmax.f32 %v3877_v16, %v547_v61  ;;  %v3992_v43 = vld [vmem:[%s4601_s2] ss:$0 sm:$0xff]  ;;  %v3995_v8 = vld [vmem:[#allocation2 + $0x50] sm:$0xff]  ;;  %v529_v61 = vpop.f32.mrf.mxu2 }
 0x15d   : > { %v1399_v31 = vadd.f32 %v1391_v40, %v1358_v51  ;;  %v1873_v30 = vadd.f32 %v1865_v56, %v1832_v36  ;;  %v2005_v29 = vmul.f32 %v3430_v17, %v3932_v23  ;;  %v3987_v25 = vmul.f32 %v3435_v45, %v3940_v2 }
 0x15e   : > { %v1153_v58 = vadd.f32 %v1145_v49, %v1112_v55  ;;  %v1644_v57 = vadd.f32 %v1636_v21, %v1627_v33  ;;  %v586_v16 = vadd.f32 %v3992_v43, %v572_v26  ;;  %v1375_v50 = vrot.slane %v1219_v1, 1 }
 0x15f   : > { %v1440_v51 = vadd.f32 %v1432_v59, %v1399_v31  ;;  %v1914_v56 = vadd.f32 %v1906_v46, %v1873_v30  ;;  %v1416_v55 = vrot.slane %v1219_v1, 2  ;;  %v573_v49 = vmax.f32 %v489_v60, %v509_v52 }
 0x160   : > { %v1194_v40 = vadd.f32 %v1186_v20, %v1153_v58  ;;  %v1685_v33 = vadd.f32 %v1677_v12, %v1644_v57  ;;  %v3997_v21 = vmax.f32 %v586_v16, 0.0  ;;  %v1457_v36 = vrot.slane %v1219_v1, 3 }
 0x161   : > { %v1481_v2 = vadd.f32 %v1473_v53, %v1440_v51  ;;  %v1931_v23 = vadd.f32 %v1923_v38, %v1914_v56  ;;  %v574_v20 = vmax.f32 %v573_v49, %v529_v61  ;;  %v4825_v53 = vrot.slane %v3862_v41, 5 }
 0x162   : > { %v1726_v26 = vadd.f32 %v1718_v35, %v1685_v33  ;;  %v1235_v0 = vrot.slane %v3997_v21, 5  ;;  %v1276_v59 = vrot.slane %v3997_v21, 6  ;;  %v1317_v46 = vrot.slane %v3997_v21, 7 }
 0x163   : > { %v1972_v52 = vadd.f32 %v1964_v28, %v1931_v23  ;;  %v1367_v60 = vrot.slane %v3997_v21, 1  ;;  %v4676_v58 = vrot.slane %v3997_v21, 2  ;;  %v4827_v35 = vrot.slane %v3862_v41, 6 }
 0x164   : > { %v4010_v12 = vsel %vm654_vm1, %v4825_v53, %v1235_v0  ;;  %v4828_v38 = vrot.slane %v3862_v41, 7  ;;  %v1767_v31 = vadd.f32 %v1759_v48, %v1726_v26  ;;  %v1351_v57 = vmul.f32 %v4797_v42, %v3997_v21  ;;  %v549_v26 = vpop.f32.mrf.mxu3  ;;  %v4078_v53 = vld [vmem:[#allocation2 + $0xe8] sm:$0xff] }
 0x165   : > { %4826 = vst [vmem:[#allocation14_spill] sm:$0xff] %v4010_v12  ;;  %v4016_v1 = vsel %vm696_vm2, %v4827_v35, %v1276_v59  ;;  %v4025_v30 = vadd.f32 %v2005_v29, %v1972_v52  ;;  %v1252_v0 = vmul.f32 %v4794_v47, %v4010_v12  ;;  %v4033_v16 = vsel %vm797_vm4, %v1367_v60, %v1375_v50  ;;  %v1506_v60 = vld [vmem:[#allocation2 + $0x58] sm:$0xff] }
 0x166   : > { %v4022_v23 = vsel %vm738_vm3, %v4828_v38, %v1317_v46  ;;  %v4039_v41 = vsel %vm839_vm5, %v4676_v58, %v1416_v55  ;;  %v4675_v48 = vrot.slane %v3997_v21, 3  ;;  %v1538_v29 = vmul.f32 %v4820_v15, %v4010_v12 }
 0x167   : > { %4829 = vst [vmem:[#allocation15_spill] sm:$0xff] %v4039_v41  ;;  %v1260_v51 = vadd.f32 %v1252_v0, %v1194_v40  ;;  %v1293_v47 = vmul.f32 %v4795_v34, %v4016_v1  ;;  %v1334_v42 = vmul.f32 %v4816_v39, %v4022_v23  ;;  %v1392_v50 = vmul.f32 %v4819_v44, %v4033_v16 }
 0x168   : > { %v1433_v56 = vmul.f32 %v4821_v63, %v4039_v41  ;;  %v4056_v55 = vsel %vm881_vm6, %v4675_v48, %v1457_v36  ;;  %v1546_v49 = vadd.f32 %v1538_v29, %v1481_v2  ;;  %v1579_v40 = vmul.f32 %v4823_v9, %v4016_v1 }
 0x169   : > { %4830 = vst [vmem:[#allocation17_spill] sm:$0xff] %v4056_v55  ;;  %v1301_v34 = vadd.f32 %v1293_v47, %v1260_v51  ;;  %v1474_v39 = vmul.f32 %v4822_v62, %v4056_v55  ;;  %v1620_v44 = vmul.f32 %v3346_v3, %v4022_v23  ;;  %v1637_v63 = vmul.f32 %v3335_v54, %v3997_v21  ;;  %v4084_v51 = vld [vmem:[#allocation2 + $0x130] sm:$0xff] }
 0x16a   : > { %v1587_v33 = vadd.f32 %v1579_v40, %v1546_v49  ;;  %v1678_v61 = vmul.f32 %v4824_v7, %v4033_v16  ;;  %v1719_v2 = vmul.f32 %v3350_v5, %v4039_v41  ;;  %v1825_v36 = vmul.f32 %v4802_v4, %v4010_v12 }
 0x16b   : > { %v1342_v59 = vadd.f32 %v1334_v42, %v1301_v34  ;;  %v1760_v62 = vmul.f32 %v3352_v6, %v4056_v55  ;;  %v1866_v46 = vmul.f32 %v3418_v11, %v4016_v1  ;;  %v1907_v52 = vmul.f32 %v3421_v27, %v4022_v23 }
 0x16c   : > { %v1628_v35 = vadd.f32 %v1620_v44, %v1587_v33  ;;  %v1833_v38 = vadd.f32 %v1825_v36, %v1767_v31  ;;  %v1924_v0 = vmul.f32 %v4727_v13, %v3997_v21  ;;  %v1965_v29 = vmul.f32 %v3427_v18, %v4033_v16 }
 0x16d   : > { %v1359_v47 = vadd.f32 %v1351_v57, %v1342_v59  ;;  %v2006_v42 = vmul.f32 %v3430_v17, %v4039_v41  ;;  %v4090_v49 = vmul.f32 %v3435_v45, %v4056_v55  ;;  %v575_v40 = vmax.f32 %v574_v20, %v549_v26 }
 0x16e   : > { %v1645_v34 = vadd.f32 %v1637_v63, %v1628_v35  ;;  %v1874_v44 = vadd.f32 %v1866_v46, %v1833_v38  ;;  %v1662_v31 = vrot.slane %v1506_v60, 1  ;;  %v1802_v33 = vrot.slane %v4078_v53, 5 }
 0x16f   : > { %v1400_v36 = vadd.f32 %v1392_v50, %v1359_v47  ;;  %v587_v48 = vadd.f32 %v3992_v43, %v575_v40  ;;  %v1703_v58 = vrot.slane %v1506_v60, 2  ;;  %v1810_v28 = vrot.slane %v4084_v51, 5 }
 0x170   : > { %v1686_v57 = vadd.f32 %v1678_v61, %v1645_v34  ;;  %v1915_v59 = vadd.f32 %v1907_v52, %v1874_v44  ;;  %v1744_v10 = vrot.slane %v1506_v60, 3  ;;  %v1843_v32 = vrot.slane %v4078_v53, 6 }
 0x171   : > { %v1441_v41 = vadd.f32 %v1433_v56, %v1400_v36  ;;  %v4096_v55 = vmax.f32 %v587_v48, 0.0  ;;  %v4100_v20 = vsel %vm654_vm1, %v1802_v33, %v1810_v28  ;;  %v1851_v63 = vrot.slane %v4084_v51, 6 }
 0x172   : > { %v1727_v50 = vadd.f32 %v1719_v2, %v1686_v57  ;;  %v1932_v26 = vadd.f32 %v1924_v0, %v1915_v59  ;;  %v1884_v43 = vrot.slane %v4078_v53, 7  ;;  %v1892_v46 = vrot.slane %v4084_v51, 7 }
 0x173   : > { %v1522_v61 = vrot.slane %v4096_v55, 5  ;;  %v1563_v52 = vrot.slane %v4096_v55, 6  ;;  %v1604_v56 = vrot.slane %v4096_v55, 7  ;;  %v4110_v48 = vmul.f32 %v4802_v4, %v4100_v20 }
 0x174   : > { %v1482_v28 = vadd.f32 %v1474_v39, %v1441_v41  ;;  %v1768_v60 = vadd.f32 %v1760_v62, %v1727_v50  ;;  %v1973_v35 = vadd.f32 %v1965_v29, %v1932_v26  ;;  %v1654_v2 = vrot.slane %v4096_v55, 1  ;;  %v1794_v50 = vld [vmem:[#allocation2 + $0x40] sm:$0xff] }
 0x175   : > { %v4831_v38 = vrot.slane %v3995_v8, 5  ;;  %v4833_v0 = vrot.slane %v3995_v8, 6  ;;  %v4834_v40 = vrot.slane %v3995_v8, 7  ;;  %v1695_v39 = vrot.slane %v4096_v55, 2 }
 0x176   : > { %v2014_v62 = vadd.f32 %v2006_v42, %v1973_v35  ;;  %v1638_v34 = vmul.f32 %v3335_v54, %v4096_v55  ;;  %v4138_v44 = vsel %vm696_vm2, %v1843_v32, %v1851_v63  ;;  %v4142_v8 = vsel %vm797_vm4, %v1654_v2, %v1662_v31 }
 0x177   : > { %v4117_v53 = vsel %vm654_vm1, %v4831_v38, %v1522_v61  ;;  %v4123_v47 = vsel %vm696_vm2, %v4833_v0, %v1563_v52  ;;  %v4129_v41 = vsel %vm738_vm3, %v4834_v40, %v1604_v56  ;;  %v4146_v33 = vsel %vm839_vm5, %v1695_v39, %v1703_v58  ;;  %v4837_v39 = vld [vmem:[#allocation27_spill] sm:$0xff] }
 0x178   : > { %4832 = vst [vmem:[#allocation25_spill] sm:$0xff] %v4117_v53  ;;  %v1539_v29 = vmul.f32 %v4820_v15, %v4117_v53  ;;  %v1736_v42 = vrot.slane %v4096_v55, 3  ;;  %v1826_v15 = vmul.f32 %v4802_v4, %v4117_v53  ;;  %v1580_v54 = vmul.f32 %v4823_v9, %v4123_v47 }
 0x179   : > { %4835 = vst [vmem:[#allocation16_spill] sm:$0xff] %v4146_v33  ;;  %v1621_v32 = vmul.f32 %v3346_v3, %v4129_v41  ;;  %v1679_v31 = vmul.f32 %v4824_v7, %v4142_v8  ;;  %v1720_v57 = vmul.f32 %v3350_v5, %v4146_v33  ;;  %v1867_v4 = vmul.f32 %v3418_v11, %v4123_v47 }
 0x17a   : > { %v1547_v36 = vadd.f32 %v1539_v29, %v1482_v28  ;;  %v4161_v58 = vsel %vm881_vm6, %v1736_v42, %v1744_v10  ;;  %v1834_v59 = vadd.f32 %v1826_v15, %v1768_v60  ;;  %v1868_v3 = vmul.f32 %v3418_v11, %v4138_v44  ;;  %v4838_v29 = vld [vmem:[#allocation24_spill] sm:$0xff] }
 0x17b   : > { %4836 = vst [vmem:[#allocation12_spill] sm:$0xff] %v4161_v58  ;;  %v1761_v9 = vmul.f32 %v3352_v6, %v4161_v58  ;;  %v1908_v7 = vmul.f32 %v3421_v27, %v4129_v41  ;;  %v1925_v10 = vmul.f32 %v4727_v13, %v4096_v55  ;;  %v1966_v26 = vmul.f32 %v3427_v18, %v4142_v8 }
 0x17c   : > { %v1588_v63 = vadd.f32 %v1580_v54, %v1547_v36  ;;  %v1875_v5 = vadd.f32 %v1867_v4, %v1834_v59  ;;  %v2007_v61 = vmul.f32 %v3430_v17, %v4146_v33  ;;  %v2048_v6 = vmul.f32 %v3435_v45, %v4161_v58  ;;  %v4198_v54 = vld [vmem:[#allocation2 + $0x28] sm:$0xff]  ;;  %v4840_v4 = vld [vmem:[#allocation32_spill] sm:$0xff] }
 0x17d   : > { %v4181_v11 = vsel %vm738_vm3, %v1884_v43, %v1892_v46  ;;  %v1942_v56 = vrot.slane %v4084_v51, 1  ;;  %v1950_v60 = vrot.slane %v1794_v50, 1  ;;  %v1983_v35 = vrot.slane %v4084_v51, 2 }
 0x17e   : > { %v1629_v52 = vadd.f32 %v1621_v32, %v1588_v63  ;;  %v1916_v28 = vadd.f32 %v1908_v7, %v1875_v5  ;;  %v1991_v2 = vrot.slane %v1794_v50, 2  ;;  %v2024_v0 = vrot.slane %v4084_v51, 3  ;;  %v4208_v7 = vld [vmem:[#allocation2 + $0xc0] sm:$0xff] }
 0x17f   : > { %v2032_v40 = vrot.slane %v1794_v50, 3  ;;  %v2050_v42 = vadd.f32 %v4838_v29, %v4837_v39  ;;  %v1909_v36 = vmul.f32 %v3421_v27, %v4181_v11  ;;  %v4192_v43 = vsel %vm797_vm4, %v1942_v56, %v1950_v60  ;;  %v4841_v27 = vld [vmem:[#allocation29_spill] sm:$0xff] }
 0x180   : > { %v1646_v38 = vadd.f32 %v1638_v34, %v1629_v52  ;;  %v1933_v15 = vadd.f32 %v1925_v10, %v1916_v28  ;;  %v4196_v46 = vsel %vm839_vm5, %v1983_v35, %v1991_v2  ;;  %v1926_v32 = vmul.f32 %v4727_v13, %v4084_v51  ;;  %v4221_v52 = vld [vmem:[%s4602_s3 + $0x28] sm:$0x7f] }
 0x181   : > { %v4204_v59 = vsel %vm881_vm6, %v2024_v0, %v2032_v40  ;;  %v2051_v63 = vadd.f32 %v4841_v27, %v4840_v4  ;;  %v1967_v5 = vmul.f32 %v3427_v18, %v4192_v43  ;;  %v2008_v10 = vmul.f32 %v3430_v17, %v4196_v46  ;;  %v4842_v56 = vld [vmem:[#allocation37_spill] sm:$0xff]  ;;  %v2951_v0 = vld [vmem:[#allocation2 + $0x20] sm:$0xff] }
 0x182   : > { %v1687_v34 = vadd.f32 %v1679_v31, %v1646_v38  ;;  %4839 = vst [vmem:[#allocation13_spill] sm:$0xff] %v4204_v59  ;;  %v1974_v50 = vadd.f32 %v1966_v26, %v1933_v15  ;;  %v4216_v31 = vmul.f32 %v3435_v45, %v4204_v59  ;;  %v4843_v28 = vld [vmem:[#allocation33_spill] sm:$0xff]  ;;  %v2053_v26 = vadd.f32 %v3866_v22, %v3918_v14 }
 0x183   : > { %v2052_v60 = vadd.f32 %v4843_v28, %v4842_v56  ;;  %v2090_v18 = vrot.slane %v4198_v54, 5  ;;  %v2054_v17 = vadd.f32 %v3987_v25, %v4025_v30  ;;  %v2098_v45 = vrot.slane %v4208_v7, 5  ;;  %v2952_v39 = vld [vmem:[#allocation2 + $0x8] sm:$0xff]  ;;  %v4844_v30 = vld [vmem:[#allocation28_spill] sm:$0xff] }
 0x184   : > { %v1728_v13 = vadd.f32 %v1720_v57, %v1687_v34  ;;  %v2015_v35 = vadd.f32 %v2007_v61, %v1974_v50  ;;  %v2107_v57 = vperm.slane %v4221_v52, 0  ;;  %v2055_v38 = vadd.f32 %v4090_v49, %v2014_v62  ;;  %v4845_v34 = vld [vmem:[#allocation31_spill] sm:$0xff] }
 0x185   : > { %v2124_v40 = vrot.slane %v2951_v0, 6  ;;  %v2125_v29 = vrot.slane %v2952_v39, 6  ;;  %v4235_v22 = vsel %vm654_vm1, %v2090_v18, %v2098_v45  ;;  %v2131_v14 = vrot.slane %v4198_v54, 6 }
 0x186   : > { %v1769_v2 = vadd.f32 %v1761_v9, %v1728_v13  ;;  %v2056_v15 = vadd.f32 %v2048_v6, %v2015_v35  ;;  %v2108_v61 = vmul.f32 %v2107_v57, %v4844_v30  ;;  %v2109_v4 = vmul.f32 %v2107_v57, %v4845_v34  ;;  %v4846_v30 = vld [vmem:[#allocation26_spill] sm:$0xff] }
 0x187   : > { %v2110_v9 = vmul.f32 %v2107_v57, %v3769_v37  ;;  %v2111_v49 = vmul.f32 %v2107_v57, %v3886_v19  ;;  %v2112_v62 = vmul.f32 %v2107_v57, %v4010_v12  ;;  %v2113_v6 = vmul.f32 %v2107_v57, %v4117_v53  ;;  %v4848_v53 = vld [vmem:[#allocation30_spill] sm:$0xff] }
 0x188   : > { %v1835_v25 = vadd.f32 %v4110_v48, %v1769_v2  ;;  %v2114_v27 = vmul.f32 %v2107_v57, %v4100_v20  ;;  %v2115_v13 = vmul.f32 %v2107_v57, %v4235_v22  ;;  %v2116_v56 = vadd.f32 %v2108_v61, %v2050_v42 }
 0x189   : > { %v2117_v28 = vadd.f32 %v2109_v4, %v2051_v63  ;;  %v2118_v48 = vadd.f32 %v2110_v9, %v2052_v60  ;;  %v2119_v18 = vadd.f32 %v2111_v49, %v2053_v26  ;;  %v2120_v35 = vadd.f32 %v2112_v62, %v2054_v17  ;;  %v4850_v4 = vld [vmem:[#allocation35_spill] sm:$0xff]  ;;  %v4269_v62 = vld [vmem:[#allocation2 + $0x110] sm:$0xff] }
 0x18a   : > { %v1876_v50 = vadd.f32 %v1868_v3, %v1835_v25  ;;  %v2139_v45 = vrot.slane %v4208_v7, 6  ;;  %v2121_v37 = vadd.f32 %v2113_v6, %v2055_v38  ;;  %v4847_v19 = vrot.slane %v4846_v30, 6 }
 0x18b   : > { %v4849_v12 = vrot.slane %v4848_v53, 6  ;;  %v2122_v57 = vadd.f32 %v2114_v27, %v2056_v15  ;;  %v2148_v63 = vperm.slane %v4221_v52, 1  ;;  %v2166_v26 = vrot.slane %v2952_v39, 7 }
 0x18c   : > { %v1917_v2 = vadd.f32 %v1909_v36, %v1876_v50  ;;  %v2140_v34 = vsel %vm696_vm2, %v2124_v40, %v4847_v19  ;;  %v4258_v42 = vsel %vm696_vm2, %v2131_v14, %v2139_v45  ;;  %v2165_v36 = vrot.slane %v2951_v0, 7  ;;  %v4273_v50 = vld [vmem:[#allocation2 + $0x148] sm:$0xff] }
 0x18d   : > { %v2141_v3 = vsel %vm696_vm2, %v2125_v29, %v4849_v12  ;;  %v2149_v17 = vmul.f32 %v2148_v63, %v2140_v34  ;;  %v2172_v25 = vrot.slane %v4198_v54, 7  ;;  %v2180_v40 = vrot.slane %v4208_v7, 7  ;;  %v4851_v12 = vld [vmem:[#allocation8_spill] sm:$0xff] }
 0x18e   : > { %v1934_v60 = vadd.f32 %v1926_v32, %v1917_v2  ;;  %v2150_v38 = vmul.f32 %v2148_v63, %v2141_v3  ;;  %v2151_v9 = vmul.f32 %v2148_v63, %v4850_v4  ;;  %v2152_v29 = vmul.f32 %v2148_v63, %v4851_v12 }
 0x18f   : > { %v2155_v15 = vmul.f32 %v2148_v63, %v4138_v44  ;;  %v2153_v14 = vmul.f32 %v2148_v63, %v4016_v1  ;;  %v2154_v49 = vmul.f32 %v2148_v63, %v4123_v47  ;;  %v2156_v32 = vmul.f32 %v2148_v63, %v4258_v42 }
 0x190   : > { %v1975_v61 = vadd.f32 %v1967_v5, %v1934_v60  ;;  %v2157_v0 = vadd.f32 %v2149_v17, %v2116_v56  ;;  %v2158_v54 = vadd.f32 %v2150_v38, %v2117_v28  ;;  %v2159_v6 = vadd.f32 %v2151_v9, %v2118_v48  ;;  %v4271_v5 = vld [vmem:[#allocation2 + $0xa8] sm:$0xff] }
 0x191   : > { %v2160_v27 = vadd.f32 %v2152_v29, %v2119_v18  ;;  %v2161_v45 = vadd.f32 %v2153_v14, %v2120_v35  ;;  %v2162_v2 = vadd.f32 %v2154_v49, %v2121_v37  ;;  %v2163_v19 = vadd.f32 %v2155_v15, %v2122_v57 }
 0x192   : > { %v2016_v39 = vadd.f32 %v2008_v10, %v1975_v61  ;;  %v4852_v34 = vrot.slane %v4846_v30, 7  ;;  %v4853_v10 = vrot.slane %v4848_v53, 7  ;;  %v2189_v48 = vperm.slane %v4221_v52, 2  ;;  %v4855_v61 = vld [vmem:[#allocation9_spill] sm:$0xff] }
 0x193   : > { %v4287_v18 = vsel %vm738_vm3, %v2172_v25, %v2180_v40  ;;  %v2206_v35 = vperm.slane %v4221_v52, 3  ;;  %v2230_v37 = vrot.slane %v4208_v7, 1  ;;  %v2231_v57 = vrot.slane %v4269_v62, 1 }
 0x194   : > { %v2181_v3 = vsel %vm738_vm3, %v2165_v36, %v4852_v34  ;;  %v2057_v56 = vadd.f32 %v4216_v31, %v2016_v39  ;;  %v2182_v28 = vsel %vm738_vm3, %v2166_v26, %v4853_v10  ;;  %v4681_v31 = vrot.slane %v4271_v5, 1  ;;  %v4854_v26 = vld [vmem:[#allocation36_spill] sm:$0xff]  ;;  %v4300_v10 = vld [vmem:[#allocation2 + $0x88] sm:$0xff]  ;;  %v4857_v36 = vld [vmem:[#allocation6_spill] sm:$0xff] }
 0x195   : > { %v2190_v60 = vmul.f32 %v2189_v48, %v2181_v3  ;;  %v2191_v17 = vmul.f32 %v2189_v48, %v2182_v28  ;;  %v2192_v38 = vmul.f32 %v2189_v48, %v4854_v26  ;;  %v2193_v4 = vmul.f32 %v2189_v48, %v4855_v61  ;;  %v4302_v28 = vld [vmem:[#allocation2 + $0x128] sm:$0xff]  ;;  %v4856_v26 = vld [vmem:[#allocation34_spill] sm:$0xff] }
 0x196   : > { %v2123_v63 = vadd.f32 %v2115_v13, %v2057_v56  ;;  %v2196_v25 = vmul.f32 %v2189_v48, %v4181_v11  ;;  %v2194_v9 = vmul.f32 %v2189_v48, %v4022_v23  ;;  %v2195_v12 = vmul.f32 %v2189_v48, %v4129_v41 }
 0x197   : > { %v2197_v29 = vmul.f32 %v2189_v48, %v4287_v18  ;;  %v2198_v13 = vadd.f32 %v2190_v60, %v2157_v0  ;;  %v2199_v15 = vadd.f32 %v2191_v17, %v2158_v54  ;;  %v2200_v14 = vadd.f32 %v2192_v38, %v2159_v6 }
 0x198   : > { %v2164_v40 = vadd.f32 %v2156_v32, %v2123_v63  ;;  %v2201_v49 = vadd.f32 %v2193_v4, %v2160_v27  ;;  %v2202_v39 = vadd.f32 %v2194_v9, %v2161_v45  ;;  %v2203_v34 = vadd.f32 %v2195_v12, %v2162_v2 }
 0x199   : > { %v2204_v3 = vadd.f32 %v2196_v25, %v2163_v19  ;;  %v2207_v32 = vmul.f32 %v4302_v28, %v2206_v35  ;;  %v2208_v63 = vmul.f32 %v2206_v35, %v4848_v53  ;;  %v2209_v61 = vmul.f32 %v2206_v35, %v4856_v26 }
 0x19a   : > { %v2205_v56 = vadd.f32 %v2197_v29, %v2164_v40  ;;  %v2210_v48 = vmul.f32 %v2206_v35, %v4857_v36  ;;  %v2211_v0 = vmul.f32 %v2206_v35, %v3997_v21  ;;  %v2212_v54 = vmul.f32 %v2206_v35, %v4096_v55 }
 0x19b   : > { %v2213_v6 = vmul.f32 %v2206_v35, %v4084_v51  ;;  %v2214_v27 = vmul.f32 %v2206_v35, %v4208_v7  ;;  %v2215_v45 = vadd.f32 %v2207_v32, %v2198_v13  ;;  %v2216_v2 = vadd.f32 %v2208_v63, %v2199_v15 }
 0x19c   : > { %v2217_v19 = vadd.f32 %v2209_v61, %v2200_v14  ;;  %v2218_v60 = vadd.f32 %v2210_v48, %v2201_v49  ;;  %v2219_v17 = vadd.f32 %v2211_v0, %v2202_v39  ;;  %v2220_v38 = vadd.f32 %v2212_v54, %v2203_v34  ;;  %v4335_v34 = vld [vmem:[#allocation2 + $0x98] sm:$0xff] }
 0x19d   : > { %v2238_v4 = vrot.slane %v4300_v10, 1  ;;  %v4858_v25 = vrot.slane %v4846_v30, 1  ;;  %v4859_v9 = vrot.slane %v4848_v53, 1  ;;  %v4860_v12 = vrot.slane %v4273_v50, 1  ;;  %v4862_v61 = vld [vmem:[#allocation7_spill] sm:$0xff] }
 0x19e   : > { %v4861_v29 = vrot.slane %v4856_v26, 1  ;;  %v2247_v15 = vperm.slane %v4221_v52, 4  ;;  %v2221_v30 = vadd.f32 %v2213_v6, %v2204_v3  ;;  %v2222_v14 = vadd.f32 %v2214_v27, %v2205_v56 }
 0x19f   : > { %v2239_v40 = vsel %vm797_vm4, %v4858_v25, %v2231_v57  ;;  %v2240_v35 = vsel %vm797_vm4, %v4859_v9, %v4681_v31  ;;  %v4332_v57 = vsel %vm797_vm4, %v2230_v37, %v2238_v4  ;;  %v2264_v53 = vrot.slane %v4302_v28, 2 }
 0x1a0   : > { %v2241_v13 = vsel %vm797_vm4, %v4861_v29, %v4860_v12  ;;  %v2248_v49 = vmul.f32 %v2247_v15, %v2239_v40  ;;  %v2249_v39 = vmul.f32 %v2247_v15, %v2240_v35  ;;  %v2265_v32 = vrot.slane %v4335_v34, 2 }
 0x1a1   : > { %v2250_v63 = vmul.f32 %v2247_v15, %v2241_v13  ;;  %v2251_v48 = vmul.f32 %v2247_v15, %v4862_v61  ;;  %v2252_v0 = vmul.f32 %v2247_v15, %v4033_v16  ;;  %v2253_v3 = vmul.f32 %v2247_v15, %v4142_v8 }
 0x1a2   : > { %v2254_v56 = vmul.f32 %v2247_v15, %v4192_v43  ;;  %v2255_v37 = vmul.f32 %v2247_v15, %v4332_v57  ;;  %v2256_v54 = vadd.f32 %v2248_v49, %v2215_v45  ;;  %v2257_v6 = vadd.f32 %v2249_v39, %v2216_v2  ;;  %v4865_v39 = vld [vmem:[#allocation10_spill] sm:$0xff] }
 0x1a3   : > { %v2258_v27 = vadd.f32 %v2250_v63, %v2217_v19  ;;  %v2259_v4 = vadd.f32 %v2251_v48, %v2218_v60  ;;  %v2260_v25 = vadd.f32 %v2252_v0, %v2219_v17  ;;  %v2261_v40 = vadd.f32 %v2253_v3, %v2220_v38  ;;  %v4866_v63 = vld [vmem:[#allocation15_spill] sm:$0xff] }
 0x1a4   : > { %v2271_v9 = vrot.slane %v4208_v7, 2  ;;  %v2272_v35 = vrot.slane %v4269_v62, 2  ;;  %v2273_v12 = vrot.slane %v4271_v5, 2  ;;  %v2274_v29 = vrot.slane %v4273_v50, 2 }
 0x1a5   : > { %v2279_v13 = vrot.slane %v4300_v10, 2  ;;  %v2288_v61 = vperm.slane %v4221_v52, 5  ;;  %v2262_v31 = vadd.f32 %v2254_v56, %v2221_v30  ;;  %v2263_v15 = vadd.f32 %v2255_v37, %v2222_v14 }
 0x1a6   : > { %v2280_v45 = vsel %vm839_vm5, %v2264_v53, %v2272_v35  ;;  %v4353_v2 = vsel %vm839_vm5, %v2265_v32, %v2273_v12  ;;  %v4863_v19 = vrot.slane %v4856_v26, 2  ;;  %v2305_v38 = vrot.slane %v4302_v28, 3 }
 0x1a7   : > { %v4363_v17 = vsel %vm839_vm5, %v2271_v9, %v2279_v13  ;;  %v2289_v30 = vmul.f32 %v2288_v61, %v2280_v45  ;;  %v2290_v14 = vmul.f32 %v2288_v61, %v4353_v2  ;;  %v2306_v49 = vrot.slane %v4335_v34, 3 }
 0x1a8   : > { %v4359_v60 = vsel %vm839_vm5, %v4863_v19, %v2274_v29  ;;  %4864 = vst [vmem:[#allocation18_spill] sm:$0xff] %v4363_v17  ;;  %v2292_v32 = vmul.f32 %v2288_v61, %v4865_v39  ;;  %v2293_v48 = vmul.f32 %v2288_v61, %v4866_v63  ;;  %v2294_v0 = vmul.f32 %v2288_v61, %v4146_v33  ;;  %v4377_v39 = vld [vmem:[#allocation2 + $0x8] sm:$0xff] }
 0x1a9   : > { %v2291_v53 = vmul.f32 %v2288_v61, %v4359_v60  ;;  %v2295_v3 = vmul.f32 %v2288_v61, %v4196_v46  ;;  %v2296_v56 = vmul.f32 %v2288_v61, %v4363_v17  ;;  %v2297_v37 = vadd.f32 %v2289_v30, %v2256_v54  ;;  %v4382_v54 = vld [vmem:[#allocation2 + $0x90] sm:$0xff]  ;;  %v4403_v30 = vld [vmem:[#allocation2 + $0x118] sm:$0xff] }
 0x1aa   : > { %v2298_v9 = vadd.f32 %v2290_v14, %v2257_v6  ;;  %v2300_v35 = vadd.f32 %v2292_v32, %v2259_v4  ;;  %v2301_v12 = vadd.f32 %v2293_v48, %v2260_v25  ;;  %v2302_v29 = vadd.f32 %v2294_v0, %v2261_v40  ;;  %v4410_v0 = vld [vmem:[#allocation2 + $0x60] sm:$0xff] }
 0x1ab   : > { %v2299_v28 = vadd.f32 %v2291_v53, %v2258_v27  ;;  %v2312_v13 = vrot.slane %v4208_v7, 3  ;;  %v2313_v45 = vrot.slane %v4269_v62, 3  ;;  %v2314_v19 = vrot.slane %v4271_v5, 3 }
 0x1ac   : > { %v2315_v63 = vrot.slane %v4273_v50, 3  ;;  %v2320_v33 = vrot.slane %v4300_v10, 3  ;;  %v2329_v61 = vperm.slane %v4221_v52, 6  ;;  %v2303_v6 = vadd.f32 %v2295_v3, %v2262_v31 }
 0x1ad   : > { %v2304_v27 = vadd.f32 %v2296_v56, %v2263_v15  ;;  %v2321_v4 = vsel %vm881_vm6, %v2305_v38, %v2313_v45  ;;  %v4388_v62 = vsel %vm881_vm6, %v2306_v49, %v2314_v19  ;;  %v4868_v25 = vrot.slane %v4856_v26, 3  ;;  %v4871_v26 = vld [vmem:[#allocation11_spill] sm:$0xff]  ;;  %v4872_v49 = vld [vmem:[#allocation17_spill] sm:$0xff] }
 0x1ae   : > { %4867 = vst [vmem:[#allocation21_spill] sm:$0xff] %v4388_v62  ;;  %v4398_v52 = vsel %vm881_vm6, %v2312_v13, %v2320_v33  ;;  %v2371_v31 = vrot.slane %v4377_v39, 5  ;;  %v2330_v10 = vmul.f32 %v2329_v61, %v2321_v4  ;;  %v2331_v15 = vmul.f32 %v2329_v61, %v4388_v62  ;;  %v4413_v19 = vld [vmem:[#allocation2 + $0xb8] sm:$0xff] }
 0x1af   : > { %v4394_v40 = vsel %vm881_vm6, %v4868_v25, %v2315_v63  ;;  %4870 = vst [vmem:[#allocation20_spill] sm:$0xff] %v4398_v52  ;;  %v2372_v14 = vrot.slane %v4382_v54, 5  ;;  %v2333_v53 = vmul.f32 %v2329_v61, %v4871_v26  ;;  %v2334_v32 = vmul.f32 %v2329_v61, %v4872_v49  ;;  %v4419_v49 = vld [vmem:[%s4602_s3 + $0x30] sm:$0x7f] }
 0x1b0   : > { %4869 = vst [vmem:[#allocation19_spill] sm:$0xff] %v4394_v40  ;;  %v2332_v38 = vmul.f32 %v2329_v61, %v4394_v40  ;;  %v2335_v48 = vmul.f32 %v2329_v61, %v4161_v58  ;;  %v2336_v33 = vmul.f32 %v2329_v61, %v4204_v59  ;;  %v2337_v3 = vmul.f32 %v2329_v61, %v4398_v52  ;;  %v4423_v61 = vld [vmem:[#allocation2 + $0xe0] sm:$0xff]  ;;  %v4875_v52 = vld [vmem:[#allocation25_spill] sm:$0xff] }
 0x1b1   : > { %v2338_v56 = vadd.f32 %v2330_v10, %v2297_v37  ;;  %v2339_v13 = vadd.f32 %v2331_v15, %v2298_v9  ;;  %v2341_v63 = vadd.f32 %v2333_v53, %v2300_v35  ;;  %v2342_v4 = vadd.f32 %v2334_v32, %v2301_v12 }
 0x1b2   : > { %v2340_v45 = vadd.f32 %v2332_v38, %v2299_v28  ;;  %v2343_v25 = vadd.f32 %v2335_v48, %v2302_v29  ;;  %v2373_v26 = vrot.slane %v4403_v30, 5  ;;  %v2378_v59 = vrot.slane %v4410_v0, 5 }
 0x1b3   : > { %v2379_v58 = vrot.slane %v4335_v34, 5  ;;  %v2380_v37 = vrot.slane %v4423_v61, 5  ;;  %v2344_v9 = vadd.f32 %v2336_v33, %v2303_v6  ;;  %v2386_v28 = vrot.slane %v4413_v19, 5 }
 0x1b4   : > { %v2395_v35 = vperm.slane %v4419_v49, 0  ;;  %v2345_v12 = vadd.f32 %v2337_v3, %v2304_v27  ;;  %v4873_v15 = vrot.slane %v4857_v36, 5  ;;  %v2412_v48 = vrot.slane %v4377_v39, 6  ;;  %v4874_v27 = vld [vmem:[#allocation14_spill] sm:$0xff] }
 0x1b5   : > { %v2387_v29 = vsel %vm654_vm1, %v2371_v31, %v2379_v58  ;;  %v2388_v10 = vsel %vm654_vm1, %v2372_v14, %v2380_v37  ;;  %v2394_v53 = vsel %vm654_vm1, %v2378_v59, %v2386_v28 }
 0x1b6   : > { %v2389_v38 = vsel %vm654_vm1, %v2373_v26, %v4873_v15  ;;  %v2396_v6 = vmul.f32 %v2395_v35, %v2387_v29  ;;  %v2397_v32 = vmul.f32 %v2395_v35, %v2388_v10  ;;  %v2399_v3 = vmul.f32 %v2395_v35, %v4874_v27 }
 0x1b7   : > { %v2398_v33 = vmul.f32 %v2395_v35, %v2389_v38  ;;  %v2400_v58 = vmul.f32 %v2395_v35, %v4875_v52  ;;  %v2401_v31 = vmul.f32 %v2395_v35, %v4100_v20  ;;  %v2402_v14 = vmul.f32 %v2395_v35, %v4235_v22 }
 0x1b8   : > { %v2403_v37 = vmul.f32 %v2395_v35, %v2394_v53  ;;  %v2404_v40 = vadd.f32 %v2396_v6, %v2338_v56  ;;  %v2413_v26 = vrot.slane %v4382_v54, 6  ;;  %v2405_v15 = vadd.f32 %v2397_v32, %v2339_v13 }
 0x1b9   : > { %v2406_v62 = vadd.f32 %v2398_v33, %v2340_v45  ;;  %v2407_v59 = vadd.f32 %v2399_v3, %v2341_v63  ;;  %v2408_v28 = vadd.f32 %v2400_v58, %v2342_v4  ;;  %v2409_v29 = vadd.f32 %v2401_v31, %v2343_v25 }
 0x1ba   : > { %v2414_v10 = vrot.slane %v4403_v30, 6  ;;  %v2419_v38 = vrot.slane %v4410_v0, 6  ;;  %v2420_v27 = vrot.slane %v4335_v34, 6  ;;  %v2421_v52 = vrot.slane %v4423_v61, 6 }
 0x1bb   : > { %v2410_v20 = vadd.f32 %v2402_v14, %v2344_v9  ;;  %v2411_v17 = vadd.f32 %v2403_v37, %v2345_v12  ;;  %v2427_v22 = vrot.slane %v4413_v19, 6  ;;  %v2436_v56 = vperm.slane %v4419_v49, 1 }
 0x1bc   : > { %v2428_v13 = vsel %vm696_vm2, %v2412_v48, %v2420_v27  ;;  %v2429_v45 = vsel %vm696_vm2, %v2413_v26, %v2421_v52  ;;  %v4876_v63 = vrot.slane %v4857_v36, 6  ;;  %v2453_v12 = vrot.slane %v4377_v39, 7 }
 0x1bd   : > { %v2435_v25 = vsel %vm696_vm2, %v2419_v38, %v2427_v22  ;;  %v2437_v9 = vmul.f32 %v2436_v56, %v2428_v13  ;;  %v2438_v35 = vmul.f32 %v2436_v56, %v2429_v45  ;;  %v2440_v6 = vmul.f32 %v2436_v56, %v4016_v1 }
 0x1be   : > { %v2430_v4 = vsel %vm696_vm2, %v2414_v10, %v4876_v63  ;;  %v2441_v32 = vmul.f32 %v2436_v56, %v4123_v47  ;;  %v2442_v48 = vmul.f32 %v2436_v56, %v4138_v44  ;;  %v2443_v33 = vmul.f32 %v2436_v56, %v4258_v42 }
 0x1bf   : > { %v2439_v53 = vmul.f32 %v2436_v56, %v2430_v4  ;;  %v2444_v3 = vmul.f32 %v2436_v56, %v2435_v25  ;;  %v2445_v58 = vadd.f32 %v2437_v9, %v2404_v40  ;;  %v2454_v31 = vrot.slane %v4382_v54, 7 }
 0x1c0   : > { %v2446_v14 = vadd.f32 %v2438_v35, %v2405_v15  ;;  %v2448_v26 = vadd.f32 %v2440_v6, %v2407_v59  ;;  %v2449_v10 = vadd.f32 %v2441_v32, %v2408_v28  ;;  %v2450_v38 = vadd.f32 %v2442_v48, %v2409_v29 }
 0x1c1   : > { %v2447_v37 = vadd.f32 %v2439_v53, %v2406_v62  ;;  %v2455_v39 = vrot.slane %v4403_v30, 7  ;;  %v2460_v27 = vrot.slane %v4410_v0, 7  ;;  %v2461_v1 = vrot.slane %v4335_v34, 7 }
 0x1c2   : > { %v2462_v47 = vrot.slane %v4423_v61, 7  ;;  %v2451_v44 = vadd.f32 %v2443_v33, %v2410_v20  ;;  %v2452_v52 = vadd.f32 %v2444_v3, %v2411_v17  ;;  %v2468_v42 = vrot.slane %v4413_v19, 7  ;;  %v4493_v3 = vld [vmem:[#allocation2 + $0x30] sm:$0xff] }
 0x1c3   : > { %v2477_v40 = vperm.slane %v4419_v49, 2  ;;  %v2469_v54 = vsel %vm738_vm3, %v2453_v12, %v2461_v1  ;;  %v4877_v30 = vrot.slane %v4857_v36, 7  ;;  %v2494_v28 = vperm.slane %v4419_v49, 3 }
 0x1c4   : > { %v2470_v62 = vsel %vm738_vm3, %v2454_v31, %v2462_v47  ;;  %v2476_v15 = vsel %vm738_vm3, %v2460_v27, %v2468_v42  ;;  %v2511_v63 = vrot.slane %v4335_v34, 1  ;;  %v2512_v27 = vrot.slane %v4423_v61, 1 }
 0x1c5   : > { %v2471_v0 = vsel %vm738_vm3, %v2455_v39, %v4877_v30  ;;  %v2478_v59 = vmul.f32 %v2477_v40, %v2469_v54  ;;  %v2479_v17 = vmul.f32 %v2477_v40, %v2470_v62  ;;  %v2481_v20 = vmul.f32 %v2477_v40, %v4022_v23 }
 0x1c6   : > { %v2480_v29 = vmul.f32 %v2477_v40, %v2471_v0  ;;  %v2483_v22 = vmul.f32 %v2477_v40, %v4181_v11  ;;  %v2484_v56 = vmul.f32 %v2477_v40, %v4287_v18  ;;  %v2482_v13 = vmul.f32 %v2477_v40, %v4129_v41  ;;  %v2956_v11 = vld [vmem:[#allocation2 + $0x68] sm:$0xff]  ;;  %v4491_v41 = vld [vmem:[#allocation2 + $0x78] sm:$0xff] }
 0x1c7   : > { %v2485_v45 = vmul.f32 %v2477_v40, %v2476_v15  ;;  %v2486_v4 = vadd.f32 %v2478_v59, %v2445_v58  ;;  %v2487_v25 = vadd.f32 %v2479_v17, %v2446_v14  ;;  %v2489_v35 = vadd.f32 %v2481_v20, %v2448_v26 }
 0x1c8   : > { %v2488_v9 = vadd.f32 %v2480_v29, %v2447_v37  ;;  %v2490_v12 = vadd.f32 %v2482_v13, %v2449_v10  ;;  %v2491_v53 = vadd.f32 %v2483_v22, %v2450_v38  ;;  %v2492_v6 = vadd.f32 %v2484_v56, %v2451_v44 }
 0x1c9   : > { %v2493_v32 = vadd.f32 %v2485_v45, %v2452_v52  ;;  %v2495_v48 = vmul.f32 %v4335_v34, %v2494_v28  ;;  %v2496_v23 = vmul.f32 %v4423_v61, %v2494_v28  ;;  %v2497_v33 = vmul.f32 %v2956_v11, %v2494_v28 }
 0x1ca   : > { %v2498_v18 = vmul.f32 %v2494_v28, %v3997_v21  ;;  %v2499_v58 = vmul.f32 %v2494_v28, %v4096_v55  ;;  %v2500_v31 = vmul.f32 %v2494_v28, %v4084_v51  ;;  %v2501_v14 = vmul.f32 %v2494_v28, %v4208_v7 }
 0x1cb   : > { %v2502_v37 = vmul.f32 %v2494_v28, %v4413_v19  ;;  %v2503_v26 = vadd.f32 %v2495_v48, %v2486_v4  ;;  %v2504_v34 = vadd.f32 %v2496_v23, %v2487_v25  ;;  %v2505_v10 = vadd.f32 %v2497_v33, %v2488_v9  ;;  %v2957_v9 = vld [vmem:[#allocation2 + $0xa0] sm:$0xff] }
 0x1cc   : > { %v2506_v38 = vadd.f32 %v2498_v18, %v2489_v35  ;;  %v2507_v39 = vadd.f32 %v2499_v58, %v2490_v12  ;;  %v2513_v1 = vrot.slane %v2956_v11, 1  ;;  %v2518_v47 = vrot.slane %v4413_v19, 1 }
 0x1cd   : > { %v2521_v44 = vrot.slane %v4491_v41, 1  ;;  %v2526_v55 = vrot.slane %v4493_v3, 1  ;;  %v4878_v51 = vrot.slane %v4271_v5, 1  ;;  %v4879_v52 = vrot.slane %v4273_v50, 1 }
 0x1ce   : > { %v2535_v40 = vperm.slane %v4419_v49, 4  ;;  %v2508_v61 = vadd.f32 %v2500_v31, %v2491_v53  ;;  %v2509_v30 = vadd.f32 %v2501_v14, %v2492_v6  ;;  %v2510_v0 = vadd.f32 %v2502_v37, %v2493_v32  ;;  %v4882_v14 = vld [vmem:[#allocation16_spill] sm:$0xff] }
 0x1cf   : > { %v2527_v7 = vsel %vm797_vm4, %v2511_v63, %v4878_v51  ;;  %v2528_v42 = vsel %vm797_vm4, %v2512_v27, %v4879_v52  ;;  %v2529_v54 = vsel %vm797_vm4, %v2513_v1, %v2521_v44  ;;  %v2534_v62 = vsel %vm797_vm4, %v2518_v47, %v2526_v55 }
 0x1d0   : > { %v2536_v5 = vmul.f32 %v2535_v40, %v2527_v7  ;;  %v2537_v15 = vmul.f32 %v2535_v40, %v2528_v42  ;;  %v2538_v59 = vmul.f32 %v2535_v40, %v2529_v54  ;;  %v2539_v17 = vmul.f32 %v2535_v40, %v4033_v16  ;;  %v4886_v54 = vld [vmem:[#allocation21_spill] sm:$0xff] }
 0x1d1   : > { %v2540_v50 = vmul.f32 %v2535_v40, %v4142_v8  ;;  %v2541_v28 = vmul.f32 %v2535_v40, %v4192_v43  ;;  %v2542_v29 = vmul.f32 %v2535_v40, %v4332_v57  ;;  %v2543_v20 = vmul.f32 %v2535_v40, %v2534_v62  ;;  %v4887_v62 = vld [vmem:[#allocation19_spill] sm:$0xff] }
 0x1d2   : > { %v2544_v22 = vadd.f32 %v2536_v5, %v2503_v26  ;;  %v2545_v56 = vadd.f32 %v2537_v15, %v2504_v34  ;;  %v2546_v13 = vadd.f32 %v2538_v59, %v2505_v10  ;;  %v2547_v45 = vadd.f32 %v2539_v17, %v2506_v38  ;;  %v4883_v26 = vld [vmem:[#allocation18_spill] sm:$0xff]  ;;  %v4888_v5 = vld [vmem:[#allocation12_spill] sm:$0xff] }
 0x1d3   : > { %v2548_v63 = vadd.f32 %v2540_v50, %v2507_v39  ;;  %v2559_v4 = vrot.slane %v4413_v19, 2  ;;  %v2562_v25 = vrot.slane %v4491_v41, 2  ;;  %v2563_v35 = vrot.slane %v2957_v9, 2  ;;  %v4890_v17 = vld [vmem:[#allocation20_spill] sm:$0xff] }
 0x1d4   : > { %v2549_v12 = vadd.f32 %v2541_v28, %v2508_v61  ;;  %v2567_v16 = vrot.slane %v4493_v3, 2  ;;  %v2576_v8 = vperm.slane %v4419_v49, 5  ;;  %v2550_v43 = vadd.f32 %v2542_v29, %v2509_v30 }
 0x1d5   : > { %v2551_v53 = vadd.f32 %v2543_v20, %v2510_v0  ;;  %v4880_v57 = vrot.slane %v4857_v36, 2  ;;  %v4881_v32 = vrot.slane %v3997_v21, 2  ;;  %v2600_v1 = vrot.slane %v4413_v19, 3 }
 0x1d6   : > { %v2575_v23 = vsel %vm839_vm5, %v2559_v4, %v2567_v16  ;;  %v2577_v11 = vmul.f32 %v2576_v8, %v4353_v2  ;;  %v2578_v33 = vmul.f32 %v2576_v8, %v4359_v60  ;;  %v2582_v58 = vmul.f32 %v2576_v8, %v4196_v46 }
 0x1d7   : > { %v2570_v6 = vsel %vm839_vm5, %v4880_v57, %v2562_v25  ;;  %v2571_v48 = vsel %vm839_vm5, %v4881_v32, %v2563_v35  ;;  %v2581_v37 = vmul.f32 %v2576_v8, %v4882_v14  ;;  %v2583_v34 = vmul.f32 %v2576_v8, %v4883_v26 }
 0x1d8   : > { %v2579_v18 = vmul.f32 %v2576_v8, %v2570_v6  ;;  %v2580_v31 = vmul.f32 %v2576_v8, %v2571_v48  ;;  %v2584_v10 = vmul.f32 %v2576_v8, %v2575_v23  ;;  %v2585_v38 = vadd.f32 %v2577_v11, %v2544_v22 }
 0x1d9   : > { %v2586_v39 = vadd.f32 %v2578_v33, %v2545_v56  ;;  %v2589_v44 = vadd.f32 %v2581_v37, %v2548_v63  ;;  %v2603_v2 = vrot.slane %v4491_v41, 3  ;;  %v2604_v60 = vrot.slane %v2957_v9, 3 }
 0x1da   : > { %v2587_v27 = vadd.f32 %v2579_v18, %v2546_v13  ;;  %v2588_v47 = vadd.f32 %v2580_v31, %v2547_v45  ;;  %v2590_v55 = vadd.f32 %v2582_v58, %v2549_v12  ;;  %v2608_v46 = vrot.slane %v4493_v3, 3 }
 0x1db   : > { %v2617_v51 = vperm.slane %v4419_v49, 6  ;;  %v2591_v7 = vadd.f32 %v2583_v34, %v2550_v43  ;;  %v2592_v52 = vadd.f32 %v2584_v10, %v2551_v53  ;;  %v4884_v42 = vrot.slane %v4857_v36, 3  ;;  %v2949_v36 = vld [vmem:[%s4603_s4] ss:$0 sm:$0xff] }
 0x1dc   : > { %v4885_v61 = vrot.slane %v3997_v21, 3  ;;  %v2616_v41 = vsel %vm881_vm6, %v2600_v1, %v2608_v46  ;;  %v4889_v21 = vld [vmem:[#allocation13_spill] sm:$0xff] }
 0x1dd   : > { %v2611_v40 = vsel %vm881_vm6, %v4884_v42, %v2603_v2  ;;  %v2618_v3 = vmul.f32 %v2617_v51, %v4886_v54  ;;  %v2619_v49 = vmul.f32 %v2617_v51, %v4887_v62  ;;  %v2622_v15 = vmul.f32 %v2617_v51, %v4888_v5 }
 0x1de   : > { %v2612_v19 = vsel %vm881_vm6, %v4885_v61, %v2604_v60  ;;  %v2620_v30 = vmul.f32 %v2617_v51, %v2611_v40  ;;  %v2623_v59 = vmul.f32 %v2617_v51, %v4889_v21  ;;  %v2624_v50 = vmul.f32 %v2617_v51, %v4890_v17 }
 0x1df   : > { %v2621_v0 = vmul.f32 %v2617_v51, %v2612_v19  ;;  %v2625_v28 = vmul.f32 %v2617_v51, %v2616_v41  ;;  %v2626_v24 = vadd.f32 %v2618_v3, %v2585_v38  ;;  %v2627_v29 = vadd.f32 %v2619_v49, %v2586_v39 }
 0x1e0   : > { %v2628_v20 = vadd.f32 %v2620_v30, %v2587_v27  ;;  %v2630_v56 = vadd.f32 %v2622_v15, %v2589_v44  ;;  %v2631_v13 = vadd.f32 %v2623_v59, %v2590_v55  ;;  %v2632_v45 = vadd.f32 %v2624_v50, %v2591_v7 }
 0x1e1   : > { %v2629_v22 = vadd.f32 %v2621_v0, %v2588_v47  ;;  %v2633_v63 = vadd.f32 %v2625_v28, %v2592_v52  ;;  %v2638_v4 = vadd.f32 %v2949_v36, %v2626_v24  ;;  %v2639_v25 = vadd.f32 %v2949_v36, %v2627_v29 }
 0x1e2   : > { %v2640_v9 = vadd.f32 %v2949_v36, %v2628_v20  ;;  %v2642_v12 = vadd.f32 %v2949_v36, %v2630_v56  ;;  %v2643_v16 = vadd.f32 %v2949_v36, %v2631_v13  ;;  %v2644_v8 = vadd.f32 %v2949_v36, %v2632_v45 }
 0x1e3   : > { %v2641_v35 = vadd.f32 %v2949_v36, %v2629_v22  ;;  %v2645_v43 = vadd.f32 %v2949_v36, %v2633_v63  ;;  %v2874_v53 = vpack.c.bf16 %v2639_v25, %v2638_v4 }
 0x1e4   : > { %v2884_v6 = vpack.c.bf16 %v2643_v16, %v2642_v12 }
 0x1e5   : > { %v2879_v57 = vpack.c.bf16 %v2641_v35, %v2640_v9  ;;  %2875 = vst [vmem:[%s3113_s12] sm:$0xff] %v2874_v53   ;;  %v2889_v32 = vpack.c.bf16 %v2645_v43, %v2644_v8 }
 0x1e6   : > { %2892 = vst [vmem:[%s3113_s12 + $0x10] sm:$0xff] %v2884_v6  }
 0x1e7   : > { %2891 = vst [vmem:[%s3113_s12 + $0x8] sm:$0xff] %v2879_v57  }
 0x1e8   : > { %2893 = vst [vmem:[%s3113_s12 + $0x18] sm:$0xff] %v2889_v32  }
 0x1e9   : > { %2985 = shalt.err (!%p2982_p4)
}
 0x1ea   : > { %s3023_s30 = smov 64   ;;  %s3024_s12 = smov 4  }
 0x1eb   : > { %2906 = dma.vmem_to_hbm [thread:$0]  (%p3093_p5), %s2676_s16, 512, %s2678_s17, %s2663_s23, %s3023_s30, %s3023_s30, %s3024_s12  }
 0x1ec PF: > { %p2912_p7 = scmp.ge.s32.totalorder %s3020_s21, 2  ;;  %s2692_s11 = sand.u32 1, %s3008_s18  }
 0x1ed   : > { %s2693_s13 = scalar_lea.sflag [#allocation4], %s2692_s11 }
 0x1ee   : > { %p2909_p8 = pnand %p2912_p7, %p3097_p6 }
 0x1f0   : > { %p2910_p9 = pneg %p2909_p8 }
 0x1f2   : > { %3003 = dma.done.wait (%p2910_p9), %s2693_s13, 512  }
 0x1f3   : > { %3005 = vsyncadd (%p2910_p9), %s2693_s13, 4294966784  ;;  %p15_p10 = scmp.ge.s32.totalorder %s3080_s24, 4   ;;  %s4891_s18 = smov %s3012_s19 }
 0x1f4   : > { %s4892_s19 = smov %s3016_s20  ;;  %s4893_s20 = smov %s3091_s27 }
 0x1f5   : > { %s4894_s21 = smov %s3080_s24  ;;  %17 = sbr.rel (!%p15_p10) target bundleno = 3 (0x3), region = 85 }
 0x1fa   :  { %2699 = vsyncpa [#allocation4], 1 }
 0x1fb   :  { %2701 = vsyncpa [#allocation4 + $0x1], 1 }

</bundles_post_ra>
